<compile_context>
chip_gen: v7x
topology: tpu7x:2x2x1
jax: 0.10.0
libtpu: 0.0.40
codegen_flags: <defaults>
</compile_context>

<pallas_src>
import functools

import numpy as np
import jax
import jax.numpy as jnp
from jax.experimental import pallas as pl
from jax.experimental.pallas import tpu as pltpu


_VMEM_LIMIT = 32 * 1024 * 1024   # >= scoped default on every generation, << physical VMEM
_ROW_TILE_CAP = 256              # >=128 rows keeps the MXU systolic array full


def _gelu(x):
    # tanh approximation of GELU (see TODO above).
    c = 0.7978845608028654  # sqrt(2/pi)
    return 0.5 * x * (1.0 + jnp.tanh(c * (x + 0.044715 * x * x * x)))


# -----------------------------------------------------------------------------
# Pallas kernel 1: fused  y = act(x @ W + b)  on a lane-dense row tile (MXU).
# -----------------------------------------------------------------------------
def _matmul_bias_act_kernel(x_ref, w_ref, b_ref, o_ref, *, activation):
    x = x_ref[...].astype(jnp.bfloat16)            # bf16 MXU operands
    acc = jnp.dot(x, w_ref[...], preferred_element_type=jnp.float32)
    acc = acc + b_ref[...]                         # f32 epilogue (v5e-safe)
    if activation == "gelu":
        acc = _gelu(acc)
    o_ref[...] = acc.astype(o_ref.dtype)


def _row_tile(m):
    # Whole M for small inputs (block == full dim), otherwise a 256-row tile
    # (multiple of 8) with a masked partial tail block.
    return m if m <= _ROW_TILE_CAP else _ROW_TILE_CAP


def matmul_bias_act(x2d, w_bf16, b_f32, activation=None):
    """y = act(x2d @ w + b);  x2d (M,K) f32, w (K,N) bf16, b (N,) f32 -> (M,N) f32."""
    m, k = x2d.shape
    kw, n = w_bf16.shape
    assert k == kw
    tm = _row_tile(m)
    grid = (pl.cdiv(m, tm),)       # no jnp.pad copy: Pallas masks the partial tail block
    kernel = functools.partial(_matmul_bias_act_kernel, activation=activation)
    return pl.pallas_call(
        kernel,
        out_shape=jax.ShapeDtypeStruct((m, n), jnp.float32),
        grid=grid,
        in_specs=[
            pl.BlockSpec((tm, k), lambda i: (i, 0)),   # row tile of activations
            pl.BlockSpec((k, n), lambda i: (0, 0)),    # weights resident (DMA'd once)
            pl.BlockSpec((1, n), lambda i: (0, 0)),    # bias row
        ],
        out_specs=pl.BlockSpec((tm, n), lambda i: (i, 0)),
        compiler_params=pltpu.CompilerParams(
            dimension_semantics=("parallel",),
            vmem_limit_bytes=_VMEM_LIMIT,
        ),
    )(x2d, w_bf16, b_f32.reshape(1, n))


# -----------------------------------------------------------------------------
# Pallas kernel 2: fused GroupNorm (+ optional GELU), one batch element per step.
# Per-group stats are computed with a lane-dense (1,C)@(C,C) group-averaging matmul.
# -----------------------------------------------------------------------------
def _groupnorm_gelu_kernel(x_ref, p_ref, g_ref, beta_ref, o_ref, *,
                           group_size, eps, apply_gelu):
    x = x_ref[0]                                           # (N, C) f32
    n = x.shape[0]
    cnt = jnp.float32(n * group_size)
    s = jnp.sum(x, axis=0, keepdims=True)                  # (1, C)
    sq = jnp.sum(x * x, axis=0, keepdims=True)             # (1, C)
    mu_c = jnp.dot(s, p_ref[...], preferred_element_type=jnp.float32) / cnt    # (1, C)
    ex2_c = jnp.dot(sq, p_ref[...], preferred_element_type=jnp.float32) / cnt  # (1, C)
    var_c = ex2_c - mu_c * mu_c
    y = (x - mu_c) * jax.lax.rsqrt(var_c + eps) * g_ref[...] + beta_ref[...]
    if apply_gelu:
        y = _gelu(y)
    o_ref[0] = y.astype(o_ref.dtype)


def groupnorm_gelu(x, gamma, beta, num_groups, *, eps=1e-5, apply_gelu=True):
    b, n, c = x.shape
    gsize = c // num_groups
    grp = np.arange(c) // gsize
    pmat = jnp.asarray(grp[:, None] == grp[None, :], jnp.float32)   # (C, C) group mask
    kernel = functools.partial(_groupnorm_gelu_kernel, group_size=gsize, eps=eps,
                               apply_gelu=apply_gelu)
    return pl.pallas_call(
        kernel,
        out_shape=jax.ShapeDtypeStruct((b, n, c), jnp.float32),
        grid=(b,),
        in_specs=[
            pl.BlockSpec((1, n, c), lambda i: (i, 0, 0)),
            pl.BlockSpec((c, c), lambda i: (0, 0)),
            pl.BlockSpec((1, c), lambda i: (0, 0)),
            pl.BlockSpec((1, c), lambda i: (0, 0)),
        ],
        out_specs=pl.BlockSpec((1, n, c), lambda i: (i, 0, 0)),
        compiler_params=pltpu.CompilerParams(
            dimension_semantics=("parallel",),
            vmem_limit_bytes=_VMEM_LIMIT,
        ),
    )(x, pmat, gamma.reshape(1, c), beta.reshape(1, c))


# -----------------------------------------------------------------------------
# Conv1d (feature-last) = cheap im2col in JAX + one fused Pallas matmul.
# -----------------------------------------------------------------------------
def _im2col_1d(x, kernel_size, stride, padding):
    b, n, c = x.shape
    xp = jnp.pad(x, ((0, 0), (padding, padding), (0, 0)))
    n_out = (n + 2 * padding - kernel_size) // stride + 1
    taps = [xp[:, k:k + stride * (n_out - 1) + 1:stride, :] for k in range(kernel_size)]
    return jnp.concatenate(taps, axis=-1), n_out


def conv1d(x, w_bf16, b_f32, *, kernel_size, stride=1, padding=0, activation=None):
    """Conv1d on feature-last (B, N, C_in) -> (B, N_out, C_out).
    Weight layout: (kernel_size*C_in, C_out), tap-major rows."""
    b, n, c = x.shape
    if kernel_size == 1 and stride == 1 and padding == 0:
        cols, n_out = x, n
    else:
        cols, n_out = _im2col_1d(x, kernel_size, stride, padding)
    y = matmul_bias_act(cols.reshape(b * n_out, -1), w_bf16, b_f32, activation)
    return y.reshape(b, n_out, -1)


# -----------------------------------------------------------------------------
# Parameters (PyTorch-style uniform init, weights stored bf16 / biases f32).
# -----------------------------------------------------------------------------
def _init_linear(key, fan_in, shape_w, shape_b):
    kw, kb = jax.random.split(key)
    bound = 1.0 / np.sqrt(fan_in)
    w = jax.random.uniform(kw, shape_w, jnp.float32, -bound, bound)
    b = jax.random.uniform(kb, shape_b, jnp.float32, -bound, bound)
    return w.astype(jnp.bfloat16), b


def make_params(key, *, motion_dim_body, motion_dim_hand, dim_body, dim_hand,
                dec_dim, down_sampling_ratio, codebook_dim, codebook_size):
    n_down = int(np.log2(down_sampling_ratio))
    d_in = motion_dim_body + motion_dim_hand
    keys = iter(jax.random.split(key, 64))

    def conv_p(cin, cout, ksize, bias=True):
        w, b = _init_linear(next(keys), cin * ksize, (ksize * cin, cout), (cout,))
        if not bias:
            b = jnp.zeros((cout,), jnp.float32)
        return {"w": w, "b": b}

    encoder = {
        "down": [
            {**conv_p(d_in, d_in, 3, bias=False),
             "gamma": jnp.ones((d_in,), jnp.float32),
             "beta": jnp.zeros((d_in,), jnp.float32)}
            for _ in range(n_down)
        ],
        "body_conv": conv_p(motion_dim_body, dim_body, 3, bias=True),
        "hand_conv": conv_p(motion_dim_hand, dim_hand, 3, bias=True),
    }

    def vq_p(dim):
        w_in, b_in = _init_linear(next(keys), dim, (dim, codebook_dim), (codebook_dim,))
        w_out, b_out = _init_linear(next(keys), codebook_dim, (codebook_dim, dim), (dim,))
        cb = jax.random.normal(next(keys), (codebook_size, codebook_dim), jnp.float32)
        return {"w_in": w_in, "b_in": b_in, "w_out": w_out, "b_out": b_out,
                "codebook": cb, "codebook_t": cb.T.astype(jnp.bfloat16)}

    decoder = {
        "fuse": conv_p(dim_body + dim_hand, dec_dim, 1, bias=True),
        "up_mid": [
            {**conv_p(dec_dim, dec_dim, 3, bias=False),
             "gamma": jnp.ones((dec_dim,), jnp.float32),
             "beta": jnp.zeros((dec_dim,), jnp.float32)}
            for _ in range(n_down - 1)
        ],
        "up_final": conv_p(dec_dim, d_in, 3, bias=False),
    }
    return {"encoder": encoder, "vq_body": vq_p(dim_body), "vq_hand": vq_p(dim_hand),
            "decoder": decoder}


# -----------------------------------------------------------------------------
# Model forward (mask=None path of ConformerVQMotionModel.forward).
# -----------------------------------------------------------------------------
def encoder_forward(enc, x_body, x_hand):
    d_body = x_body.shape[-1]
    x = jnp.concatenate([x_body, x_hand], axis=-1)            # (B, N, d_body + d_hand)
    for st in enc["down"]:                                    # Conv(s=2) -> GN(1) -> GELU
        x = conv1d(x, st["w"], st["b"], kernel_size=3, stride=2, padding=1)
        x = groupnorm_gelu(x, st["gamma"], st["beta"], num_groups=1)
    xb = x[..., :d_body]
    xh = x[..., d_body:]
    xb = conv1d(xb, enc["body_conv"]["w"], enc["body_conv"]["b"],
                kernel_size=3, stride=1, padding=1)
    xh = conv1d(xh, enc["hand_conv"]["w"], enc["hand_conv"]["b"],
                kernel_size=3, stride=1, padding=1)
    # TODO(synk): hand_model / body_model ConformerBlock stacks -> identity.
    return xh, xb


def vq_forward(vq, z):
    b, n, d = z.shape
    z_in = matmul_bias_act(z.reshape(-1, d), vq["w_in"], vq["b_in"])        # project_in
    score_bias = -0.5 * jnp.sum(vq["codebook"] * vq["codebook"], axis=-1)   # (K,)
    scores = matmul_bias_act(z_in, vq["codebook_t"], score_bias)            # argmax == NN
    idx = jnp.argmax(scores, axis=-1)
    codes = jnp.take(vq["codebook"], idx, axis=0)                           # (M, cd)
    commit = jnp.mean((z_in - codes) ** 2)
    q = matmul_bias_act(codes, vq["w_out"], vq["b_out"])                    # project_out
    return q.reshape(b, n, d), idx.reshape(b, n), commit


def decoder_forward(dec, x):
    x = conv1d(x, dec["fuse"]["w"], dec["fuse"]["b"], kernel_size=1)  # body_hand_fuse 1x1
    # TODO(synk): decoder ConformerBlock stack -> identity.
    for st in dec["up_mid"]:                                   # Up(x2) -> Conv -> GN -> GELU
        x = jnp.repeat(x, 2, axis=1)                           # nearest upsample
        x = conv1d(x, st["w"], st["b"], kernel_size=3, stride=1, padding=1)
        x = groupnorm_gelu(x, st["gamma"], st["beta"],
                           num_groups=st["gamma"].shape[0] // 8)
    x = jnp.repeat(x, 2, axis=1)                               # final Up -> Conv -> GELU
    x = conv1d(x, dec["up_final"]["w"], dec["up_final"]["b"],
               kernel_size=3, stride=1, padding=1, activation="gelu")
    return x


def conformer_vq_motion_forward(params, motion_input_body, motion_input_hands):
    emb_hand, emb_body = encoder_forward(params["encoder"],
                                         motion_input_body, motion_input_hands)
    q_hand, idx_hand, commit_hand = vq_forward(params["vq_hand"], emb_hand)
    q_body, idx_body, commit_body = vq_forward(params["vq_body"], emb_body)
    quantized = jnp.concatenate([q_body, q_hand], axis=-1)
    indices = jnp.stack([idx_body, idx_hand], axis=-1)
    decoded = decoder_forward(params["decoder"], quantized)
    return decoded, indices, commit_body, commit_hand


# -----------------------------------------------------------------------------
# Plain-JAX references for kernel unit checks.
# -----------------------------------------------------------------------------
def _ref_matmul_bias_act(x, w_bf16, b, activation=None):
    y = jnp.dot(x.astype(jnp.bfloat16), w_bf16, preferred_element_type=jnp.float32) + b
    return _gelu(y) if activation == "gelu" else y


def _ref_groupnorm_gelu(x, gamma, beta, num_groups, eps=1e-5):
    b, n, c = x.shape
    gsz = c // num_groups
    xg = x.reshape(b, n, num_groups, gsz)
    mu = jnp.mean(xg, axis=(1, 3), keepdims=True)
    var = jnp.mean(xg * xg, axis=(1, 3), keepdims=True) - mu * mu
    y = (xg - mu) * jax.lax.rsqrt(var + eps)
    return _gelu(y.reshape(b, n, c) * gamma + beta)


if __name__ == "__main__":
    key = jax.random.PRNGKey(0)
    kp, kb, kh, kt = jax.random.split(key, 4)

    # Small, module-consistent shapes with lane-dense (128-multiple) feature dims.
    B, N = 2, 16
    MOTION_BODY, MOTION_HAND = 128, 128
    DIM_BODY, DIM_HAND, DEC_DIM = 128, 128, 128
    RATIO, CB_DIM, CB_SIZE = 4, 128, 256

    params = make_params(kp, motion_dim_body=MOTION_BODY, motion_dim_hand=MOTION_HAND,
                         dim_body=DIM_BODY, dim_hand=DIM_HAND, dec_dim=DEC_DIM,
                         down_sampling_ratio=RATIO, codebook_dim=CB_DIM,
                         codebook_size=CB_SIZE)
    x_body = jax.random.normal(kb, (B, N, MOTION_BODY), jnp.float32)
    x_hand = jax.random.normal(kh, (B, N, MOTION_HAND), jnp.float32)

    fwd = jax.jit(conformer_vq_motion_forward)
    decoded, indices, commit_body, commit_hand = jax.block_until_ready(
        fwd(params, x_body, x_hand))

    # Shape / sanity checks on the full forward pass.
    assert decoded.shape == (B, N, MOTION_BODY + MOTION_HAND)
    assert indices.shape == (B, N // RATIO, 2)
    assert bool(jnp.all(jnp.isfinite(decoded)))
    assert bool(jnp.isfinite(commit_body)) and bool(jnp.isfinite(commit_hand))

    # Unit checks of each Pallas kernel against a plain-JAX reference.
    # (M=300 also exercises the masked partial tail tile of the 256-row grid.)
    xt = jax.random.normal(kt, (300, 384), jnp.float32)
    wt = (0.05 * jax.random.normal(jax.random.fold_in(kt, 1), (384, 256),
                                   jnp.float32)).astype(jnp.bfloat16)
    bt = 0.1 * jax.random.normal(jax.random.fold_in(kt, 2), (256,), jnp.float32)
    got = matmul_bias_act(xt, wt, bt, activation="gelu")
    want = _ref_matmul_bias_act(xt, wt, bt, activation="gelu")
    np.testing.assert_allclose(np.asarray(got), np.asarray(want), atol=2e-3, rtol=2e-3)

    xg = jax.random.normal(jax.random.fold_in(kt, 3), (2, 12, 128), jnp.float32)
    gamma = 1.0 + 0.1 * jax.random.normal(jax.random.fold_in(kt, 4), (128,), jnp.float32)
    beta = 0.1 * jax.random.normal(jax.random.fold_in(kt, 5), (128,), jnp.float32)
    got_gn = groupnorm_gelu(xg, gamma, beta, num_groups=16)
    want_gn = _ref_groupnorm_gelu(xg, gamma, beta, num_groups=16)
    np.testing.assert_allclose(np.asarray(got_gn), np.asarray(want_gn),
                               atol=2e-3, rtol=2e-3)

    print("KERNEL_OK")
</pallas_src>

<mosaic_0001>
module attributes {stable_mosaic.version = 11 : i64} {
  func.func @_matmul_bias_act_kernel(%arg0: i32, %arg1: memref<16x768xf32, #tpu.memory_space<vmem>>, %arg2: memref<768x256xbf16, #tpu.memory_space<vmem>>, %arg3: memref<1x256xf32, #tpu.memory_space<vmem>>, %arg4: memref<16x256xf32, #tpu.memory_space<vmem>>) attributes {dimension_semantics = [#tpu.dimension_semantics<parallel>], iteration_bounds = array<i64: 1>, scalar_prefetch = 0 : i64, scratch_operands = 0 : i64, tpu.core_type = #tpu.core_type<tc>, window_params = [{transform_indices = @transform_0, window_bounds = array<i64: 16, 768>}, {pipeline_mode = #tpu.pipeline_mode<synchronous>, transform_indices = @transform_1, window_bounds = array<i64: 768, 256>}, {pipeline_mode = #tpu.pipeline_mode<synchronous>, transform_indices = @transform_2, window_bounds = array<i64: 1, 256>}, {transform_indices = @transform_3, window_bounds = array<i64: 16, 256>}]} {
    %c0 = arith.constant 0 : index
    %c0_0 = arith.constant 0 : index
    %0 = vector.load %arg1[%c0, %c0_0] : memref<16x768xf32, #tpu.memory_space<vmem>>, vector<16x768xf32>
    %1 = arith.truncf %0 : vector<16x768xf32> to vector<16x768xbf16>
    %c0_1 = arith.constant 0 : index
    %c0_2 = arith.constant 0 : index
    %2 = vector.load %arg2[%c0_1, %c0_2] : memref<768x256xbf16, #tpu.memory_space<vmem>>, vector<768x256xbf16>
    %cst = arith.constant dense<0.000000e+00> : vector<16x256xf32>
    %3 = tpu.matmul %1, %2, %cst {dimension_numbers = #tpu.dot_dimension_numbers<[1], [0], [0], [1], [0, 0, 1, 1], [], []>} : vector<16x768xbf16>, vector<768x256xbf16>, vector<16x256xf32> -> vector<16x256xf32>
    %c0_3 = arith.constant 0 : index
    %c0_4 = arith.constant 0 : index
    %4 = vector.load %arg3[%c0_3, %c0_4] : memref<1x256xf32, #tpu.memory_space<vmem>>, vector<1x256xf32>
    %5 = vector.broadcast %4 : vector<1x256xf32> to vector<16x256xf32>
    %6 = arith.addf %3, %5 : vector<16x256xf32>
    %c0_5 = arith.constant 0 : index
    %c0_6 = arith.constant 0 : index
    %7 = vector.load %arg4[%c0_5, %c0_6] : memref<16x256xf32, #tpu.memory_space<vmem>>, vector<16x256xf32>
    tpu.vector_store %arg4[%c0_5, %c0_6], %6 {strides = array<i32>} : memref<16x256xf32, #tpu.memory_space<vmem>>, vector<16x256xf32>,
    return
  }
  func.func @transform_0(%arg0: i32) -> (i32, i32) {
    %c0_i32 = arith.constant 0 : i32
    %c0_i32_0 = arith.constant 0 : i32
    return %arg0, %c0_i32 : i32, i32
  }
  func.func @transform_1(%arg0: i32) -> (i32, i32) {
    %c0_i32 = arith.constant 0 : i32
    %c0_i32_0 = arith.constant 0 : i32
    %c0_i32_1 = arith.constant 0 : i32
    return %c0_i32, %c0_i32_0 : i32, i32
  }
  func.func @transform_2(%arg0: i32) -> (i32, i32) {
    %c0_i32 = arith.constant 0 : i32
    %c0_i32_0 = arith.constant 0 : i32
    %c0_i32_1 = arith.constant 0 : i32
    return %c0_i32, %c0_i32_0 : i32, i32
  }
  func.func @transform_3(%arg0: i32) -> (i32, i32) {
    %c0_i32 = arith.constant 0 : i32
    %c0_i32_0 = arith.constant 0 : i32
    return %arg0, %c0_i32 : i32, i32
  }
}

module attributes {stable_mosaic.version = 11 : i64} {
  func.func @_groupnorm_gelu_kernel(%arg0: i32, %arg1: memref<1x8x256xf32, #tpu.memory_space<vmem>>, %arg2: memref<256x256xf32, #tpu.memory_space<vmem>>, %arg3: memref<1x256xf32, #tpu.memory_space<vmem>>, %arg4: memref<1x256xf32, #tpu.memory_space<vmem>>, %arg5: memref<1x8x256xf32, #tpu.memory_space<vmem>>) attributes {dimension_semantics = [#tpu.dimension_semantics<parallel>], iteration_bounds = array<i64: 2>, scalar_prefetch = 0 : i64, scratch_operands = 0 : i64, tpu.core_type = #tpu.core_type<tc>, window_params = [{transform_indices = @transform_0, window_bounds = array<i64: 1, 8, 256>}, {pipeline_mode = #tpu.pipeline_mode<synchronous>, transform_indices = @transform_1, window_bounds = array<i64: 256, 256>}, {pipeline_mode = #tpu.pipeline_mode<synchronous>, transform_indices = @transform_2, window_bounds = array<i64: 1, 256>}, {pipeline_mode = #tpu.pipeline_mode<synchronous>, transform_indices = @transform_3, window_bounds = array<i64: 1, 256>}, {transform_indices = @transform_4, window_bounds = array<i64: 1, 8, 256>}]} {
    %c0 = arith.constant 0 : index
    %c0_0 = arith.constant 0 : index
    %c0_1 = arith.constant 0 : index
    %0 = vector.load %arg1[%c0, %c0_0, %c0_1] : memref<1x8x256xf32, #tpu.memory_space<vmem>>, vector<1x8x256xf32>
    %1 = vector.shape_cast %0 : vector<1x8x256xf32> to vector<8x256xf32>
    %cst = arith.constant dense<0.000000e+00> : vector<256xf32>
    %2 = vector.multi_reduction <add>, %1, %cst [0] : vector<8x256xf32> to vector<256xf32>
    %3 = vector.shape_cast %2 : vector<256xf32> to vector<1x256xf32>
    %4 = arith.mulf %1, %1 : vector<8x256xf32>
    %cst_2 = arith.constant dense<0.000000e+00> : vector<256xf32>
    %5 = vector.multi_reduction <add>, %4, %cst_2 [0] : vector<8x256xf32> to vector<256xf32>
    %6 = vector.shape_cast %5 : vector<256xf32> to vector<1x256xf32>
    %c0_3 = arith.constant 0 : index
    %c0_4 = arith.constant 0 : index
    %7 = vector.load %arg2[%c0_3, %c0_4] : memref<256x256xf32, #tpu.memory_space<vmem>>, vector<256x256xf32>
    %cst_5 = arith.constant dense<0.000000e+00> : vector<1x256xf32>
    %8 = tpu.matmul %3, %7, %cst_5 {dimension_numbers = #tpu.dot_dimension_numbers<[1], [0], [0], [1], [0, 0, 1, 1], [], []>} : vector<1x256xf32>, vector<256x256xf32>, vector<1x256xf32> -> vector<1x256xf32>
    %cst_6 = arith.constant 2.048000e+03 : f32
    %9 = vector.broadcast %cst_6 : f32 to vector<1x256xf32>
    %10 = arith.divf %8, %9 : vector<1x256xf32>
    %c0_7 = arith.constant 0 : index
    %c0_8 = arith.constant 0 : index
    %11 = vector.load %arg2[%c0_7, %c0_8] : memref<256x256xf32, #tpu.memory_space<vmem>>, vector<256x256xf32>
    %cst_9 = arith.constant dense<0.000000e+00> : vector<1x256xf32>
    %12 = tpu.matmul %6, %11, %cst_9 {dimension_numbers = #tpu.dot_dimension_numbers<[1], [0], [0], [1], [0, 0, 1, 1], [], []>} : vector<1x256xf32>, vector<256x256xf32>, vector<1x256xf32> -> vector<1x256xf32>
    %cst_10 = arith.constant 2.048000e+03 : f32
    %13 = vector.broadcast %cst_10 : f32 to vector<1x256xf32>
    %14 = arith.divf %12, %13 : vector<1x256xf32>
    %15 = arith.mulf %10, %10 : vector<1x256xf32>
    %16 = arith.subf %14, %15 : vector<1x256xf32>
    %17 = vector.broadcast %10 : vector<1x256xf32> to vector<8x256xf32>
    %18 = arith.subf %1, %17 : vector<8x256xf32>
    %cst_11 = arith.constant 9.99999974E-6 : f32
    %19 = vector.broadcast %cst_11 : f32 to vector<1x256xf32>
    %20 = arith.addf %16, %19 : vector<1x256xf32>
    %21 = math.rsqrt %20 : vector<1x256xf32>
    %22 = vector.broadcast %21 : vector<1x256xf32> to vector<8x256xf32>
    %23 = arith.mulf %18, %22 : vector<8x256xf32>
    %c0_12 = arith.constant 0 : index
    %c0_13 = arith.constant 0 : index
    %24 = vector.load %arg3[%c0_12, %c0_13] : memref<1x256xf32, #tpu.memory_space<vmem>>, vector<1x256xf32>
    %25 = vector.broadcast %24 : vector<1x256xf32> to vector<8x256xf32>
    %26 = arith.mulf %23, %25 : vector<8x256xf32>
    %c0_14 = arith.constant 0 : index
    %c0_15 = arith.constant 0 : index
    %27 = vector.load %arg4[%c0_14, %c0_15] : memref<1x256xf32, #tpu.memory_space<vmem>>, vector<1x256xf32>
    %28 = vector.broadcast %27 : vector<1x256xf32> to vector<8x256xf32>
    %29 = arith.addf %26, %28 : vector<8x256xf32>
    %cst_16 = arith.constant 5.000000e-01 : f32
    %30 = vector.broadcast %cst_16 : f32 to vector<8x256xf32>
    %31 = arith.mulf %30, %29 : vector<8x256xf32>
    %cst_17 = arith.constant 4.471500e-02 : f32
    %32 = vector.broadcast %cst_17 : f32 to vector<8x256xf32>
    %33 = arith.mulf %32, %29 : vector<8x256xf32>
    %34 = arith.mulf %33, %29 : vector<8x256xf32>
    %35 = arith.mulf %34, %29 : vector<8x256xf32>
    %36 = arith.addf %29, %35 : vector<8x256xf32>
    %cst_18 = arith.constant 0.797884583 : f32
    %37 = vector.broadcast %cst_18 : f32 to vector<8x256xf32>
    %38 = arith.mulf %37, %36 : vector<8x256xf32>
    %39 = math.tanh %38 : vector<8x256xf32>
    %cst_19 = arith.constant 1.000000e+00 : f32
    %40 = vector.broadcast %cst_19 : f32 to vector<8x256xf32>
    %41 = arith.addf %40, %39 : vector<8x256xf32>
    %42 = arith.mulf %31, %41 : vector<8x256xf32>
    %c0_20 = arith.constant 0 : index
    %c0_21 = arith.constant 0 : index
    %c0_22 = arith.constant 0 : index
    %43 = vector.load %arg5[%c0_20, %c0_21, %c0_22] : memref<1x8x256xf32, #tpu.memory_space<vmem>>, vector<1x8x256xf32>
    %44 = vector.shape_cast %43 : vector<1x8x256xf32> to vector<8x256xf32>
    %45 = vector.shape_cast %42 : vector<8x256xf32> to vector<1x8x256xf32>
    tpu.vector_store %arg5[%c0_20, %c0_21, %c0_22], %45 {strides = array<i32>} : memref<1x8x256xf32, #tpu.memory_space<vmem>>, vector<1x8x256xf32>,
    return
  }
  func.func @transform_0(%arg0: i32) -> (i32, i32, i32) {
    %c0_i32 = arith.constant 0 : i32
    %c0_i32_0 = arith.constant 0 : i32
    %c0_i32_1 = arith.constant 0 : i32
    return %arg0, %c0_i32, %c0_i32_0 : i32, i32, i32
  }
  func.func @transform_1(%arg0: i32) -> (i32, i32) {
    %c0_i32 = arith.constant 0 : i32
    %c0_i32_0 = arith.constant 0 : i32
    %c0_i32_1 = arith.constant 0 : i32
    return %c0_i32, %c0_i32_0 : i32, i32
  }
  func.func @transform_2(%arg0: i32) -> (i32, i32) {
    %c0_i32 = arith.constant 0 : i32
    %c0_i32_0 = arith.constant 0 : i32
    %c0_i32_1 = arith.constant 0 : i32
    return %c0_i32, %c0_i32_0 : i32, i32
  }
  func.func @transform_3(%arg0: i32) -> (i32, i32) {
    %c0_i32 = arith.constant 0 : i32
    %c0_i32_0 = arith.constant 0 : i32
    %c0_i32_1 = arith.constant 0 : i32
    return %c0_i32, %c0_i32_0 : i32, i32
  }
  func.func @transform_4(%arg0: i32) -> (i32, i32, i32) {
    %c0_i32 = arith.constant 0 : i32
    %c0_i32_0 = arith.constant 0 : i32
    %c0_i32_1 = arith.constant 0 : i32
    return %arg0, %c0_i32, %c0_i32_0 : i32, i32, i32
  }
}

module attributes {stable_mosaic.version = 11 : i64} {
  func.func @_matmul_bias_act_kernel(%arg0: i32, %arg1: memref<8x768xf32, #tpu.memory_space<vmem>>, %arg2: memref<768x256xbf16, #tpu.memory_space<vmem>>, %arg3: memref<1x256xf32, #tpu.memory_space<vmem>>, %arg4: memref<8x256xf32, #tpu.memory_space<vmem>>) attributes {dimension_semantics = [#tpu.dimension_semantics<parallel>], iteration_bounds = array<i64: 1>, scalar_prefetch = 0 : i64, scratch_operands = 0 : i64, tpu.core_type = #tpu.core_type<tc>, window_params = [{transform_indices = @transform_0, window_bounds = array<i64: 8, 768>}, {pipeline_mode = #tpu.pipeline_mode<synchronous>, transform_indices = @transform_1, window_bounds = array<i64: 768, 256>}, {pipeline_mode = #tpu.pipeline_mode<synchronous>, transform_indices = @transform_2, window_bounds = array<i64: 1, 256>}, {transform_indices = @transform_3, window_bounds = array<i64: 8, 256>}]} {
    %c0 = arith.constant 0 : index
    %c0_0 = arith.constant 0 : index
    %0 = vector.load %arg1[%c0, %c0_0] : memref<8x768xf32, #tpu.memory_space<vmem>>, vector<8x768xf32>
    %1 = arith.truncf %0 : vector<8x768xf32> to vector<8x768xbf16>
    %c0_1 = arith.constant 0 : index
    %c0_2 = arith.constant 0 : index
    %2 = vector.load %arg2[%c0_1, %c0_2] : memref<768x256xbf16, #tpu.memory_space<vmem>>, vector<768x256xbf16>
    %cst = arith.constant dense<0.000000e+00> : vector<8x256xf32>
    %3 = tpu.matmul %1, %2, %cst {dimension_numbers = #tpu.dot_dimension_numbers<[1], [0], [0], [1], [0, 0, 1, 1], [], []>} : vector<8x768xbf16>, vector<768x256xbf16>, vector<8x256xf32> -> vector<8x256xf32>
    %c0_3 = arith.constant 0 : index
    %c0_4 = arith.constant 0 : index
    %4 = vector.load %arg3[%c0_3, %c0_4] : memref<1x256xf32, #tpu.memory_space<vmem>>, vector<1x256xf32>
    %5 = vector.broadcast %4 : vector<1x256xf32> to vector<8x256xf32>
    %6 = arith.addf %3, %5 : vector<8x256xf32>
    %c0_5 = arith.constant 0 : index
    %c0_6 = arith.constant 0 : index
    %7 = vector.load %arg4[%c0_5, %c0_6] : memref<8x256xf32, #tpu.memory_space<vmem>>, vector<8x256xf32>
    tpu.vector_store %arg4[%c0_5, %c0_6], %6 {strides = array<i32>} : memref<8x256xf32, #tpu.memory_space<vmem>>, vector<8x256xf32>,
    return
  }
  func.func @transform_0(%arg0: i32) -> (i32, i32) {
    %c0_i32 = arith.constant 0 : i32
    %c0_i32_0 = arith.constant 0 : i32
    return %arg0, %c0_i32 : i32, i32
  }
  func.func @transform_1(%arg0: i32) -> (i32, i32) {
    %c0_i32 = arith.constant 0 : i32
    %c0_i32_0 = arith.constant 0 : i32
    %c0_i32_1 = arith.constant 0 : i32
    return %c0_i32, %c0_i32_0 : i32, i32
  }
  func.func @transform_2(%arg0: i32) -> (i32, i32) {
    %c0_i32 = arith.constant 0 : i32
    %c0_i32_0 = arith.constant 0 : i32
    %c0_i32_1 = arith.constant 0 : i32
    return %c0_i32, %c0_i32_0 : i32, i32
  }
  func.func @transform_3(%arg0: i32) -> (i32, i32) {
    %c0_i32 = arith.constant 0 : i32
    %c0_i32_0 = arith.constant 0 : i32
    return %arg0, %c0_i32 : i32, i32
  }
}

module attributes {stable_mosaic.version = 11 : i64} {
  func.func @_groupnorm_gelu_kernel(%arg0: i32, %arg1: memref<1x4x256xf32, #tpu.memory_space<vmem>>, %arg2: memref<256x256xf32, #tpu.memory_space<vmem>>, %arg3: memref<1x256xf32, #tpu.memory_space<vmem>>, %arg4: memref<1x256xf32, #tpu.memory_space<vmem>>, %arg5: memref<1x4x256xf32, #tpu.memory_space<vmem>>) attributes {dimension_semantics = [#tpu.dimension_semantics<parallel>], iteration_bounds = array<i64: 2>, scalar_prefetch = 0 : i64, scratch_operands = 0 : i64, tpu.core_type = #tpu.core_type<tc>, window_params = [{transform_indices = @transform_0, window_bounds = array<i64: 1, 4, 256>}, {pipeline_mode = #tpu.pipeline_mode<synchronous>, transform_indices = @transform_1, window_bounds = array<i64: 256, 256>}, {pipeline_mode = #tpu.pipeline_mode<synchronous>, transform_indices = @transform_2, window_bounds = array<i64: 1, 256>}, {pipeline_mode = #tpu.pipeline_mode<synchronous>, transform_indices = @transform_3, window_bounds = array<i64: 1, 256>}, {transform_indices = @transform_4, window_bounds = array<i64: 1, 4, 256>}]} {
    %c0 = arith.constant 0 : index
    %c0_0 = arith.constant 0 : index
    %c0_1 = arith.constant 0 : index
    %0 = vector.load %arg1[%c0, %c0_0, %c0_1] : memref<1x4x256xf32, #tpu.memory_space<vmem>>, vector<1x4x256xf32>
    %1 = vector.shape_cast %0 : vector<1x4x256xf32> to vector<4x256xf32>
    %cst = arith.constant dense<0.000000e+00> : vector<256xf32>
    %2 = vector.multi_reduction <add>, %1, %cst [0] : vector<4x256xf32> to vector<256xf32>
    %3 = vector.shape_cast %2 : vector<256xf32> to vector<1x256xf32>
    %4 = arith.mulf %1, %1 : vector<4x256xf32>
    %cst_2 = arith.constant dense<0.000000e+00> : vector<256xf32>
    %5 = vector.multi_reduction <add>, %4, %cst_2 [0] : vector<4x256xf32> to vector<256xf32>
    %6 = vector.shape_cast %5 : vector<256xf32> to vector<1x256xf32>
    %c0_3 = arith.constant 0 : index
    %c0_4 = arith.constant 0 : index
    %7 = vector.load %arg2[%c0_3, %c0_4] : memref<256x256xf32, #tpu.memory_space<vmem>>, vector<256x256xf32>
    %cst_5 = arith.constant dense<0.000000e+00> : vector<1x256xf32>
    %8 = tpu.matmul %3, %7, %cst_5 {dimension_numbers = #tpu.dot_dimension_numbers<[1], [0], [0], [1], [0, 0, 1, 1], [], []>} : vector<1x256xf32>, vector<256x256xf32>, vector<1x256xf32> -> vector<1x256xf32>
    %cst_6 = arith.constant 1.024000e+03 : f32
    %9 = vector.broadcast %cst_6 : f32 to vector<1x256xf32>
    %10 = arith.divf %8, %9 : vector<1x256xf32>
    %c0_7 = arith.constant 0 : index
    %c0_8 = arith.constant 0 : index
    %11 = vector.load %arg2[%c0_7, %c0_8] : memref<256x256xf32, #tpu.memory_space<vmem>>, vector<256x256xf32>
    %cst_9 = arith.constant dense<0.000000e+00> : vector<1x256xf32>
    %12 = tpu.matmul %6, %11, %cst_9 {dimension_numbers = #tpu.dot_dimension_numbers<[1], [0], [0], [1], [0, 0, 1, 1], [], []>} : vector<1x256xf32>, vector<256x256xf32>, vector<1x256xf32> -> vector<1x256xf32>
    %cst_10 = arith.constant 1.024000e+03 : f32
    %13 = vector.broadcast %cst_10 : f32 to vector<1x256xf32>
    %14 = arith.divf %12, %13 : vector<1x256xf32>
    %15 = arith.mulf %10, %10 : vector<1x256xf32>
    %16 = arith.subf %14, %15 : vector<1x256xf32>
    %17 = vector.broadcast %10 : vector<1x256xf32> to vector<4x256xf32>
    %18 = arith.subf %1, %17 : vector<4x256xf32>
    %cst_11 = arith.constant 9.99999974E-6 : f32
    %19 = vector.broadcast %cst_11 : f32 to vector<1x256xf32>
    %20 = arith.addf %16, %19 : vector<1x256xf32>
    %21 = math.rsqrt %20 : vector<1x256xf32>
    %22 = vector.broadcast %21 : vector<1x256xf32> to vector<4x256xf32>
    %23 = arith.mulf %18, %22 : vector<4x256xf32>
    %c0_12 = arith.constant 0 : index
    %c0_13 = arith.constant 0 : index
    %24 = vector.load %arg3[%c0_12, %c0_13] : memref<1x256xf32, #tpu.memory_space<vmem>>, vector<1x256xf32>
    %25 = vector.broadcast %24 : vector<1x256xf32> to vector<4x256xf32>
    %26 = arith.mulf %23, %25 : vector<4x256xf32>
    %c0_14 = arith.constant 0 : index
    %c0_15 = arith.constant 0 : index
    %27 = vector.load %arg4[%c0_14, %c0_15] : memref<1x256xf32, #tpu.memory_space<vmem>>, vector<1x256xf32>
    %28 = vector.broadcast %27 : vector<1x256xf32> to vector<4x256xf32>
    %29 = arith.addf %26, %28 : vector<4x256xf32>
    %cst_16 = arith.constant 5.000000e-01 : f32
    %30 = vector.broadcast %cst_16 : f32 to vector<4x256xf32>
    %31 = arith.mulf %30, %29 : vector<4x256xf32>
    %cst_17 = arith.constant 4.471500e-02 : f32
    %32 = vector.broadcast %cst_17 : f32 to vector<4x256xf32>
    %33 = arith.mulf %32, %29 : vector<4x256xf32>
    %34 = arith.mulf %33, %29 : vector<4x256xf32>
    %35 = arith.mulf %34, %29 : vector<4x256xf32>
    %36 = arith.addf %29, %35 : vector<4x256xf32>
    %cst_18 = arith.constant 0.797884583 : f32
    %37 = vector.broadcast %cst_18 : f32 to vector<4x256xf32>
    %38 = arith.mulf %37, %36 : vector<4x256xf32>
    %39 = math.tanh %38 : vector<4x256xf32>
    %cst_19 = arith.constant 1.000000e+00 : f32
    %40 = vector.broadcast %cst_19 : f32 to vector<4x256xf32>
    %41 = arith.addf %40, %39 : vector<4x256xf32>
    %42 = arith.mulf %31, %41 : vector<4x256xf32>
    %c0_20 = arith.constant 0 : index
    %c0_21 = arith.constant 0 : index
    %c0_22 = arith.constant 0 : index
    %43 = vector.load %arg5[%c0_20, %c0_21, %c0_22] : memref<1x4x256xf32, #tpu.memory_space<vmem>>, vector<1x4x256xf32>
    %44 = vector.shape_cast %43 : vector<1x4x256xf32> to vector<4x256xf32>
    %45 = vector.shape_cast %42 : vector<4x256xf32> to vector<1x4x256xf32>
    tpu.vector_store %arg5[%c0_20, %c0_21, %c0_22], %45 {strides = array<i32>} : memref<1x4x256xf32, #tpu.memory_space<vmem>>, vector<1x4x256xf32>,
    return
  }
  func.func @transform_0(%arg0: i32) -> (i32, i32, i32) {
    %c0_i32 = arith.constant 0 : i32
    %c0_i32_0 = arith.constant 0 : i32
    %c0_i32_1 = arith.constant 0 : i32
    return %arg0, %c0_i32, %c0_i32_0 : i32, i32, i32
  }
  func.func @transform_1(%arg0: i32) -> (i32, i32) {
    %c0_i32 = arith.constant 0 : i32
    %c0_i32_0 = arith.constant 0 : i32
    %c0_i32_1 = arith.constant 0 : i32
    return %c0_i32, %c0_i32_0 : i32, i32
  }
  func.func @transform_2(%arg0: i32) -> (i32, i32) {
    %c0_i32 = arith.constant 0 : i32
    %c0_i32_0 = arith.constant 0 : i32
    %c0_i32_1 = arith.constant 0 : i32
    return %c0_i32, %c0_i32_0 : i32, i32
  }
  func.func @transform_3(%arg0: i32) -> (i32, i32) {
    %c0_i32 = arith.constant 0 : i32
    %c0_i32_0 = arith.constant 0 : i32
    %c0_i32_1 = arith.constant 0 : i32
    return %c0_i32, %c0_i32_0 : i32, i32
  }
  func.func @transform_4(%arg0: i32) -> (i32, i32, i32) {
    %c0_i32 = arith.constant 0 : i32
    %c0_i32_0 = arith.constant 0 : i32
    %c0_i32_1 = arith.constant 0 : i32
    return %arg0, %c0_i32, %c0_i32_0 : i32, i32, i32
  }
}

module attributes {stable_mosaic.version = 11 : i64} {
  func.func @_matmul_bias_act_kernel(%arg0: i32, %arg1: memref<8x128xf32, #tpu.memory_space<vmem>>, %arg2: memref<128x128xbf16, #tpu.memory_space<vmem>>, %arg3: memref<1x128xf32, #tpu.memory_space<vmem>>, %arg4: memref<8x128xf32, #tpu.memory_space<vmem>>) attributes {dimension_semantics = [#tpu.dimension_semantics<parallel>], iteration_bounds = array<i64: 1>, scalar_prefetch = 0 : i64, scratch_operands = 0 : i64, tpu.core_type = #tpu.core_type<tc>, window_params = [{transform_indices = @transform_0, window_bounds = array<i64: 8, 128>}, {pipeline_mode = #tpu.pipeline_mode<synchronous>, transform_indices = @transform_1, window_bounds = array<i64: 128, 128>}, {pipeline_mode = #tpu.pipeline_mode<synchronous>, transform_indices = @transform_2, window_bounds = array<i64: 1, 128>}, {transform_indices = @transform_3, window_bounds = array<i64: 8, 128>}]} {
    %c0 = arith.constant 0 : index
    %c0_0 = arith.constant 0 : index
    %0 = vector.load %arg1[%c0, %c0_0] : memref<8x128xf32, #tpu.memory_space<vmem>>, vector<8x128xf32>
    %1 = arith.truncf %0 : vector<8x128xf32> to vector<8x128xbf16>
    %c0_1 = arith.constant 0 : index
    %c0_2 = arith.constant 0 : index
    %2 = vector.load %arg2[%c0_1, %c0_2] : memref<128x128xbf16, #tpu.memory_space<vmem>>, vector<128x128xbf16>
    %cst = arith.constant dense<0.000000e+00> : vector<8x128xf32>
    %3 = tpu.matmul %1, %2, %cst {dimension_numbers = #tpu.dot_dimension_numbers<[1], [0], [0], [1], [0, 0, 1, 1], [], []>} : vector<8x128xbf16>, vector<128x128xbf16>, vector<8x128xf32> -> vector<8x128xf32>
    %c0_3 = arith.constant 0 : index
    %c0_4 = arith.constant 0 : index
    %4 = vector.load %arg3[%c0_3, %c0_4] : memref<1x128xf32, #tpu.memory_space<vmem>>, vector<1x128xf32>
    %5 = vector.broadcast %4 : vector<1x128xf32> to vector<8x128xf32>
    %6 = arith.addf %3, %5 : vector<8x128xf32>
    %c0_5 = arith.constant 0 : index
    %c0_6 = arith.constant 0 : index
    %7 = vector.load %arg4[%c0_5, %c0_6] : memref<8x128xf32, #tpu.memory_space<vmem>>, vector<8x128xf32>
    tpu.vector_store %arg4[%c0_5, %c0_6], %6 {strides = array<i32>} : memref<8x128xf32, #tpu.memory_space<vmem>>, vector<8x128xf32>,
    return
  }
  func.func @transform_0(%arg0: i32) -> (i32, i32) {
    %c0_i32 = arith.constant 0 : i32
    %c0_i32_0 = arith.constant 0 : i32
    return %arg0, %c0_i32 : i32, i32
  }
  func.func @transform_1(%arg0: i32) -> (i32, i32) {
    %c0_i32 = arith.constant 0 : i32
    %c0_i32_0 = arith.constant 0 : i32
    %c0_i32_1 = arith.constant 0 : i32
    return %c0_i32, %c0_i32_0 : i32, i32
  }
  func.func @transform_2(%arg0: i32) -> (i32, i32) {
    %c0_i32 = arith.constant 0 : i32
    %c0_i32_0 = arith.constant 0 : i32
    %c0_i32_1 = arith.constant 0 : i32
    return %c0_i32, %c0_i32_0 : i32, i32
  }
  func.func @transform_3(%arg0: i32) -> (i32, i32) {
    %c0_i32 = arith.constant 0 : i32
    %c0_i32_0 = arith.constant 0 : i32
    return %arg0, %c0_i32 : i32, i32
  }
}

module attributes {stable_mosaic.version = 11 : i64} {
  func.func @_matmul_bias_act_kernel(%arg0: i32, %arg1: memref<8x384xf32, #tpu.memory_space<vmem>>, %arg2: memref<384x128xbf16, #tpu.memory_space<vmem>>, %arg3: memref<1x128xf32, #tpu.memory_space<vmem>>, %arg4: memref<8x128xf32, #tpu.memory_space<vmem>>) attributes {dimension_semantics = [#tpu.dimension_semantics<parallel>], iteration_bounds = array<i64: 1>, scalar_prefetch = 0 : i64, scratch_operands = 0 : i64, tpu.core_type = #tpu.core_type<tc>, window_params = [{transform_indices = @transform_0, window_bounds = array<i64: 8, 384>}, {pipeline_mode = #tpu.pipeline_mode<synchronous>, transform_indices = @transform_1, window_bounds = array<i64: 384, 128>}, {pipeline_mode = #tpu.pipeline_mode<synchronous>, transform_indices = @transform_2, window_bounds = array<i64: 1, 128>}, {transform_indices = @transform_3, window_bounds = array<i64: 8, 128>}]} {
    %c0 = arith.constant 0 : index
    %c0_0 = arith.constant 0 : index
    %0 = vector.load %arg1[%c0, %c0_0] : memref<8x384xf32, #tpu.memory_space<vmem>>, vector<8x384xf32>
    %1 = arith.truncf %0 : vector<8x384xf32> to vector<8x384xbf16>
    %c0_1 = arith.constant 0 : index
    %c0_2 = arith.constant 0 : index
    %2 = vector.load %arg2[%c0_1, %c0_2] : memref<384x128xbf16, #tpu.memory_space<vmem>>, vector<384x128xbf16>
    %cst = arith.constant dense<0.000000e+00> : vector<8x128xf32>
    %3 = tpu.matmul %1, %2, %cst {dimension_numbers = #tpu.dot_dimension_numbers<[1], [0], [0], [1], [0, 0, 1, 1], [], []>} : vector<8x384xbf16>, vector<384x128xbf16>, vector<8x128xf32> -> vector<8x128xf32>
    %c0_3 = arith.constant 0 : index
    %c0_4 = arith.constant 0 : index
    %4 = vector.load %arg3[%c0_3, %c0_4] : memref<1x128xf32, #tpu.memory_space<vmem>>, vector<1x128xf32>
    %5 = vector.broadcast %4 : vector<1x128xf32> to vector<8x128xf32>
    %6 = arith.addf %3, %5 : vector<8x128xf32>
    %c0_5 = arith.constant 0 : index
    %c0_6 = arith.constant 0 : index
    %7 = vector.load %arg4[%c0_5, %c0_6] : memref<8x128xf32, #tpu.memory_space<vmem>>, vector<8x128xf32>
    tpu.vector_store %arg4[%c0_5, %c0_6], %6 {strides = array<i32>} : memref<8x128xf32, #tpu.memory_space<vmem>>, vector<8x128xf32>,
    return
  }
  func.func @transform_0(%arg0: i32) -> (i32, i32) {
    %c0_i32 = arith.constant 0 : i32
    %c0_i32_0 = arith.constant 0 : i32
    return %arg0, %c0_i32 : i32, i32
  }
  func.func @transform_1(%arg0: i32) -> (i32, i32) {
    %c0_i32 = arith.constant 0 : i32
    %c0_i32_0 = arith.constant 0 : i32
    %c0_i32_1 = arith.constant 0 : i32
    return %c0_i32, %c0_i32_0 : i32, i32
  }
  func.func @transform_2(%arg0: i32) -> (i32, i32) {
    %c0_i32 = arith.constant 0 : i32
    %c0_i32_0 = arith.constant 0 : i32
    %c0_i32_1 = arith.constant 0 : i32
    return %c0_i32, %c0_i32_0 : i32, i32
  }
  func.func @transform_3(%arg0: i32) -> (i32, i32) {
    %c0_i32 = arith.constant 0 : i32
    %c0_i32_0 = arith.constant 0 : i32
    return %arg0, %c0_i32 : i32, i32
  }
}

module attributes {stable_mosaic.version = 11 : i64} {
  func.func @_matmul_bias_act_kernel(%arg0: i32, %arg1: memref<8x128xf32, #tpu.memory_space<vmem>>, %arg2: memref<128x256xbf16, #tpu.memory_space<vmem>>, %arg3: memref<1x256xf32, #tpu.memory_space<vmem>>, %arg4: memref<8x256xf32, #tpu.memory_space<vmem>>) attributes {dimension_semantics = [#tpu.dimension_semantics<parallel>], iteration_bounds = array<i64: 1>, scalar_prefetch = 0 : i64, scratch_operands = 0 : i64, tpu.core_type = #tpu.core_type<tc>, window_params = [{transform_indices = @transform_0, window_bounds = array<i64: 8, 128>}, {pipeline_mode = #tpu.pipeline_mode<synchronous>, transform_indices = @transform_1, window_bounds = array<i64: 128, 256>}, {pipeline_mode = #tpu.pipeline_mode<synchronous>, transform_indices = @transform_2, window_bounds = array<i64: 1, 256>}, {transform_indices = @transform_3, window_bounds = array<i64: 8, 256>}]} {
    %c0 = arith.constant 0 : index
    %c0_0 = arith.constant 0 : index
    %0 = vector.load %arg1[%c0, %c0_0] : memref<8x128xf32, #tpu.memory_space<vmem>>, vector<8x128xf32>
    %1 = arith.truncf %0 : vector<8x128xf32> to vector<8x128xbf16>
    %c0_1 = arith.constant 0 : index
    %c0_2 = arith.constant 0 : index
    %2 = vector.load %arg2[%c0_1, %c0_2] : memref<128x256xbf16, #tpu.memory_space<vmem>>, vector<128x256xbf16>
    %cst = arith.constant dense<0.000000e+00> : vector<8x256xf32>
    %3 = tpu.matmul %1, %2, %cst {dimension_numbers = #tpu.dot_dimension_numbers<[1], [0], [0], [1], [0, 0, 1, 1], [], []>} : vector<8x128xbf16>, vector<128x256xbf16>, vector<8x256xf32> -> vector<8x256xf32>
    %c0_3 = arith.constant 0 : index
    %c0_4 = arith.constant 0 : index
    %4 = vector.load %arg3[%c0_3, %c0_4] : memref<1x256xf32, #tpu.memory_space<vmem>>, vector<1x256xf32>
    %5 = vector.broadcast %4 : vector<1x256xf32> to vector<8x256xf32>
    %6 = arith.addf %3, %5 : vector<8x256xf32>
    %c0_5 = arith.constant 0 : index
    %c0_6 = arith.constant 0 : index
    %7 = vector.load %arg4[%c0_5, %c0_6] : memref<8x256xf32, #tpu.memory_space<vmem>>, vector<8x256xf32>
    tpu.vector_store %arg4[%c0_5, %c0_6], %6 {strides = array<i32>} : memref<8x256xf32, #tpu.memory_space<vmem>>, vector<8x256xf32>,
    return
  }
  func.func @transform_0(%arg0: i32) -> (i32, i32) {
    %c0_i32 = arith.constant 0 : i32
    %c0_i32_0 = arith.constant 0 : i32
    return %arg0, %c0_i32 : i32, i32
  }
  func.func @transform_1(%arg0: i32) -> (i32, i32) {
    %c0_i32 = arith.constant 0 : i32
    %c0_i32_0 = arith.constant 0 : i32
    %c0_i32_1 = arith.constant 0 : i32
    return %c0_i32, %c0_i32_0 : i32, i32
  }
  func.func @transform_2(%arg0: i32) -> (i32, i32) {
    %c0_i32 = arith.constant 0 : i32
    %c0_i32_0 = arith.constant 0 : i32
    %c0_i32_1 = arith.constant 0 : i32
    return %c0_i32, %c0_i32_0 : i32, i32
  }
  func.func @transform_3(%arg0: i32) -> (i32, i32) {
    %c0_i32 = arith.constant 0 : i32
    %c0_i32_0 = arith.constant 0 : i32
    return %arg0, %c0_i32 : i32, i32
  }
}

module attributes {stable_mosaic.version = 11 : i64} {
  func.func @_matmul_bias_act_kernel(%arg0: i32, %arg1: memref<8x256xf32, #tpu.memory_space<vmem>>, %arg2: memref<256x128xbf16, #tpu.memory_space<vmem>>, %arg3: memref<1x128xf32, #tpu.memory_space<vmem>>, %arg4: memref<8x128xf32, #tpu.memory_space<vmem>>) attributes {dimension_semantics = [#tpu.dimension_semantics<parallel>], iteration_bounds = array<i64: 1>, scalar_prefetch = 0 : i64, scratch_operands = 0 : i64, tpu.core_type = #tpu.core_type<tc>, window_params = [{transform_indices = @transform_0, window_bounds = array<i64: 8, 256>}, {pipeline_mode = #tpu.pipeline_mode<synchronous>, transform_indices = @transform_1, window_bounds = array<i64: 256, 128>}, {pipeline_mode = #tpu.pipeline_mode<synchronous>, transform_indices = @transform_2, window_bounds = array<i64: 1, 128>}, {transform_indices = @transform_3, window_bounds = array<i64: 8, 128>}]} {
    %c0 = arith.constant 0 : index
    %c0_0 = arith.constant 0 : index
    %0 = vector.load %arg1[%c0, %c0_0] : memref<8x256xf32, #tpu.memory_space<vmem>>, vector<8x256xf32>
    %1 = arith.truncf %0 : vector<8x256xf32> to vector<8x256xbf16>
    %c0_1 = arith.constant 0 : index
    %c0_2 = arith.constant 0 : index
    %2 = vector.load %arg2[%c0_1, %c0_2] : memref<256x128xbf16, #tpu.memory_space<vmem>>, vector<256x128xbf16>
    %cst = arith.constant dense<0.000000e+00> : vector<8x128xf32>
    %3 = tpu.matmul %1, %2, %cst {dimension_numbers = #tpu.dot_dimension_numbers<[1], [0], [0], [1], [0, 0, 1, 1], [], []>} : vector<8x256xbf16>, vector<256x128xbf16>, vector<8x128xf32> -> vector<8x128xf32>
    %c0_3 = arith.constant 0 : index
    %c0_4 = arith.constant 0 : index
    %4 = vector.load %arg3[%c0_3, %c0_4] : memref<1x128xf32, #tpu.memory_space<vmem>>, vector<1x128xf32>
    %5 = vector.broadcast %4 : vector<1x128xf32> to vector<8x128xf32>
    %6 = arith.addf %3, %5 : vector<8x128xf32>
    %c0_5 = arith.constant 0 : index
    %c0_6 = arith.constant 0 : index
    %7 = vector.load %arg4[%c0_5, %c0_6] : memref<8x128xf32, #tpu.memory_space<vmem>>, vector<8x128xf32>
    tpu.vector_store %arg4[%c0_5, %c0_6], %6 {strides = array<i32>} : memref<8x128xf32, #tpu.memory_space<vmem>>, vector<8x128xf32>,
    return
  }
  func.func @transform_0(%arg0: i32) -> (i32, i32) {
    %c0_i32 = arith.constant 0 : i32
    %c0_i32_0 = arith.constant 0 : i32
    return %arg0, %c0_i32 : i32, i32
  }
  func.func @transform_1(%arg0: i32) -> (i32, i32) {
    %c0_i32 = arith.constant 0 : i32
    %c0_i32_0 = arith.constant 0 : i32
    %c0_i32_1 = arith.constant 0 : i32
    return %c0_i32, %c0_i32_0 : i32, i32
  }
  func.func @transform_2(%arg0: i32) -> (i32, i32) {
    %c0_i32 = arith.constant 0 : i32
    %c0_i32_0 = arith.constant 0 : i32
    %c0_i32_1 = arith.constant 0 : i32
    return %c0_i32, %c0_i32_0 : i32, i32
  }
  func.func @transform_3(%arg0: i32) -> (i32, i32) {
    %c0_i32 = arith.constant 0 : i32
    %c0_i32_0 = arith.constant 0 : i32
    return %arg0, %c0_i32 : i32, i32
  }
}

module attributes {stable_mosaic.version = 11 : i64} {
  func.func @_groupnorm_gelu_kernel(%arg0: i32, %arg1: memref<1x8x128xf32, #tpu.memory_space<vmem>>, %arg2: memref<128x128xf32, #tpu.memory_space<vmem>>, %arg3: memref<1x128xf32, #tpu.memory_space<vmem>>, %arg4: memref<1x128xf32, #tpu.memory_space<vmem>>, %arg5: memref<1x8x128xf32, #tpu.memory_space<vmem>>) attributes {dimension_semantics = [#tpu.dimension_semantics<parallel>], iteration_bounds = array<i64: 2>, scalar_prefetch = 0 : i64, scratch_operands = 0 : i64, tpu.core_type = #tpu.core_type<tc>, window_params = [{transform_indices = @transform_0, window_bounds = array<i64: 1, 8, 128>}, {pipeline_mode = #tpu.pipeline_mode<synchronous>, transform_indices = @transform_1, window_bounds = array<i64: 128, 128>}, {pipeline_mode = #tpu.pipeline_mode<synchronous>, transform_indices = @transform_2, window_bounds = array<i64: 1, 128>}, {pipeline_mode = #tpu.pipeline_mode<synchronous>, transform_indices = @transform_3, window_bounds = array<i64: 1, 128>}, {transform_indices = @transform_4, window_bounds = array<i64: 1, 8, 128>}]} {
    %c0 = arith.constant 0 : index
    %c0_0 = arith.constant 0 : index
    %c0_1 = arith.constant 0 : index
    %0 = vector.load %arg1[%c0, %c0_0, %c0_1] : memref<1x8x128xf32, #tpu.memory_space<vmem>>, vector<1x8x128xf32>
    %1 = vector.shape_cast %0 : vector<1x8x128xf32> to vector<8x128xf32>
    %cst = arith.constant dense<0.000000e+00> : vector<128xf32>
    %2 = vector.multi_reduction <add>, %1, %cst [0] : vector<8x128xf32> to vector<128xf32>
    %3 = vector.shape_cast %2 : vector<128xf32> to vector<1x128xf32>
    %4 = arith.mulf %1, %1 : vector<8x128xf32>
    %cst_2 = arith.constant dense<0.000000e+00> : vector<128xf32>
    %5 = vector.multi_reduction <add>, %4, %cst_2 [0] : vector<8x128xf32> to vector<128xf32>
    %6 = vector.shape_cast %5 : vector<128xf32> to vector<1x128xf32>
    %c0_3 = arith.constant 0 : index
    %c0_4 = arith.constant 0 : index
    %7 = vector.load %arg2[%c0_3, %c0_4] : memref<128x128xf32, #tpu.memory_space<vmem>>, vector<128x128xf32>
    %cst_5 = arith.constant dense<0.000000e+00> : vector<1x128xf32>
    %8 = tpu.matmul %3, %7, %cst_5 {dimension_numbers = #tpu.dot_dimension_numbers<[1], [0], [0], [1], [0, 0, 1, 1], [], []>} : vector<1x128xf32>, vector<128x128xf32>, vector<1x128xf32> -> vector<1x128xf32>
    %cst_6 = arith.constant 6.400000e+01 : f32
    %9 = vector.broadcast %cst_6 : f32 to vector<1x128xf32>
    %10 = arith.divf %8, %9 : vector<1x128xf32>
    %c0_7 = arith.constant 0 : index
    %c0_8 = arith.constant 0 : index
    %11 = vector.load %arg2[%c0_7, %c0_8] : memref<128x128xf32, #tpu.memory_space<vmem>>, vector<128x128xf32>
    %cst_9 = arith.constant dense<0.000000e+00> : vector<1x128xf32>
    %12 = tpu.matmul %6, %11, %cst_9 {dimension_numbers = #tpu.dot_dimension_numbers<[1], [0], [0], [1], [0, 0, 1, 1], [], []>} : vector<1x128xf32>, vector<128x128xf32>, vector<1x128xf32> -> vector<1x128xf32>
    %cst_10 = arith.constant 6.400000e+01 : f32
    %13 = vector.broadcast %cst_10 : f32 to vector<1x128xf32>
    %14 = arith.divf %12, %13 : vector<1x128xf32>
    %15 = arith.mulf %10, %10 : vector<1x128xf32>
    %16 = arith.subf %14, %15 : vector<1x128xf32>
    %17 = vector.broadcast %10 : vector<1x128xf32> to vector<8x128xf32>
    %18 = arith.subf %1, %17 : vector<8x128xf32>
    %cst_11 = arith.constant 9.99999974E-6 : f32
    %19 = vector.broadcast %cst_11 : f32 to vector<1x128xf32>
    %20 = arith.addf %16, %19 : vector<1x128xf32>
    %21 = math.rsqrt %20 : vector<1x128xf32>
    %22 = vector.broadcast %21 : vector<1x128xf32> to vector<8x128xf32>
    %23 = arith.mulf %18, %22 : vector<8x128xf32>
    %c0_12 = arith.constant 0 : index
    %c0_13 = arith.constant 0 : index
    %24 = vector.load %arg3[%c0_12, %c0_13] : memref<1x128xf32, #tpu.memory_space<vmem>>, vector<1x128xf32>
    %25 = vector.broadcast %24 : vector<1x128xf32> to vector<8x128xf32>
    %26 = arith.mulf %23, %25 : vector<8x128xf32>
    %c0_14 = arith.constant 0 : index
    %c0_15 = arith.constant 0 : index
    %27 = vector.load %arg4[%c0_14, %c0_15] : memref<1x128xf32, #tpu.memory_space<vmem>>, vector<1x128xf32>
    %28 = vector.broadcast %27 : vector<1x128xf32> to vector<8x128xf32>
    %29 = arith.addf %26, %28 : vector<8x128xf32>
    %cst_16 = arith.constant 5.000000e-01 : f32
    %30 = vector.broadcast %cst_16 : f32 to vector<8x128xf32>
    %31 = arith.mulf %30, %29 : vector<8x128xf32>
    %cst_17 = arith.constant 4.471500e-02 : f32
    %32 = vector.broadcast %cst_17 : f32 to vector<8x128xf32>
    %33 = arith.mulf %32, %29 : vector<8x128xf32>
    %34 = arith.mulf %33, %29 : vector<8x128xf32>
    %35 = arith.mulf %34, %29 : vector<8x128xf32>
    %36 = arith.addf %29, %35 : vector<8x128xf32>
    %cst_18 = arith.constant 0.797884583 : f32
    %37 = vector.broadcast %cst_18 : f32 to vector<8x128xf32>
    %38 = arith.mulf %37, %36 : vector<8x128xf32>
    %39 = math.tanh %38 : vector<8x128xf32>
    %cst_19 = arith.constant 1.000000e+00 : f32
    %40 = vector.broadcast %cst_19 : f32 to vector<8x128xf32>
    %41 = arith.addf %40, %39 : vector<8x128xf32>
    %42 = arith.mulf %31, %41 : vector<8x128xf32>
    %c0_20 = arith.constant 0 : index
    %c0_21 = arith.constant 0 : index
    %c0_22 = arith.constant 0 : index
    %43 = vector.load %arg5[%c0_20, %c0_21, %c0_22] : memref<1x8x128xf32, #tpu.memory_space<vmem>>, vector<1x8x128xf32>
    %44 = vector.shape_cast %43 : vector<1x8x128xf32> to vector<8x128xf32>
    %45 = vector.shape_cast %42 : vector<8x128xf32> to vector<1x8x128xf32>
    tpu.vector_store %arg5[%c0_20, %c0_21, %c0_22], %45 {strides = array<i32>} : memref<1x8x128xf32, #tpu.memory_space<vmem>>, vector<1x8x128xf32>,
    return
  }
  func.func @transform_0(%arg0: i32) -> (i32, i32, i32) {
    %c0_i32 = arith.constant 0 : i32
    %c0_i32_0 = arith.constant 0 : i32
    %c0_i32_1 = arith.constant 0 : i32
    return %arg0, %c0_i32, %c0_i32_0 : i32, i32, i32
  }
  func.func @transform_1(%arg0: i32) -> (i32, i32) {
    %c0_i32 = arith.constant 0 : i32
    %c0_i32_0 = arith.constant 0 : i32
    %c0_i32_1 = arith.constant 0 : i32
    return %c0_i32, %c0_i32_0 : i32, i32
  }
  func.func @transform_2(%arg0: i32) -> (i32, i32) {
    %c0_i32 = arith.constant 0 : i32
    %c0_i32_0 = arith.constant 0 : i32
    %c0_i32_1 = arith.constant 0 : i32
    return %c0_i32, %c0_i32_0 : i32, i32
  }
  func.func @transform_3(%arg0: i32) -> (i32, i32) {
    %c0_i32 = arith.constant 0 : i32
    %c0_i32_0 = arith.constant 0 : i32
    %c0_i32_1 = arith.constant 0 : i32
    return %c0_i32, %c0_i32_0 : i32, i32
  }
  func.func @transform_4(%arg0: i32) -> (i32, i32, i32) {
    %c0_i32 = arith.constant 0 : i32
    %c0_i32_0 = arith.constant 0 : i32
    %c0_i32_1 = arith.constant 0 : i32
    return %arg0, %c0_i32, %c0_i32_0 : i32, i32, i32
  }
}

module attributes {stable_mosaic.version = 11 : i64} {
  func.func @_matmul_bias_act_kernel(%arg0: i32, %arg1: memref<16x384xf32, #tpu.memory_space<vmem>>, %arg2: memref<384x128xbf16, #tpu.memory_space<vmem>>, %arg3: memref<1x128xf32, #tpu.memory_space<vmem>>, %arg4: memref<16x128xf32, #tpu.memory_space<vmem>>) attributes {dimension_semantics = [#tpu.dimension_semantics<parallel>], iteration_bounds = array<i64: 1>, scalar_prefetch = 0 : i64, scratch_operands = 0 : i64, tpu.core_type = #tpu.core_type<tc>, window_params = [{transform_indices = @transform_0, window_bounds = array<i64: 16, 384>}, {pipeline_mode = #tpu.pipeline_mode<synchronous>, transform_indices = @transform_1, window_bounds = array<i64: 384, 128>}, {pipeline_mode = #tpu.pipeline_mode<synchronous>, transform_indices = @transform_2, window_bounds = array<i64: 1, 128>}, {transform_indices = @transform_3, window_bounds = array<i64: 16, 128>}]} {
    %c0 = arith.constant 0 : index
    %c0_0 = arith.constant 0 : index
    %0 = vector.load %arg1[%c0, %c0_0] : memref<16x384xf32, #tpu.memory_space<vmem>>, vector<16x384xf32>
    %1 = arith.truncf %0 : vector<16x384xf32> to vector<16x384xbf16>
    %c0_1 = arith.constant 0 : index
    %c0_2 = arith.constant 0 : index
    %2 = vector.load %arg2[%c0_1, %c0_2] : memref<384x128xbf16, #tpu.memory_space<vmem>>, vector<384x128xbf16>
    %cst = arith.constant dense<0.000000e+00> : vector<16x128xf32>
    %3 = tpu.matmul %1, %2, %cst {dimension_numbers = #tpu.dot_dimension_numbers<[1], [0], [0], [1], [0, 0, 1, 1], [], []>} : vector<16x384xbf16>, vector<384x128xbf16>, vector<16x128xf32> -> vector<16x128xf32>
    %c0_3 = arith.constant 0 : index
    %c0_4 = arith.constant 0 : index
    %4 = vector.load %arg3[%c0_3, %c0_4] : memref<1x128xf32, #tpu.memory_space<vmem>>, vector<1x128xf32>
    %5 = vector.broadcast %4 : vector<1x128xf32> to vector<16x128xf32>
    %6 = arith.addf %3, %5 : vector<16x128xf32>
    %c0_5 = arith.constant 0 : index
    %c0_6 = arith.constant 0 : index
    %7 = vector.load %arg4[%c0_5, %c0_6] : memref<16x128xf32, #tpu.memory_space<vmem>>, vector<16x128xf32>
    tpu.vector_store %arg4[%c0_5, %c0_6], %6 {strides = array<i32>} : memref<16x128xf32, #tpu.memory_space<vmem>>, vector<16x128xf32>,
    return
  }
  func.func @transform_0(%arg0: i32) -> (i32, i32) {
    %c0_i32 = arith.constant 0 : i32
    %c0_i32_0 = arith.constant 0 : i32
    return %arg0, %c0_i32 : i32, i32
  }
  func.func @transform_1(%arg0: i32) -> (i32, i32) {
    %c0_i32 = arith.constant 0 : i32
    %c0_i32_0 = arith.constant 0 : i32
    %c0_i32_1 = arith.constant 0 : i32
    return %c0_i32, %c0_i32_0 : i32, i32
  }
  func.func @transform_2(%arg0: i32) -> (i32, i32) {
    %c0_i32 = arith.constant 0 : i32
    %c0_i32_0 = arith.constant 0 : i32
    %c0_i32_1 = arith.constant 0 : i32
    return %c0_i32, %c0_i32_0 : i32, i32
  }
  func.func @transform_3(%arg0: i32) -> (i32, i32) {
    %c0_i32 = arith.constant 0 : i32
    %c0_i32_0 = arith.constant 0 : i32
    return %arg0, %c0_i32 : i32, i32
  }
}

module attributes {stable_mosaic.version = 11 : i64} {
  func.func @_matmul_bias_act_kernel(%arg0: i32, %arg1: memref<32x384xf32, #tpu.memory_space<vmem>>, %arg2: memref<384x256xbf16, #tpu.memory_space<vmem>>, %arg3: memref<1x256xf32, #tpu.memory_space<vmem>>, %arg4: memref<32x256xf32, #tpu.memory_space<vmem>>) attributes {dimension_semantics = [#tpu.dimension_semantics<parallel>], iteration_bounds = array<i64: 1>, scalar_prefetch = 0 : i64, scratch_operands = 0 : i64, tpu.core_type = #tpu.core_type<tc>, window_params = [{transform_indices = @transform_0, window_bounds = array<i64: 32, 384>}, {pipeline_mode = #tpu.pipeline_mode<synchronous>, transform_indices = @transform_1, window_bounds = array<i64: 384, 256>}, {pipeline_mode = #tpu.pipeline_mode<synchronous>, transform_indices = @transform_2, window_bounds = array<i64: 1, 256>}, {transform_indices = @transform_3, window_bounds = array<i64: 32, 256>}]} {
    %c0 = arith.constant 0 : index
    %c0_0 = arith.constant 0 : index
    %0 = vector.load %arg1[%c0, %c0_0] : memref<32x384xf32, #tpu.memory_space<vmem>>, vector<32x384xf32>
    %1 = arith.truncf %0 : vector<32x384xf32> to vector<32x384xbf16>
    %c0_1 = arith.constant 0 : index
    %c0_2 = arith.constant 0 : index
    %2 = vector.load %arg2[%c0_1, %c0_2] : memref<384x256xbf16, #tpu.memory_space<vmem>>, vector<384x256xbf16>
    %cst = arith.constant dense<0.000000e+00> : vector<32x256xf32>
    %3 = tpu.matmul %1, %2, %cst {dimension_numbers = #tpu.dot_dimension_numbers<[1], [0], [0], [1], [0, 0, 1, 1], [], []>} : vector<32x384xbf16>, vector<384x256xbf16>, vector<32x256xf32> -> vector<32x256xf32>
    %c0_3 = arith.constant 0 : index
    %c0_4 = arith.constant 0 : index
    %4 = vector.load %arg3[%c0_3, %c0_4] : memref<1x256xf32, #tpu.memory_space<vmem>>, vector<1x256xf32>
    %5 = vector.broadcast %4 : vector<1x256xf32> to vector<32x256xf32>
    %6 = arith.addf %3, %5 : vector<32x256xf32>
    %cst_5 = arith.constant 5.000000e-01 : f32
    %7 = vector.broadcast %cst_5 : f32 to vector<32x256xf32>
    %8 = arith.mulf %7, %6 : vector<32x256xf32>
    %cst_6 = arith.constant 4.471500e-02 : f32
    %9 = vector.broadcast %cst_6 : f32 to vector<32x256xf32>
    %10 = arith.mulf %9, %6 : vector<32x256xf32>
    %11 = arith.mulf %10, %6 : vector<32x256xf32>
    %12 = arith.mulf %11, %6 : vector<32x256xf32>
    %13 = arith.addf %6, %12 : vector<32x256xf32>
    %cst_7 = arith.constant 0.797884583 : f32
    %14 = vector.broadcast %cst_7 : f32 to vector<32x256xf32>
    %15 = arith.mulf %14, %13 : vector<32x256xf32>
    %16 = math.tanh %15 : vector<32x256xf32>
    %cst_8 = arith.constant 1.000000e+00 : f32
    %17 = vector.broadcast %cst_8 : f32 to vector<32x256xf32>
    %18 = arith.addf %17, %16 : vector<32x256xf32>
    %19 = arith.mulf %8, %18 : vector<32x256xf32>
    %c0_9 = arith.constant 0 : index
    %c0_10 = arith.constant 0 : index
    %20 = vector.load %arg4[%c0_9, %c0_10] : memref<32x256xf32, #tpu.memory_space<vmem>>, vector<32x256xf32>
    tpu.vector_store %arg4[%c0_9, %c0_10], %19 {strides = array<i32>} : memref<32x256xf32, #tpu.memory_space<vmem>>, vector<32x256xf32>,
    return
  }
  func.func @transform_0(%arg0: i32) -> (i32, i32) {
    %c0_i32 = arith.constant 0 : i32
    %c0_i32_0 = arith.constant 0 : i32
    return %arg0, %c0_i32 : i32, i32
  }
  func.func @transform_1(%arg0: i32) -> (i32, i32) {
    %c0_i32 = arith.constant 0 : i32
    %c0_i32_0 = arith.constant 0 : i32
    %c0_i32_1 = arith.constant 0 : i32
    return %c0_i32, %c0_i32_0 : i32, i32
  }
  func.func @transform_2(%arg0: i32) -> (i32, i32) {
    %c0_i32 = arith.constant 0 : i32
    %c0_i32_0 = arith.constant 0 : i32
    %c0_i32_1 = arith.constant 0 : i32
    return %c0_i32, %c0_i32_0 : i32, i32
  }
  func.func @transform_3(%arg0: i32) -> (i32, i32) {
    %c0_i32 = arith.constant 0 : i32
    %c0_i32_0 = arith.constant 0 : i32
    return %arg0, %c0_i32 : i32, i32
  }
}

</mosaic_0001>

<bundles_post_ra>
// kernel: conformer_vq_motion_forward.17
= control target key start
LH: loop header
LB: loop body
LE: loop exit
PB: predicated region body
PF: predicated region fallthrough
CT: control target
= control target key end

     0   :  { %s758_s15 = smov 0   ;;  %s1002_s0 = inlined_call_operand.vmem [shape: f32[2,8,256], index: 0, kind: input, shape index: {}]   ;;  %s1003_s1 = inlined_call_operand.vmem [shape: f32[256,256], index: 1, kind: input, shape index: {}]   ;;  %s1004_s2 = inlined_call_operand.vmem [shape: f32[1,256], index: 2, kind: input, shape index: {}]   ;;  %s1005_s3 = inlined_call_operand.vmem [shape: f32[1,256], index: 3, kind: input, shape index: {}]   ;;  %s1006_s4 = inlined_call_operand.vmem [shape: f32[2,8,256], index: 4, kind: output, shape index: {}]  }
   0x1 LB: > { %s568_s16 = sadd.s32 4294967295, %s731_s15   ;;  %p572_p0 = scmp.ge.s32.totalorder %s731_s15, 1  ;;  %s731_s15 = sphi %s758_s15, %s14_s15  }
   0x2   : > { %p162_p1 = scmp.lt.s32.totalorder %s731_s15, 3 }
   0x4   : > { %p163_p2 = pnand %p572_p0, %p162_p1 }
   0x5   : > { %v227_v0 = vld [vmem:[%s1003_s1 + $0x8] sm:$0xff] (!%p163_p2)  ;;  %v229_v1 = vld [vmem:[%s1003_s1 + $0x18] sm:$0xff] (!%p163_p2)  ;;  %v226_v2 = vld [vmem:[%s1003_s1] sm:$0xff] (!%p163_p2)  ;;  %p188_p3 = scmp.lt.s32.totalorder (!%p163_p2), %s568_s16, 1 }
   0x6   : > { %166 = sbr.rel (%p163_p2) target bundleno = 338 (0x152), region = 36  ;;  %v581_v3 = vpack.c.bf16 (!%p163_p2), %v229_v1, %v227_v0  ;;  %v228_v4 = vld [vmem:[%s1003_s1 + $0x10] sm:$0xff] (!%p163_p2)  ;;  %v231_v5 = vld [vmem:[%s1003_s1 + $0x28] sm:$0xff] (!%p163_p2)  ;;  %v233_v6 = vld [vmem:[%s1003_s1 + $0x38] sm:$0xff] (!%p163_p2) }
   0x7   : > { %v583_v7 = vpack.c.bf16 (!%p163_p2), %v228_v4, %v226_v2  ;;  %v585_v8 = vpack.c.bf16 (!%p163_p2), %v233_v6, %v231_v5  ;;  %v230_v9 = vld [vmem:[%s1003_s1 + $0x20] sm:$0xff] (!%p163_p2)  ;;  %v232_v10 = vld [vmem:[%s1003_s1 + $0x30] sm:$0xff] (!%p163_p2)  ;;  %v235_v11 = vld [vmem:[%s1003_s1 + $0x48] sm:$0xff] (!%p163_p2) }
   0x8   : > { %582 = vmatprep.subr.bf16.mxu0 (!%p163_p2), %v581_v3  ;;  %646 = vmatprep.subr.bf16.mxu1 (!%p163_p2), %v581_v3  ;;  %v237_v12 = vld [vmem:[%s1003_s1 + $0x58] sm:$0xff] (!%p163_p2)  ;;  %v587_v13 = vpack.c.bf16 (!%p163_p2), %v232_v10, %v230_v9  ;;  %v234_v15 = vld [vmem:[%s1003_s1 + $0x40] sm:$0xff] (!%p163_p2)  ;;  %v236_v16 = vld [vmem:[%s1003_s1 + $0x50] sm:$0xff] (!%p163_p2) }
   0x9   : > { %584 = vmatpush1.bf16.msra.mxu0 (!%p163_p2), %v583_v7  ;;  %648 = vmatpush1.bf16.msra.mxu1 (!%p163_p2), %v583_v7  ;;  %v589_v14 = vpack.c.bf16 (!%p163_p2), %v237_v12, %v235_v11  ;;  %v239_v17 = vld [vmem:[%s1003_s1 + $0x68] sm:$0xff] (!%p163_p2)  ;;  %v241_v18 = vld [vmem:[%s1003_s1 + $0x78] sm:$0xff] (!%p163_p2)  ;;  %v591_v19 = vpack.c.bf16 (!%p163_p2), %v236_v16, %v234_v15  ;;  %v238_v21 = vld [vmem:[%s1003_s1 + $0x60] sm:$0xff] (!%p163_p2) }
   0xa   : > { %586 = vmatprep.subr.bf16.mxu0 (!%p163_p2), %v585_v8  ;;  %650 = vmatprep.subr.bf16.mxu1 (!%p163_p2), %v585_v8  ;;  %v593_v20 = vpack.c.bf16 (!%p163_p2), %v241_v18, %v239_v17  ;;  %v240_v22 = vld [vmem:[%s1003_s1 + $0x70] sm:$0xff] (!%p163_p2)  ;;  %v243_v23 = vld [vmem:[%s1003_s1 + $0x88] sm:$0xff] (!%p163_p2)  ;;  %v245_v24 = vld [vmem:[%s1003_s1 + $0x98] sm:$0xff] (!%p163_p2) }
   0xb   : > { %v595_v25 = vpack.c.bf16 (!%p163_p2), %v240_v22, %v238_v21  ;;  %v597_v26 = vpack.c.bf16 (!%p163_p2), %v245_v24, %v243_v23  ;;  %v242_v27 = vld [vmem:[%s1003_s1 + $0x80] sm:$0xff] (!%p163_p2)  ;;  %v244_v28 = vld [vmem:[%s1003_s1 + $0x90] sm:$0xff] (!%p163_p2)  ;;  %v247_v29 = vld [vmem:[%s1003_s1 + $0xa8] sm:$0xff] (!%p163_p2) }
   0xc   : > { %v249_v30 = vld [vmem:[%s1003_s1 + $0xb8] sm:$0xff] (!%p163_p2)  ;;  %v599_v31 = vpack.c.bf16 (!%p163_p2), %v244_v28, %v242_v27  ;;  %v246_v33 = vld [vmem:[%s1003_s1 + $0xa0] sm:$0xff] (!%p163_p2)  ;;  %v248_v34 = vld [vmem:[%s1003_s1 + $0xb0] sm:$0xff] (!%p163_p2) }
   0xd   : > { %588 = vmatpush1.bf16.msra.mxu0 %v587_v13  ;;  %652 = vmatpush1.bf16.msra.mxu1 %v587_v13  ;;  %s1008_s16 = smov (!%p188_p3, %s568_s16), 1  ;;  %v601_v32 = vpack.c.bf16 %v249_v30, %v247_v29  ;;  %v251_v35 = vld [vmem:[%s1003_s1 + $0xc8] sm:$0xff]  ;;  %v253_v36 = vld [vmem:[%s1003_s1 + $0xd8] sm:$0xff]  ;;  %v603_v37 = vpack.c.bf16 %v248_v34, %v246_v33  ;;  %v250_v39 = vld [vmem:[%s1003_s1 + $0xc0] sm:$0xff] }
   0xe   : > { %590 = vmatprep.subr.bf16.mxu0 %v589_v14  ;;  %654 = vmatprep.subr.bf16.mxu1 %v589_v14  ;;  %s579_s11 = sshll.u32 %s1008_s16, 4  ;;  %v605_v38 = vpack.c.bf16 %v253_v36, %v251_v35  ;;  %v252_v40 = vld [vmem:[%s1003_s1 + $0xd0] sm:$0xff]  ;;  %v255_v42 = vld [vmem:[%s1003_s1 + $0xe8] sm:$0xff]  ;;  %v257_v43 = vld [vmem:[%s1003_s1 + $0xf8] sm:$0xff] }
   0xf   : > { %s856_s24 = scalar_lea.vmem %s1002_s0, %s579_s11  ;;  %v607_v46 = vpack.c.bf16 %v252_v40, %v250_v39  ;;  %v609_v49 = vpack.c.bf16 %v257_v43, %v255_v42  ;;  %v254_v50 = vld [vmem:[%s1003_s1 + $0xe0] sm:$0xff]  ;;  %v256_v51 = vld [vmem:[%s1003_s1 + $0xf0] sm:$0xff]  ;;  %v259_v52 = vld [vmem:[%s1003_s1 + $0x108] sm:$0xff]  ;;  %s197_s14 = scalar_lea.vmem %s1006_s4, %s579_s11 }
  0x10   : > { %v865_v41 = vld [vmem:[%s856_s24 + $0x8] sm:$0xff]  ;;  %v261_v53 = vld [vmem:[%s1003_s1 + $0x118] sm:$0xff]  ;;  %v611_v56 = vpack.c.bf16 %v256_v51, %v254_v50  ;;  %v258_v60 = vld [vmem:[%s1003_s1 + $0x100] sm:$0xff] }
  0x11   : > { %592 = vmatpush1.bf16.msra.mxu0 %v591_v19  ;;  %656 = vmatpush1.bf16.msra.mxu1 %v591_v19  ;;  %v206_v44 = vrot.slane %v865_v41, 4  ;;  %v213_v45 = vmul.f32 %v865_v41, %v865_v41  ;;  %v613_v59 = vpack.c.bf16 %v261_v53, %v259_v52  ;;  %v260_v61 = vld [vmem:[%s1003_s1 + $0x110] sm:$0xff]  ;;  %v263_v62 = vld [vmem:[%s1003_s1 + $0x128] sm:$0xff]  ;;  %v265_v63 = vld [vmem:[%s1003_s1 + $0x138] sm:$0xff] }
  0x12   : > { %594 = vmatprep.subr.bf16.mxu0 %v593_v20  ;;  %658 = vmatprep.subr.bf16.mxu1 %v593_v20  ;;  %v615_v2 = vpack.c.bf16 %v260_v61, %v258_v60  ;;  %v617_v5 = vpack.c.bf16 %v265_v63, %v263_v62  ;;  %v262_v6 = vld [vmem:[%s1003_s1 + $0x120] sm:$0xff]  ;;  %v264_v7 = vld [vmem:[%s1003_s1 + $0x130] sm:$0xff]  ;;  %v267_v8 = vld [vmem:[%s1003_s1 + $0x148] sm:$0xff] }
  0x13   : > { %v207_v47 = vadd.f32 %v206_v44, %v865_v41  ;;  %v220_v48 = vrot.slane %v213_v45, 4  ;;  %v269_v9 = vld [vmem:[%s1003_s1 + $0x158] sm:$0xff]  ;;  %v619_v11 = vpack.c.bf16 %v264_v7, %v262_v6  ;;  %v914_v12 = vld [vmem:[%s856_s24] sm:$0xff]  ;;  %v268_v15 = vld [vmem:[%s1003_s1 + $0x150] sm:$0xff]  ;;  %v441_v6 = vlaneseq }
  0x14   : > { %v621_v13 = vpack.c.bf16 %v269_v9, %v267_v8  ;;  %v266_v14 = vld [vmem:[%s1003_s1 + $0x140] sm:$0xff]  ;;  %v271_v16 = vld [vmem:[%s1003_s1 + $0x168] sm:$0xff]  ;;  %v273_v17 = vld [vmem:[%s1003_s1 + $0x178] sm:$0xff]  ;;  %v212_v18 = vmul.f32 %v914_v12, %v914_v12 }
  0x15   : > { %596 = vmatpush1.bf16.msra.mxu0 %v595_v25  ;;  %660 = vmatpush1.bf16.msra.mxu1 %v595_v25  ;;  %v208_v54 = vrot.slane %v207_v47, 2  ;;  %v221_v55 = vadd.f32 %v220_v48, %v213_v45  ;;  %v623_v19 = vpack.c.bf16 %v268_v15, %v266_v14  ;;  %v625_v20 = vpack.c.bf16 %v273_v17, %v271_v16  ;;  %v270_v21 = vld [vmem:[%s1003_s1 + $0x160] sm:$0xff]  ;;  %v272_v22 = vld [vmem:[%s1003_s1 + $0x170] sm:$0xff]  ;;  %v275_v23 = vld [vmem:[%s1003_s1 + $0x188] sm:$0xff] }
  0x16   : > { %598 = vmatprep.subr.bf16.mxu0 %v597_v26  ;;  %662 = vmatprep.subr.bf16.mxu1 %v597_v26  ;;  %v277_v24 = vld [vmem:[%s1003_s1 + $0x198] sm:$0xff]  ;;  %v200_v25 = vrot.slane %v914_v12, 4  ;;  %v214_v26 = vrot.slane %v212_v18, 4  ;;  %v627_v27 = vpack.c.bf16 %v272_v22, %v270_v21  ;;  %v274_v29 = vld [vmem:[%s1003_s1 + $0x180] sm:$0xff]  ;;  %v276_v30 = vld [vmem:[%s1003_s1 + $0x190] sm:$0xff] }
  0x17   : > { %v209_v57 = vadd.f32 %v208_v54, %v207_v47  ;;  %v222_v58 = vrot.slane %v221_v55, 2  ;;  %v629_v28 = vpack.c.bf16 %v277_v24, %v275_v23  ;;  %v631_v35 = vpack.c.bf16 %v276_v30, %v274_v29  ;;  %v283_v39 = vld [vmem:[%s1003_s1 + $0x1c8] sm:$0xff]  ;;  %v285_v40 = vld [vmem:[%s1003_s1 + $0x1d8] sm:$0xff]  ;;  %v284_v47 = vld [vmem:[%s1003_s1 + $0x1d0] sm:$0xff] }
  0x18   : > { %v201_v33 = vadd.f32 %v200_v25, %v914_v12  ;;  %v215_v34 = vadd.f32 %v214_v26, %v212_v18  ;;  %v637_v45 = vpack.c.bf16 %v285_v40, %v283_v39  ;;  %v287_v48 = vld [vmem:[%s1003_s1 + $0x1e8] sm:$0xff]  ;;  %v286_v54 = vld [vmem:[%s1003_s1 + $0x1e0] sm:$0xff] }
  0x19   : > { %600 = vmatpush1.bf16.msra.mxu0 %v599_v31  ;;  %664 = vmatpush1.bf16.msra.mxu1 %v599_v31  ;;  %v210_v0 = vrot.slane %v209_v57, 1  ;;  %v223_v1 = vadd.f32 %v222_v58, %v221_v55  ;;  %v279_v31 = vld [vmem:[%s1003_s1 + $0x1a8] sm:$0xff]  ;;  %v288_v55 = vld [vmem:[%s1003_s1 + $0x1f0] sm:$0xff]  ;;  %v465_v17 = vld [vmem:[%s1004_s2] sm:$0x3] }
  0x1a   : > { %602 = vmatprep.subr.bf16.mxu0 %v601_v32  ;;  %666 = vmatprep.subr.bf16.mxu1 %v601_v32  ;;  %v281_v32 = vld [vmem:[%s1003_s1 + $0x1b8] sm:$0xff]  ;;  %v202_v42 = vrot.slane %v201_v33, 2  ;;  %v216_v43 = vrot.slane %v215_v34, 2  ;;  %v643_v58 = vpack.c.bf16 %v288_v55, %v286_v54 }
  0x1b   : > { %v211_v3 = vadd.f32 %v210_v0, %v209_v57  ;;  %v224_v4 = vrot.slane %v223_v1, 1  ;;  %v633_v36 = vpack.c.bf16 %v281_v32, %v279_v31 }
  0x1c   : > { %v203_v50 = vadd.f32 %v202_v42, %v201_v33  ;;  %v217_v51 = vadd.f32 %v216_v43, %v215_v34 }
  0x1d   : > { %604 = vmatpush1.bf16.msra.mxu0 %v603_v37  ;;  %668 = vmatpush1.bf16.msra.mxu1 %v603_v37  ;;  %v225_v10 = vadd.f32 %v224_v4, %v223_v1  ;;  %v278_v37 = vld [vmem:[%s1003_s1 + $0x1a0] sm:$0xff] }
  0x1e   : > { %606 = vmatprep.subr.bf16.mxu0 %v605_v38  ;;  %670 = vmatprep.subr.bf16.mxu1 %v605_v38  ;;  %v280_v38 = vld [vmem:[%s1003_s1 + $0x1b0] sm:$0xff]  ;;  %v218_v57 = vrot.slane %v217_v51, 1 }
  0x1f   : > { %354 = vmatprep.mubr.f32.mxu0 %v211_v3  ;;  %428 = vmatprep.mubr.f32.mxu1 %v225_v10  ;;  %v635_v44 = vpack.c.bf16 %v280_v38, %v278_v37 }
  0x20   : > { %v219_v60 = vadd.f32 %v218_v57, %v217_v51 }
  0x21   : > { %608 = vmatpush1.bf16.msra.mxu0 %v607_v46  ;;  %672 = vmatpush1.bf16.msra.mxu1 %v607_v46  ;;  %v282_v46 = vld [vmem:[%s1003_s1 + $0x1c0] sm:$0xff] }
  0x22   : > { %610 = vmatprep.subr.bf16.mxu0 %v609_v49  ;;  %674 = vmatprep.subr.bf16.mxu1 %v609_v49  ;;  %v289_v49 = vld [vmem:[%s1003_s1 + $0x1f8] sm:$0xff]  ;;  %v639_v52 = vpack.c.bf16 %v284_v47, %v282_v46 }
  0x23   : > { %v641_v53 = vpack.c.bf16 %v289_v49, %v287_v48 }
  0x25   : > { %612 = vmatpush1.bf16.msra.mxu0 %v611_v56  ;;  %676 = vmatpush1.bf16.msra.mxu1 %v611_v56  ;;  %v204_v56 = vrot.slane %v203_v50, 1 }
  0x26   : > { %614 = vmatprep.subr.bf16.mxu0 %v613_v59  ;;  %678 = vmatprep.subr.bf16.mxu1 %v613_v59 }
  0x27   : > { %v205_v59 = vadd.f32 %v204_v56, %v203_v50 }
  0x29   : > { %616 = vmatpush1.bf16.msra.mxu0 %v615_v2  ;;  %680 = vmatpush1.bf16.msra.mxu1 %v615_v2 }
  0x2a   : > { %618 = vmatprep.subr.bf16.mxu0 %v617_v5  ;;  %682 = vmatprep.subr.bf16.mxu1 %v617_v5 }
  0x2d   : > { %620 = vmatpush1.bf16.msra.mxu0 %v619_v11  ;;  %684 = vmatpush1.bf16.msra.mxu1 %v619_v11  ;;  %v442_v11 = vshrl.u32 %v441_v6, 7 }
  0x2e   : > { %622 = vmatprep.subr.bf16.mxu0 %v621_v13  ;;  %686 = vmatprep.subr.bf16.mxu1 %v621_v13 }
  0x2f   : > { %v443_v14 = vsub.s32 0, %v442_v11  ;;  %v473_v18 = vsub.s32 1, %v442_v11 }
  0x31   : > { %624 = vmatpush1.bf16.msra.mxu0 %v623_v19  ;;  %688 = vmatpush1.bf16.msra.mxu1 %v623_v19  ;;  %v470_v24 = vrot.slane %v465_v17, %v443_v14 }
  0x32   : > { %626 = vmatprep.subr.bf16.mxu0 %v625_v20  ;;  %690 = vmatprep.subr.bf16.mxu1 %v625_v20  ;;  %v479_v20 = vld [vmem:[%s1005_s3] sm:$0x3] }
  0x33   : > { %v484_v29 = vrot.slane %v479_v20, %v443_v14  ;;  %v488_v31 = vrot.slane %v479_v20, %v473_v18 }
  0x35   : > { %628 = vmatpush1.bf16.msra.mxu0 %v627_v27  ;;  %692 = vmatpush1.bf16.msra.mxu1 %v627_v27  ;;  %v474_v27 = vrot.slane %v465_v17, %v473_v18 }
  0x36   : > { %630 = vmatprep.subr.bf16.mxu0 %v629_v28  ;;  %694 = vmatprep.subr.bf16.mxu1 %v629_v28 }
  0x39   : > { %632 = vmatpush1.bf16.msra.mxu0 %v631_v35  ;;  %696 = vmatpush1.bf16.msra.mxu1 %v631_v35 }
  0x3a   : > { %634 = vmatprep.subr.bf16.mxu0 %v633_v36  ;;  %698 = vmatprep.subr.bf16.mxu1 %v633_v36 }
  0x3d   : > { %636 = vmatpush1.bf16.msra.mxu0 %v635_v44  ;;  %700 = vmatpush1.bf16.msra.mxu1 %v635_v44 }
  0x3e   : > { %638 = vmatprep.subr.bf16.mxu0 %v637_v45  ;;  %702 = vmatprep.subr.bf16.mxu1 %v637_v45 }
  0x41   : > { %640 = vmatpush1.bf16.msra.mxu0 %v639_v52  ;;  %704 = vmatpush1.bf16.msra.mxu1 %v639_v52 }
  0x42   : > { %642 = vmatprep.subr.bf16.mxu0 %v641_v53  ;;  %706 = vmatprep.subr.bf16.mxu1 %v641_v53 }
  0x45   : > { %644 = vmatpush1.bf16.msra.mxu0 %v643_v58  ;;  %708 = vmatpush1.bf16.msra.mxu1 %v643_v58 }
  0x48   : > { %355 = vmatmul.mubr.f32.vlgmr.msra.gmra.mrb[0].mxu0 %v205_v59  ;;  %429 = vmatmul.mubr.f32.vlgmr.msra.gmra.mrb[0].mxu1 %v219_v60 }
 0x11b   : > { %v356_v61 = vpop.f32.mrb[0].mxu0  ;;  %v430_v62 = vpop.f32.mrb[0].mxu1 }
 0x11c   : > { %v362_v63 = vmul.f32 0.00048828125, %v356_v61  ;;  %v358_v0 = vpop.f32.mrb[1].mxu0  ;;  %v435_v1 = vmul.f32 0.00048828125, %v430_v62  ;;  %v432_v2 = vpop.f32.mrb[1].mxu1 }
 0x11d   : > { %v363_v3 = vmul.f32 0.00048828125, %v358_v0  ;;  %v436_v4 = vmul.f32 0.00048828125, %v432_v2 }
 0x11e   : > { %v437_v5 = vmul.f32 %v362_v63, %v362_v63  ;;  %v444_v15 = vrot.slane %v362_v63, %v443_v14 }
 0x11f   : > { %v438_v7 = vmul.f32 %v363_v3, %v363_v3  ;;  %v448_v16 = vrot.slane %v363_v3, %v443_v14 }
 0x120   : > { %v439_v8 = vsub.f32 %v435_v1, %v437_v5  ;;  %v449_v22 = vsub.f32 %v914_v12, %v444_v15 }
 0x121   : > { %v440_v9 = vsub.f32 %v436_v4, %v438_v7  ;;  %v450_v25 = vsub.f32 %v865_v41, %v448_v16 }
 0x122   : > { %v451_v10 = vadd.f32 1e-05, %v439_v8 }
 0x123   : > { %v452_v13 = vadd.f32 1e-05, %v440_v9 }
 0x124   : > { %717 = vrsqrt.f32 %v451_v10 }
 0x125   : > { %719 = vrsqrt.f32 %v452_v13 }
 0x12e   : > { %v718_v19 = vpop.eup %717 }
 0x12f   : > { %v720_v21 = vpop.eup %719  ;;  %v458_v23 = vrot.slane %v718_v19, %v443_v14 }
 0x130   : > { %v462_v26 = vrot.slane %v720_v21, %v443_v14 }
 0x131   : > { %v463_v28 = vmul.f32 %v458_v23, %v449_v22 }
 0x132   : > { %v464_v30 = vmul.f32 %v462_v26, %v450_v25 }
 0x133   : > { %v477_v32 = vmul.f32 %v470_v24, %v463_v28 }
 0x134   : > { %v478_v33 = vmul.f32 %v474_v27, %v464_v30 }
 0x135   : > { %v491_v34 = vadd.f32 %v484_v29, %v477_v32 }
 0x136   : > { %v492_v35 = vadd.f32 %v488_v31, %v478_v33 }
 0x137   : > { %v495_v36 = vmul.f32 0.044715, %v491_v34  ;;  %v493_v47 = vmul.f32 0.5, %v491_v34 }
 0x138   : > { %v496_v37 = vmul.f32 0.044715, %v492_v35  ;;  %v494_v49 = vmul.f32 0.5, %v492_v35 }
 0x139   : > { %v497_v38 = vmul.f32 %v495_v36, %v491_v34 }
 0x13a   : > { %v498_v39 = vmul.f32 %v496_v37, %v492_v35 }
 0x13b   : > { %v499_v12 = vmul.f32 %v497_v38, %v491_v34 }
 0x13c   : > { %v500_v40 = vmul.f32 %v498_v39, %v492_v35 }
 0x13d   : > { %v501_v42 = vadd.f32 %v499_v12, %v491_v34 }
 0x13e   : > { %v502_v43 = vadd.f32 %v500_v40, %v492_v35 }
 0x13f   : > { %v503_v41 = vmul.f32 0.7978846, %v501_v42 }
 0x140   : > { %v504_v44 = vmul.f32 0.7978846, %v502_v43 }
 0x141   : > { %721 = vtanh.f32 %v503_v41 }
 0x142   : > { %723 = vtanh.f32 %v504_v44 }
 0x14b   : > { %v722_v45 = vpop.eup %721 }
 0x14c   : > { %v724_v46 = vpop.eup %723  ;;  %v507_v48 = vadd.f32 1.0, %v722_v45 }
 0x14d   : > { %v508_v50 = vadd.f32 1.0, %v724_v46 }
 0x14e   : > { %v509_v51 = vmul.f32 %v507_v48, %v493_v47 }
 0x14f   : > { %v510_v52 = vmul.f32 %v508_v50, %v494_v49 }
 0x150   : > { %511 = vst [vmem:[%s197_s14] sm:$0xff] %v509_v51 }
 0x151   : > { %512 = vst [vmem:[%s197_s14 + $0x8] sm:$0xff] %v510_v52 }
 0x152 PF: > { %s14_s15 = sadd.s32 1, %s731_s15  }
 0x153   : > { %p11_p4 = scmp.ge.s32.totalorder %s14_s15, 4  }
 0x155   :  { %13 = sbr.rel (!%p11_p4) target bundleno = 1 (0x1), region = 66 }

// kernel: conformer_vq_motion_forward.16
= control target key start
LH: loop header
LB: loop body
LE: loop exit
PB: predicated region body
PF: predicated region fallthrough
CT: control target
= control target key end

     0   :  { %8 = vsyncpa [#allocation3], 0  ;;  %s1051_s12 = smov [#allocation2]   ;;  %s1137_s0 = inlined_call_operand.vmem [shape: f32[16,768], index: 0, kind: input, shape index: {}]   ;;  %s1138_s1 = inlined_call_operand.hbm [shape: bf16[768,256], index: 1, kind: input, shape index: {}]   ;;  %s1139_s2 = inlined_call_operand.vmem [shape: f32[1,256], index: 2, kind: input, shape index: {}]   ;;  %s1140_s3 = inlined_call_operand.vmem [shape: f32[16,256], index: 3, kind: output, shape index: {}]  }
   0x1   :  { %s16_s13 = sshll.u32 %s1051_s12, 4  ;;  %s1027_s16 = scalar_lea.hbm %s1138_s1, 12288  ;;  %s17_s13 = int_to_ptr.vmem [resolvable:$true] %s16_s13 }
   0x2   :  { %p1028_p0 = scmp.ne.s32.totalorder %s1138_s1, %s1027_s16  ;;  %p1031_p1 = scmp.lt.u32.totalorder %s1027_s16, %s1138_s1 }
   0x4   :  { %p1033_p2 = pnand %p1031_p1, %p1028_p0 }
   0x6   :  { %1036 = shalt.err (!%p1033_p2)
}
   0x7   :  { %s1037_s21 = scalar_lea.vmem %s17_s13, 12288  ;;  %p1042_p4 = scmp.lt.s32.totalorder %s17_s13, %s17_s13 }
   0x8   :  { %p1038_p3 = scmp.ne.s32.totalorder %s17_s13, %s1037_s21  ;;  %p1043_p5 = scmp.lt.s32.totalorder %s1037_s21, %s1037_s21 }
   0xa   :  { %p1044_p6 = por %p1043_p5, %p1042_p4 }
   0xc   :  { %p1045_p7 = pnand %p1044_p6, %p1038_p3 }
   0xe   :  { %1048 = shalt.err (!%p1045_p7)
}
   0xf   :  { %s1052_s22 = smov 128   ;;  %s1053_s23 = smov 8  }
  0x10   :  { %22 = dma.hbm_to_vmem [thread:$0]  %s1138_s1, 12288, %s17_s13, [#allocation3], %s1052_s22, %s1052_s22, %s1053_s23  }
  0x11   :  { %1049 = dma.done.wait [#allocation3], 12288  }
  0x12   :  { %1050 = vsyncadd [#allocation3], 4294955008  ;;  %v883_v0 = vld [vmem:[#allocation2 + $0x104] ss:$8 sps:$4 sm:$0xff]   ;;  %v885_v1 = vld [vmem:[#allocation2 + $0x100] ss:$8 sps:$4 sm:$0xff]  }
  0x13   :  { %677 = vmatprep.subr.bf16.mxu0 %v883_v0  ;;  %v886_v2 = vld [vmem:[#allocation2 + $0x114] ss:$8 sps:$4 sm:$0xff]   ;;  %v888_v3 = vld [vmem:[#allocation2 + $0x110] ss:$8 sps:$4 sm:$0xff]   ;;  %v889_v4 = vld [vmem:[#allocation2 + $0x124] ss:$8 sps:$4 sm:$0xff]  }
  0x14   :  { %678 = vmatpush1.bf16.msra.mxu0 %v885_v1  ;;  %v891_v5 = vld [vmem:[#allocation2 + $0x120] ss:$8 sps:$4 sm:$0xff]   ;;  %v892_v6 = vld [vmem:[#allocation2 + $0x134] ss:$8 sps:$4 sm:$0xff]   ;;  %v894_v7 = vld [vmem:[#allocation2 + $0x130] ss:$8 sps:$4 sm:$0xff]  }
  0x15   :  { %679 = vmatprep.subr.bf16.mxu0 %v886_v2  ;;  %v895_v8 = vld [vmem:[#allocation2 + $0x144] ss:$8 sps:$4 sm:$0xff]   ;;  %v897_v9 = vld [vmem:[#allocation2 + $0x140] ss:$8 sps:$4 sm:$0xff]   ;;  %v898_v10 = vld [vmem:[#allocation2 + $0x154] ss:$8 sps:$4 sm:$0xff]  }
  0x16   :  { %v900_v11 = vld [vmem:[#allocation2 + $0x150] ss:$8 sps:$4 sm:$0xff]   ;;  %v901_v12 = vld [vmem:[#allocation2 + $0x164] ss:$8 sps:$4 sm:$0xff]   ;;  %v930_v14 = vld [vmem:[#allocation2] ss:$8 sps:$4 sm:$0xff]  }
  0x17   :  { %v928_v13 = vld [vmem:[#allocation2 + $0x4] ss:$8 sps:$4 sm:$0xff]   ;;  %v903_v15 = vld [vmem:[#allocation2 + $0x160] ss:$8 sps:$4 sm:$0xff]   ;;  %v904_v16 = vld [vmem:[#allocation2 + $0x174] ss:$8 sps:$4 sm:$0xff]  }
  0x18   :  { %680 = vmatpush1.bf16.msra.mxu0 %v888_v3  ;;  %634 = vmatprep.subr.bf16.mxu1 %v928_v13  ;;  %v934_v17 = vld [vmem:[#allocation2 + $0x14] ss:$8 sps:$4 sm:$0xff]   ;;  %v936_v18 = vld [vmem:[#allocation2 + $0x10] ss:$8 sps:$4 sm:$0xff]   ;;  %v37_v20 = vld [vmem:[%s1137_s0 + $0x48] sm:$0xff] }
  0x19   :  { %681 = vmatprep.subr.bf16.mxu0 %v889_v4  ;;  %635 = vmatpush1.bf16.msra.mxu1 %v930_v14  ;;  %v31_v19 = vld [vmem:[%s1137_s0 + $0x18] sm:$0xff]  ;;  %v940_v23 = vld [vmem:[#allocation2 + $0x24] ss:$8 sps:$4 sm:$0xff]   ;;  %v942_v24 = vld [vmem:[#allocation2 + $0x20] ss:$8 sps:$4 sm:$0xff]  }
  0x1a   :  { %636 = vmatprep.subr.bf16.mxu1 %v934_v17  ;;  %v43_v21 = vpack.c.bf16 %v37_v20, %v31_v19  ;;  %v906_v22 = vld [vmem:[#allocation2 + $0x170] ss:$8 sps:$4 sm:$0xff]   ;;  %v907_v25 = vld [vmem:[#allocation2 + $0x184] ss:$8 sps:$4 sm:$0xff]   ;;  %v909_v26 = vld [vmem:[#allocation2 + $0x180] ss:$8 sps:$4 sm:$0xff]  }
  0x1b   :  { %v946_v27 = vld [vmem:[#allocation2 + $0x34] ss:$8 sps:$4 sm:$0xff]   ;;  %v948_v29 = vld [vmem:[#allocation2 + $0x30] ss:$8 sps:$4 sm:$0xff]   ;;  %v952_v30 = vld [vmem:[#allocation2 + $0x44] ss:$8 sps:$4 sm:$0xff]  }
  0x1c   :  { %682 = vmatpush1.bf16.msra.mxu0 %v891_v5  ;;  %709 = vmatprep.mubr.bf16.mxu0 %v43_v21  ;;  %v910_v28 = vld [vmem:[#allocation2 + $0x194] ss:$8 sps:$4 sm:$0xff]   ;;  %v912_v31 = vld [vmem:[#allocation2 + $0x190] ss:$8 sps:$4 sm:$0xff]   ;;  %v913_v32 = vld [vmem:[#allocation2 + $0x1a4] ss:$8 sps:$4 sm:$0xff]  }
  0x1d   :  { %683 = vmatprep.subr.bf16.mxu0 %v892_v6  ;;  %637 = vmatpush1.bf16.msra.mxu1 %v936_v18  ;;  %v954_v33 = vld [vmem:[#allocation2 + $0x40] ss:$8 sps:$4 sm:$0xff]   ;;  %v958_v34 = vld [vmem:[#allocation2 + $0x54] ss:$8 sps:$4 sm:$0xff]   ;;  %v960_v37 = vld [vmem:[#allocation2 + $0x50] ss:$8 sps:$4 sm:$0xff]  }
  0x1e   :  { %638 = vmatprep.subr.bf16.mxu1 %v940_v23  ;;  %v915_v35 = vld [vmem:[#allocation2 + $0x1a0] ss:$8 sps:$4 sm:$0xff]   ;;  %v916_v36 = vld [vmem:[#allocation2 + $0x1b4] ss:$8 sps:$4 sm:$0xff]   ;;  %v964_v38 = vld [vmem:[#allocation2 + $0x64] ss:$8 sps:$4 sm:$0xff]  }
  0x1f   :  { %v918_v39 = vld [vmem:[#allocation2 + $0x1b0] ss:$8 sps:$4 sm:$0xff]   ;;  %v919_v40 = vld [vmem:[#allocation2 + $0x1c4] ss:$8 sps:$4 sm:$0xff]   ;;  %v966_v41 = vld [vmem:[#allocation2 + $0x60] ss:$8 sps:$4 sm:$0xff]  }
  0x20   :  { %684 = vmatpush1.bf16.msra.mxu0 %v894_v7  ;;  %v970_v42 = vld [vmem:[#allocation2 + $0x74] ss:$8 sps:$4 sm:$0xff]   ;;  %v921_v43 = vld [vmem:[#allocation2 + $0x1c0] ss:$8 sps:$4 sm:$0xff]   ;;  %v972_v45 = vld [vmem:[#allocation2 + $0x70] ss:$8 sps:$4 sm:$0xff]  }
  0x21   :  { %685 = vmatprep.subr.bf16.mxu0 %v895_v8  ;;  %639 = vmatpush1.bf16.msra.mxu1 %v942_v24  ;;  %v922_v44 = vld [vmem:[#allocation2 + $0x1d4] ss:$8 sps:$4 sm:$0xff]   ;;  %v976_v46 = vld [vmem:[#allocation2 + $0x84] ss:$8 sps:$4 sm:$0xff]   ;;  %v924_v47 = vld [vmem:[#allocation2 + $0x1d0] ss:$8 sps:$4 sm:$0xff]  }
  0x22   :  { %640 = vmatprep.subr.bf16.mxu1 %v946_v27  ;;  %v925_v48 = vld [vmem:[#allocation2 + $0x1e4] ss:$8 sps:$4 sm:$0xff]   ;;  %v978_v49 = vld [vmem:[#allocation2 + $0x80] ss:$8 sps:$4 sm:$0xff]   ;;  %v982_v50 = vld [vmem:[#allocation2 + $0x94] ss:$8 sps:$4 sm:$0xff]  }
  0x23   :  { %v927_v51 = vld [vmem:[#allocation2 + $0x1e0] ss:$8 sps:$4 sm:$0xff]   ;;  %v931_v52 = vld [vmem:[#allocation2 + $0x1f4] ss:$8 sps:$4 sm:$0xff]   ;;  %v984_v53 = vld [vmem:[#allocation2 + $0x90] ss:$8 sps:$4 sm:$0xff]  }
  0x24   :  { %686 = vmatpush1.bf16.msra.mxu0 %v897_v9  ;;  %v988_v54 = vld [vmem:[#allocation2 + $0xa4] ss:$8 sps:$4 sm:$0xff]   ;;  %v933_v55 = vld [vmem:[#allocation2 + $0x1f0] ss:$8 sps:$4 sm:$0xff]   ;;  %v990_v59 = vld [vmem:[#allocation2 + $0xa0] ss:$8 sps:$4 sm:$0xff]  }
  0x25   :  { %687 = vmatprep.subr.bf16.mxu0 %v898_v10  ;;  %641 = vmatpush1.bf16.msra.mxu1 %v948_v29  ;;  %v939_v56 = vld [vmem:[#allocation2 + $0x204] ss:$8 sps:$4 sm:$0xff]   ;;  %v30_v57 = vld [vmem:[%s1137_s0 + $0x10] sm:$0xff]  ;;  %v937_v61 = vld [vmem:[#allocation2 + $0x200] ss:$8 sps:$4 sm:$0xff]  }
  0x26   :  { %642 = vmatprep.subr.bf16.mxu1 %v952_v30  ;;  %v36_v58 = vld [vmem:[%s1137_s0 + $0x40] sm:$0xff]  ;;  %v994_v60 = vld [vmem:[#allocation2 + $0xb4] ss:$8 sps:$4 sm:$0xff]   ;;  %v996_v0 = vld [vmem:[#allocation2 + $0xb0] ss:$8 sps:$4 sm:$0xff]  }
  0x27   :  { %v42_v62 = vpack.c.bf16 %v36_v58, %v30_v57  ;;  %v945_v63 = vld [vmem:[#allocation2 + $0x214] ss:$8 sps:$4 sm:$0xff]   ;;  %v1000_v1 = vld [vmem:[#allocation2 + $0xc4] ss:$8 sps:$4 sm:$0xff]   ;;  %v943_v6 = vld [vmem:[#allocation2 + $0x210] ss:$8 sps:$4 sm:$0xff]  }
  0x28   :  { %688 = vmatpush1.bf16.msra.mxu0 %v900_v11  ;;  %v29_v2 = vld [vmem:[%s1137_s0 + $0x8] sm:$0xff]  ;;  %v35_v3 = vld [vmem:[%s1137_s0 + $0x38] sm:$0xff]  ;;  %v34_v23 = vld [vmem:[%s1137_s0 + $0x30] sm:$0xff] }
  0x29   :  { %689 = vmatprep.subr.bf16.mxu0 %v901_v12  ;;  %643 = vmatpush1.bf16.msra.mxu1 %v954_v33  ;;  %v41_v4 = vpack.c.bf16 %v35_v3, %v29_v2  ;;  %v33_v5 = vld [vmem:[%s1137_s0 + $0x28] sm:$0xff]  ;;  %v39_v8 = vld [vmem:[%s1137_s0 + $0x58] sm:$0xff]  ;;  %v142_v57 = vld [vmem:[%s1139_s2] sm:$0x3] }
  0x2a   :  { %644 = vmatprep.subr.bf16.mxu1 %v958_v34  ;;  %v1002_v7 = vld [vmem:[#allocation2 + $0xc0] ss:$8 sps:$4 sm:$0xff]   ;;  %v951_v9 = vld [vmem:[#allocation2 + $0x224] ss:$8 sps:$4 sm:$0xff]   ;;  %v1006_v10 = vld [vmem:[#allocation2 + $0xd4] ss:$8 sps:$4 sm:$0xff]   ;;  %v45_v11 = vpack.c.bf16 %v39_v8, %v33_v5 }
  0x2b   :  { %666 = vmatprep.mubr.bf16.mxu1 %v41_v4  ;;  %v949_v12 = vld [vmem:[#allocation2 + $0x220] ss:$8 sps:$4 sm:$0xff]   ;;  %v1008_v13 = vld [vmem:[#allocation2 + $0xd0] ss:$8 sps:$4 sm:$0xff]   ;;  %v957_v14 = vld [vmem:[#allocation2 + $0x234] ss:$8 sps:$4 sm:$0xff]  }
  0x2c   :  { %690 = vmatpush1.bf16.msra.mxu0 %v903_v15  ;;  %v1012_v15 = vld [vmem:[#allocation2 + $0xe4] ss:$8 sps:$4 sm:$0xff]   ;;  %v1014_v17 = vld [vmem:[#allocation2 + $0xe0] ss:$8 sps:$4 sm:$0xff]   ;;  %v1018_v19 = vld [vmem:[#allocation2 + $0xf4] ss:$8 sps:$4 sm:$0xff]  }
  0x2d   :  { %691 = vmatprep.subr.bf16.mxu0 %v904_v16  ;;  %645 = vmatpush1.bf16.msra.mxu1 %v960_v37  ;;  %v955_v16 = vld [vmem:[#allocation2 + $0x230] ss:$8 sps:$4 sm:$0xff]   ;;  %v963_v18 = vld [vmem:[#allocation2 + $0x244] ss:$8 sps:$4 sm:$0xff]   ;;  %v961_v20 = vld [vmem:[#allocation2 + $0x240] ss:$8 sps:$4 sm:$0xff]  }
  0x2e   :  { %646 = vmatprep.subr.bf16.mxu1 %v964_v38  ;;  %v1020_v21 = vld [vmem:[#allocation2 + $0xf0] ss:$8 sps:$4 sm:$0xff]   ;;  %v969_v24 = vld [vmem:[#allocation2 + $0x254] ss:$8 sps:$4 sm:$0xff]   ;;  %v975_v27 = vld [vmem:[#allocation2 + $0x264] ss:$8 sps:$4 sm:$0xff]  }
  0x2f   :  { %v981_v29 = vld [vmem:[#allocation2 + $0x274] ss:$8 sps:$4 sm:$0xff]   ;;  %v979_v30 = vld [vmem:[#allocation2 + $0x270] ss:$8 sps:$4 sm:$0xff]  }
  0x30   :  { %692 = vmatpush1.bf16.msra.mxu0 %v906_v22  ;;  %v28_v22 = vld [vmem:[%s1137_s0] sm:$0xff]  ;;  %v993_v33 = vld [vmem:[#allocation2 + $0x294] ss:$8 sps:$4 sm:$0xff]   ;;  %v991_v34 = vld [vmem:[#allocation2 + $0x290] ss:$8 sps:$4 sm:$0xff]  }
  0x31   :  { %693 = vmatprep.subr.bf16.mxu0 %v907_v25  ;;  %647 = vmatpush1.bf16.msra.mxu1 %v966_v41  ;;  %v40_v25 = vpack.c.bf16 %v34_v23, %v28_v22  ;;  %v1005_v37 = vld [vmem:[#allocation2 + $0x2b4] ss:$8 sps:$4 sm:$0xff]   ;;  %v1003_v38 = vld [vmem:[#allocation2 + $0x2b0] ss:$8 sps:$4 sm:$0xff]  }
  0x32   :  { %648 = vmatprep.subr.bf16.mxu1 %v970_v42  ;;  %v1017_v41 = vld [vmem:[#allocation2 + $0x2d4] ss:$8 sps:$4 sm:$0xff]   ;;  %v1015_v42 = vld [vmem:[#allocation2 + $0x2d0] ss:$8 sps:$4 sm:$0xff]  }
  0x34   :  { %694 = vmatpush1.bf16.msra.mxu0 %v909_v26  ;;  %v967_v26 = vld [vmem:[#allocation2 + $0x250] ss:$8 sps:$4 sm:$0xff]  }
  0x35   :  { %695 = vmatprep.subr.bf16.mxu0 %v910_v28  ;;  %649 = vmatpush1.bf16.msra.mxu1 %v972_v45  ;;  %v973_v28 = vld [vmem:[#allocation2 + $0x260] ss:$8 sps:$4 sm:$0xff]   ;;  %v1026_v45 = vld [vmem:[#allocation2 + $0x2f4] ss:$8 sps:$4 sm:$0xff]  }
  0x36   :  { %650 = vmatprep.subr.bf16.mxu1 %v976_v46  ;;  %v1024_v46 = vld [vmem:[#allocation2 + $0x2f0] ss:$8 sps:$4 sm:$0xff]  }
  0x38   :  { %696 = vmatpush1.bf16.msra.mxu0 %v912_v31  ;;  %v987_v31 = vld [vmem:[#allocation2 + $0x284] ss:$8 sps:$4 sm:$0xff]  }
  0x39   :  { %697 = vmatprep.subr.bf16.mxu0 %v913_v32  ;;  %651 = vmatpush1.bf16.msra.mxu1 %v978_v49  ;;  %v985_v32 = vld [vmem:[#allocation2 + $0x280] ss:$8 sps:$4 sm:$0xff]  }
  0x3a   :  { %652 = vmatprep.subr.bf16.mxu1 %v982_v50 }
  0x3c   :  { %698 = vmatpush1.bf16.msra.mxu0 %v915_v35  ;;  %v999_v35 = vld [vmem:[#allocation2 + $0x2a4] ss:$8 sps:$4 sm:$0xff]  }
  0x3d   :  { %699 = vmatprep.subr.bf16.mxu0 %v916_v36  ;;  %653 = vmatpush1.bf16.msra.mxu1 %v984_v53  ;;  %v997_v36 = vld [vmem:[#allocation2 + $0x2a0] ss:$8 sps:$4 sm:$0xff]  }
  0x3e   :  { %654 = vmatprep.subr.bf16.mxu1 %v988_v54  ;;  %v144_v54 = vlaneseq }
  0x40   :  { %700 = vmatpush1.bf16.msra.mxu0 %v918_v39  ;;  %v1011_v39 = vld [vmem:[#allocation2 + $0x2c4] ss:$8 sps:$4 sm:$0xff]  }
  0x41   :  { %701 = vmatprep.subr.bf16.mxu0 %v919_v40  ;;  %655 = vmatpush1.bf16.msra.mxu1 %v990_v59  ;;  %v1009_v40 = vld [vmem:[#allocation2 + $0x2c0] ss:$8 sps:$4 sm:$0xff]  }
  0x42   :  { %656 = vmatprep.subr.bf16.mxu1 %v994_v60 }
  0x44   :  { %702 = vmatpush1.bf16.msra.mxu0 %v921_v43  ;;  %v1023_v43 = vld [vmem:[#allocation2 + $0x2e4] ss:$8 sps:$4 sm:$0xff]  }
  0x45   :  { %703 = vmatprep.subr.bf16.mxu0 %v922_v44  ;;  %657 = vmatpush1.bf16.msra.mxu1 %v996_v0  ;;  %v1021_v44 = vld [vmem:[#allocation2 + $0x2e0] ss:$8 sps:$4 sm:$0xff]  }
  0x46   :  { %658 = vmatprep.subr.bf16.mxu1 %v1000_v1 }
  0x48   :  { %704 = vmatpush1.bf16.msra.mxu0 %v924_v47  ;;  %v32_v47 = vld [vmem:[%s1137_s0 + $0x20] sm:$0xff] }
  0x49   :  { %705 = vmatprep.subr.bf16.mxu0 %v925_v48  ;;  %659 = vmatpush1.bf16.msra.mxu1 %v1002_v7  ;;  %v38_v48 = vld [vmem:[%s1137_s0 + $0x50] sm:$0xff] }
  0x4a   :  { %660 = vmatprep.subr.bf16.mxu1 %v1006_v10  ;;  %v44_v49 = vpack.c.bf16 %v38_v48, %v32_v47 }
  0x4c   :  { %706 = vmatpush1.bf16.msra.mxu0 %v927_v51 }
  0x4d   :  { %707 = vmatprep.subr.bf16.mxu0 %v931_v52  ;;  %661 = vmatpush1.bf16.msra.mxu1 %v1008_v13 }
  0x4e   :  { %662 = vmatprep.subr.bf16.mxu1 %v1012_v15 }
  0x50   :  { %708 = vmatpush1.bf16.msra.mxu0 %v933_v55  ;;  %v145_v55 = vshrl.u32 %v144_v54, 7 }
  0x51   :  { %720 = vmatprep.subr.bf16.mxu0 %v939_v56  ;;  %663 = vmatpush1.bf16.msra.mxu1 %v1014_v17 }
  0x52   :  { %664 = vmatprep.subr.bf16.mxu1 %v1018_v19  ;;  %v146_v56 = vsub.s32 0, %v145_v55  ;;  %v150_v58 = vsub.s32 1, %v145_v55 }
  0x53   :  { %710 = vmatmul.mubr.bf16.vlgmr.msra.gmra.mrb[0].mxu0 %v42_v62 }
  0x54   :  { %721 = vmatpush1.bf16.msra.mxu0 %v937_v61  ;;  %752 = vmatprep.mubr.bf16.mxu0 %v45_v11  ;;  %v147_v59 = vrot.slane %v142_v57, %v146_v56  ;;  %v151_v60 = vrot.slane %v142_v57, %v150_v58 }
  0x55   :  { %722 = vmatprep.subr.bf16.mxu0 %v945_v63  ;;  %665 = vmatpush1.bf16.msra.mxu1 %v1020_v21 }
  0x58   :  { %723 = vmatpush1.bf16.msra.mxu0 %v943_v6  ;;  %667 = vmatmul.mubr.bf16.vlgmr.msra.gmra.mrb[0].mxu1 %v40_v25 }
  0x59   :  { %724 = vmatprep.subr.bf16.mxu0 %v951_v9 }
  0x5c   :  { %725 = vmatpush1.bf16.msra.mxu0 %v949_v12 }
  0x5d   :  { %726 = vmatprep.subr.bf16.mxu0 %v957_v14 }
  0x60   :  { %727 = vmatpush1.bf16.msra.mxu0 %v955_v16 }
  0x61   :  { %728 = vmatprep.subr.bf16.mxu0 %v963_v18 }
  0x64   :  { %729 = vmatpush1.bf16.msra.mxu0 %v961_v20 }
  0x65   :  { %730 = vmatprep.subr.bf16.mxu0 %v969_v24 }
  0x68   :  { %731 = vmatpush1.bf16.msra.mxu0 %v967_v26 }
  0x69   :  { %732 = vmatprep.subr.bf16.mxu0 %v975_v27 }
  0x6c   :  { %733 = vmatpush1.bf16.msra.mxu0 %v973_v28 }
  0x6d   :  { %734 = vmatprep.subr.bf16.mxu0 %v981_v29 }
  0x70   :  { %735 = vmatpush1.bf16.msra.mxu0 %v979_v30 }
  0x71   :  { %736 = vmatprep.subr.bf16.mxu0 %v987_v31 }
  0x74   :  { %737 = vmatpush1.bf16.msra.mxu0 %v985_v32 }
  0x75   :  { %738 = vmatprep.subr.bf16.mxu0 %v993_v33 }
  0x78   :  { %739 = vmatpush1.bf16.msra.mxu0 %v991_v34 }
  0x79   :  { %740 = vmatprep.subr.bf16.mxu0 %v999_v35 }
  0x7c   :  { %741 = vmatpush1.bf16.msra.mxu0 %v997_v36 }
  0x7d   :  { %742 = vmatprep.subr.bf16.mxu0 %v1005_v37 }
  0x80   :  { %743 = vmatpush1.bf16.msra.mxu0 %v1003_v38 }
  0x81   :  { %744 = vmatprep.subr.bf16.mxu0 %v1011_v39 }
  0x84   :  { %745 = vmatpush1.bf16.msra.mxu0 %v1009_v40 }
  0x85   :  { %746 = vmatprep.subr.bf16.mxu0 %v1017_v41 }
  0x88   :  { %747 = vmatpush1.bf16.msra.mxu0 %v1015_v42 }
  0x89   :  { %748 = vmatprep.subr.bf16.mxu0 %v1023_v43 }
  0x8c   :  { %749 = vmatpush1.bf16.msra.mxu0 %v1021_v44 }
  0x8d   :  { %750 = vmatprep.subr.bf16.mxu0 %v1026_v45 }
  0x90   :  { %751 = vmatpush1.bf16.msra.mxu0 %v1024_v46 }
  0x93   :  { %753 = vmatmul.mubr.bf16.vlgmr.msra.gmra.mrb[0].mxu0 %v44_v49 }
 0x12b   :  { %v668_v50 = vpop.f32.mrb[0].mxu1 }
 0x12c   :  { %v670_v51 = vpop.f32.mrb[1].mxu1  ;;  %v669_v61 = vadd.f32 %v668_v50, %v147_v59 }
 0x12d   :  { %v672_v52 = vpop.f32.mrb[2].mxu1  ;;  %v671_v62 = vadd.f32 %v670_v51, %v151_v60 }
 0x12e   :  { %v674_v53 = vpop.f32.mrb[3].mxu1  ;;  %v673_v0 = vadd.f32 %v672_v52, %v147_v59 }
 0x12f   :  { %v675_v3 = vadd.f32 %v674_v53, %v151_v60 }
 0x166   :  { %v754_v63 = vpop.f32.mrb[0].mxu0 }
 0x167   :  { %v869_v1 = vadd.f32 %v754_v63, %v669_v61  ;;  %v756_v2 = vpop.f32.mrb[1].mxu0 }
 0x168   :  { %v871_v4 = vadd.f32 %v756_v2, %v671_v62  ;;  %v758_v5 = vpop.f32.mrb[2].mxu0 }
 0x169   :  { %763 = vst [vmem:[%s1140_s3] sm:$0xff] %v869_v1  ;;  %v873_v6 = vadd.f32 %v758_v5, %v673_v0  ;;  %v760_v7 = vpop.f32.mrb[3].mxu0 }
 0x16a   :  { %764 = vst [vmem:[%s1140_s3 + $0x8] sm:$0xff] %v871_v4  ;;  %v875_v8 = vadd.f32 %v760_v7, %v675_v3 }
 0x16b   :  { %765 = vst [vmem:[%s1140_s3 + $0x10] sm:$0xff] %v873_v6 }
 0x16c   :  { %766 = vst [vmem:[%s1140_s3 + $0x18] sm:$0xff] %v875_v8 }
 0x16d   :  { %771 = vsyncpa [#allocation3], 1 }

// kernel: conformer_vq_motion_forward.19
= control target key start
LH: loop header
LB: loop body
LE: loop exit
PB: predicated region body
PF: predicated region fallthrough
CT: control target
= control target key end

     0   :  { %s760_s15 = smov 0   ;;  %s998_s0 = inlined_call_operand.vmem [shape: f32[2,4,256], index: 0, kind: input, shape index: {}]   ;;  %s999_s1 = inlined_call_operand.vmem [shape: f32[256,256], index: 1, kind: input, shape index: {}]   ;;  %s1000_s2 = inlined_call_operand.vmem [shape: f32[1,256], index: 2, kind: input, shape index: {}]   ;;  %s1001_s3 = inlined_call_operand.vmem [shape: f32[1,256], index: 3, kind: input, shape index: {}]   ;;  %s1002_s4 = inlined_call_operand.vmem [shape: f32[2,4,256], index: 4, kind: output, shape index: {}]  }
   0x1 LB: > { %s571_s16 = sadd.s32 4294967295, %s733_s15   ;;  %p575_p0 = scmp.ge.s32.totalorder %s733_s15, 1  ;;  %s733_s15 = sphi %s760_s15, %s14_s15  }
   0x2   : > { %p162_p1 = scmp.lt.s32.totalorder %s733_s15, 3 }
   0x4   : > { %p163_p2 = pnand %p575_p0, %p162_p1 }
   0x5   : > { %v236_v0 = vld [vmem:[%s999_s1 + $0x8] sm:$0xff] (!%p163_p2)  ;;  %v238_v1 = vld [vmem:[%s999_s1 + $0x18] sm:$0xff] (!%p163_p2)  ;;  %v235_v2 = vld [vmem:[%s999_s1] sm:$0xff] (!%p163_p2)  ;;  %p188_p3 = scmp.lt.s32.totalorder (!%p163_p2), %s571_s16, 1  ;;  %vm202_vm0 = vcmask (!%p163_p2), 1043456  }
   0x6   : > { %166 = sbr.rel (%p163_p2) target bundleno = 340 (0x154), region = 36  ;;  %v584_v3 = vpack.c.bf16 (!%p163_p2), %v238_v1, %v236_v0  ;;  %v237_v4 = vld [vmem:[%s999_s1 + $0x10] sm:$0xff] (!%p163_p2)  ;;  %v240_v5 = vld [vmem:[%s999_s1 + $0x28] sm:$0xff] (!%p163_p2)  ;;  %v242_v6 = vld [vmem:[%s999_s1 + $0x38] sm:$0xff] (!%p163_p2) }
   0x7   : > { %v586_v7 = vpack.c.bf16 (!%p163_p2), %v237_v4, %v235_v2  ;;  %v588_v8 = vpack.c.bf16 (!%p163_p2), %v242_v6, %v240_v5  ;;  %v239_v9 = vld [vmem:[%s999_s1 + $0x20] sm:$0xff] (!%p163_p2)  ;;  %v241_v10 = vld [vmem:[%s999_s1 + $0x30] sm:$0xff] (!%p163_p2)  ;;  %v244_v11 = vld [vmem:[%s999_s1 + $0x48] sm:$0xff] (!%p163_p2) }
   0x8   : > { %585 = vmatprep.subr.bf16.mxu0 (!%p163_p2), %v584_v3  ;;  %649 = vmatprep.subr.bf16.mxu1 (!%p163_p2), %v584_v3  ;;  %v246_v12 = vld [vmem:[%s999_s1 + $0x58] sm:$0xff] (!%p163_p2)  ;;  %v590_v13 = vpack.c.bf16 (!%p163_p2), %v241_v10, %v239_v9  ;;  %v243_v15 = vld [vmem:[%s999_s1 + $0x40] sm:$0xff] (!%p163_p2)  ;;  %v245_v16 = vld [vmem:[%s999_s1 + $0x50] sm:$0xff] (!%p163_p2) }
   0x9   : > { %587 = vmatpush1.bf16.msra.mxu0 (!%p163_p2), %v586_v7  ;;  %651 = vmatpush1.bf16.msra.mxu1 (!%p163_p2), %v586_v7  ;;  %v592_v14 = vpack.c.bf16 (!%p163_p2), %v246_v12, %v244_v11  ;;  %v248_v17 = vld [vmem:[%s999_s1 + $0x68] sm:$0xff] (!%p163_p2)  ;;  %v250_v18 = vld [vmem:[%s999_s1 + $0x78] sm:$0xff] (!%p163_p2)  ;;  %v594_v19 = vpack.c.bf16 (!%p163_p2), %v245_v16, %v243_v15  ;;  %v247_v21 = vld [vmem:[%s999_s1 + $0x60] sm:$0xff] (!%p163_p2) }
   0xa   : > { %589 = vmatprep.subr.bf16.mxu0 (!%p163_p2), %v588_v8  ;;  %653 = vmatprep.subr.bf16.mxu1 (!%p163_p2), %v588_v8  ;;  %v596_v20 = vpack.c.bf16 (!%p163_p2), %v250_v18, %v248_v17  ;;  %v249_v22 = vld [vmem:[%s999_s1 + $0x70] sm:$0xff] (!%p163_p2)  ;;  %v252_v23 = vld [vmem:[%s999_s1 + $0x88] sm:$0xff] (!%p163_p2)  ;;  %v254_v24 = vld [vmem:[%s999_s1 + $0x98] sm:$0xff] (!%p163_p2) }
   0xb   : > { %v598_v25 = vpack.c.bf16 (!%p163_p2), %v249_v22, %v247_v21  ;;  %v600_v26 = vpack.c.bf16 (!%p163_p2), %v254_v24, %v252_v23  ;;  %v251_v27 = vld [vmem:[%s999_s1 + $0x80] sm:$0xff] (!%p163_p2)  ;;  %v253_v28 = vld [vmem:[%s999_s1 + $0x90] sm:$0xff] (!%p163_p2)  ;;  %v256_v29 = vld [vmem:[%s999_s1 + $0xa8] sm:$0xff] (!%p163_p2) }
   0xc   : > { %v258_v30 = vld [vmem:[%s999_s1 + $0xb8] sm:$0xff] (!%p163_p2)  ;;  %v602_v31 = vpack.c.bf16 (!%p163_p2), %v253_v28, %v251_v27  ;;  %v255_v33 = vld [vmem:[%s999_s1 + $0xa0] sm:$0xff] (!%p163_p2)  ;;  %v257_v34 = vld [vmem:[%s999_s1 + $0xb0] sm:$0xff] (!%p163_p2) }
   0xd   : > { %591 = vmatpush1.bf16.msra.mxu0 %v590_v13  ;;  %655 = vmatpush1.bf16.msra.mxu1 %v590_v13  ;;  %s1004_s16 = smov (!%p188_p3, %s571_s16), 1  ;;  %v604_v32 = vpack.c.bf16 %v258_v30, %v256_v29  ;;  %v260_v35 = vld [vmem:[%s999_s1 + $0xc8] sm:$0xff]  ;;  %v262_v36 = vld [vmem:[%s999_s1 + $0xd8] sm:$0xff]  ;;  %v606_v37 = vpack.c.bf16 %v257_v34, %v255_v33  ;;  %v259_v39 = vld [vmem:[%s999_s1 + $0xc0] sm:$0xff] }
   0xe   : > { %593 = vmatprep.subr.bf16.mxu0 %v592_v14  ;;  %657 = vmatprep.subr.bf16.mxu1 %v592_v14  ;;  %s582_s11 = sshll.u32 %s1004_s16, 3  ;;  %v608_v38 = vpack.c.bf16 %v262_v36, %v260_v35  ;;  %v261_v40 = vld [vmem:[%s999_s1 + $0xd0] sm:$0xff]  ;;  %v264_v42 = vld [vmem:[%s999_s1 + $0xe8] sm:$0xff]  ;;  %v266_v43 = vld [vmem:[%s999_s1 + $0xf8] sm:$0xff] }
   0xf   : > { %s192_s24 = scalar_lea.vmem %s998_s0, %s582_s11  ;;  %v610_v46 = vpack.c.bf16 %v261_v40, %v259_v39  ;;  %v612_v49 = vpack.c.bf16 %v266_v43, %v264_v42  ;;  %v263_v50 = vld [vmem:[%s999_s1 + $0xe0] sm:$0xff]  ;;  %v265_v51 = vld [vmem:[%s999_s1 + $0xf0] sm:$0xff]  ;;  %v268_v53 = vld [vmem:[%s999_s1 + $0x108] sm:$0xff]  ;;  %s197_s13 = scalar_lea.vmem %s1002_s4, %s582_s11 }
  0x10   : > { %v864_v41 = vld [vmem:[%s192_s24] sm:$0xff]  ;;  %v270_v54 = vld [vmem:[%s999_s1 + $0x118] sm:$0xff]  ;;  %v614_v58 = vpack.c.bf16 %v265_v51, %v263_v50  ;;  %v269_v61 = vld [vmem:[%s999_s1 + $0x110] sm:$0xff] }
  0x11   : > { %595 = vmatpush1.bf16.msra.mxu0 %v594_v19  ;;  %659 = vmatpush1.bf16.msra.mxu1 %v594_v19  ;;  %v200_v44 = vcombine.high %v864_v41, %v864_v41  ;;  %v217_v45 = vmul.f32 %v864_v41, %v864_v41  ;;  %v616_v59 = vpack.c.bf16 %v270_v54, %v268_v53  ;;  %v267_v60 = vld [vmem:[%s999_s1 + $0x100] sm:$0xff]  ;;  %v272_v0 = vld [vmem:[%s999_s1 + $0x128] sm:$0xff]  ;;  %v274_v1 = vld [vmem:[%s999_s1 + $0x138] sm:$0xff]  ;;  %v203_v22 = vsel %vm202_vm0, %v864_v41, 0.0 }
  0x12   : > { %597 = vmatprep.subr.bf16.mxu0 %v596_v20  ;;  %661 = vmatprep.subr.bf16.mxu1 %v596_v20  ;;  %v618_v4 = vpack.c.bf16 %v269_v61, %v267_v60  ;;  %v620_v5 = vpack.c.bf16 %v274_v1, %v272_v0  ;;  %v271_v6 = vld [vmem:[%s999_s1 + $0x120] sm:$0xff]  ;;  %v273_v7 = vld [vmem:[%s999_s1 + $0x130] sm:$0xff]  ;;  %v276_v10 = vld [vmem:[%s999_s1 + $0x148] sm:$0xff]  ;;  %v204_v29 = vrot.slane %v203_v22, 4  ;;  %v450_v1 = vlaneseq }
  0x13   : > { %v210_v47 = vsel %vm202_vm0, %v200_v44, 0.0  ;;  %v219_v48 = vcombine.high %v217_v45, %v217_v45  ;;  %v278_v11 = vld [vmem:[%s999_s1 + $0x158] sm:$0xff]  ;;  %v622_v14 = vpack.c.bf16 %v273_v7, %v271_v6  ;;  %v275_v16 = vld [vmem:[%s999_s1 + $0x140] sm:$0xff]  ;;  %v277_v17 = vld [vmem:[%s999_s1 + $0x150] sm:$0xff]  ;;  %v221_v23 = vsel %vm202_vm0, %v217_v45, 0.0 }
  0x14   : > { %v211_v52 = vrot.slane %v210_v47, 4  ;;  %v624_v15 = vpack.c.bf16 %v278_v11, %v276_v10  ;;  %v280_v19 = vld [vmem:[%s999_s1 + $0x168] sm:$0xff]  ;;  %v282_v20 = vld [vmem:[%s999_s1 + $0x178] sm:$0xff]  ;;  %v626_v21 = vpack.c.bf16 %v277_v17, %v275_v16  ;;  %v222_v30 = vrot.slane %v221_v23, 4  ;;  %v283_v33 = vld [vmem:[%s999_s1 + $0x180] sm:$0xff] }
  0x15   : > { %599 = vmatpush1.bf16.msra.mxu0 %v598_v25  ;;  %663 = vmatpush1.bf16.msra.mxu1 %v598_v25  ;;  %v228_v55 = vsel %vm202_vm0, %v219_v48, 0.0  ;;  %v628_v24 = vpack.c.bf16 %v282_v20, %v280_v19  ;;  %v279_v25 = vld [vmem:[%s999_s1 + $0x160] sm:$0xff]  ;;  %v284_v27 = vld [vmem:[%s999_s1 + $0x188] sm:$0xff]  ;;  %v286_v28 = vld [vmem:[%s999_s1 + $0x198] sm:$0xff] }
  0x16   : > { %601 = vmatprep.subr.bf16.mxu0 %v600_v26  ;;  %665 = vmatprep.subr.bf16.mxu1 %v600_v26  ;;  %v212_v56 = vadd.f32 %v211_v52, %v210_v47  ;;  %v229_v57 = vrot.slane %v228_v55, 4  ;;  %v281_v26 = vld [vmem:[%s999_s1 + $0x170] sm:$0xff]  ;;  %v288_v35 = vld [vmem:[%s999_s1 + $0x1a8] sm:$0xff]  ;;  %v290_v36 = vld [vmem:[%s999_s1 + $0x1b8] sm:$0xff] }
  0x17   : > { %v285_v34 = vld [vmem:[%s999_s1 + $0x190] sm:$0xff]  ;;  %v636_v40 = vpack.c.bf16 %v290_v36, %v288_v35  ;;  %v287_v42 = vld [vmem:[%s999_s1 + $0x1a0] sm:$0xff]  ;;  %v292_v44 = vld [vmem:[%s999_s1 + $0x1c8] sm:$0xff] }
  0x18   : > { %v213_v62 = vrot.slane %v212_v56, 2  ;;  %v230_v63 = vadd.f32 %v229_v57, %v228_v55  ;;  %v634_v39 = vpack.c.bf16 %v285_v34, %v283_v33  ;;  %v289_v43 = vld [vmem:[%s999_s1 + $0x1b0] sm:$0xff]  ;;  %v294_v45 = vld [vmem:[%s999_s1 + $0x1d8] sm:$0xff]  ;;  %v291_v50 = vld [vmem:[%s999_s1 + $0x1c0] sm:$0xff] }
  0x19   : > { %603 = vmatpush1.bf16.msra.mxu0 %v602_v31  ;;  %667 = vmatpush1.bf16.msra.mxu1 %v602_v31  ;;  %v630_v31 = vpack.c.bf16 %v281_v26, %v279_v25  ;;  %v638_v48 = vpack.c.bf16 %v289_v43, %v287_v42  ;;  %v293_v51 = vld [vmem:[%s999_s1 + $0x1d0] sm:$0xff]  ;;  %v296_v52 = vld [vmem:[%s999_s1 + $0x1e8] sm:$0xff]  ;;  %v298_v53 = vld [vmem:[%s999_s1 + $0x1f8] sm:$0xff] }
  0x1a   : > { %605 = vmatprep.subr.bf16.mxu0 %v604_v32  ;;  %669 = vmatprep.subr.bf16.mxu1 %v604_v32  ;;  %v214_v2 = vadd.f32 %v213_v62, %v212_v56  ;;  %v231_v3 = vrot.slane %v230_v63, 2  ;;  %v632_v32 = vpack.c.bf16 %v286_v28, %v284_v27  ;;  %v642_v56 = vpack.c.bf16 %v293_v51, %v291_v50 }
  0x1b   : > { %v644_v57 = vpack.c.bf16 %v298_v53, %v296_v52 }
  0x1c   : > { %v215_v8 = vrot.slane %v214_v2, 1  ;;  %v232_v9 = vadd.f32 %v231_v3, %v230_v63 }
  0x1d   : > { %607 = vmatpush1.bf16.msra.mxu0 %v606_v37  ;;  %671 = vmatpush1.bf16.msra.mxu1 %v606_v37  ;;  %v205_v37 = vadd.f32 %v204_v29, %v203_v22  ;;  %v480_v22 = vld [vmem:[%s1000_s2] sm:$0x3] }
  0x1e   : > { %609 = vmatprep.subr.bf16.mxu0 %v608_v38  ;;  %673 = vmatprep.subr.bf16.mxu1 %v608_v38  ;;  %v216_v12 = vadd.f32 %v215_v8, %v214_v2  ;;  %v233_v13 = vrot.slane %v232_v9, 1  ;;  %v223_v38 = vadd.f32 %v222_v30, %v221_v23  ;;  %v451_v2 = vshrl.u32 %v450_v1, 7  ;;  %v493_v23 = vld [vmem:[%s1001_s3] sm:$0x3] }
  0x20   : > { %v234_v18 = vadd.f32 %v233_v13, %v232_v9  ;;  %363 = vmatprep.mubr.f32.mxu0 %v216_v12  ;;  %v224_v47 = vrot.slane %v223_v38, 2  ;;  %v452_v3 = vsub.s32 0, %v451_v2 }
  0x21   : > { %611 = vmatpush1.bf16.msra.mxu0 %v610_v46  ;;  %675 = vmatpush1.bf16.msra.mxu1 %v610_v46  ;;  %v206_v46 = vrot.slane %v205_v37, 2 }
  0x22   : > { %613 = vmatprep.subr.bf16.mxu0 %v612_v49  ;;  %677 = vmatprep.subr.bf16.mxu1 %v612_v49  ;;  %v640_v49 = vpack.c.bf16 %v294_v45, %v292_v44  ;;  %v225_v55 = vadd.f32 %v224_v47, %v223_v38  ;;  %v485_v25 = vrot.slane %v480_v22, %v452_v3 }
  0x23   : > { %437 = vmatprep.mubr.f32.mxu1 %v234_v18  ;;  %v207_v54 = vadd.f32 %v206_v46, %v205_v37  ;;  %v498_v30 = vrot.slane %v493_v23, %v452_v3 }
  0x24   : > { %v226_v61 = vrot.slane %v225_v55, 1 }
  0x25   : > { %615 = vmatpush1.bf16.msra.mxu0 %v614_v58  ;;  %679 = vmatpush1.bf16.msra.mxu1 %v614_v58  ;;  %v295_v58 = vld [vmem:[%s999_s1 + $0x1e0] sm:$0xff]  ;;  %v208_v60 = vrot.slane %v207_v54, 1 }
  0x26   : > { %617 = vmatprep.subr.bf16.mxu0 %v616_v59  ;;  %681 = vmatprep.subr.bf16.mxu1 %v616_v59  ;;  %v297_v59 = vld [vmem:[%s999_s1 + $0x1f0] sm:$0xff]  ;;  %v227_v0 = vadd.f32 %v226_v61, %v225_v55 }
  0x27   : > { %v646_v62 = vpack.c.bf16 %v297_v59, %v295_v58  ;;  %v209_v63 = vadd.f32 %v208_v60, %v207_v54 }
  0x29   : > { %619 = vmatpush1.bf16.msra.mxu0 %v618_v4  ;;  %683 = vmatpush1.bf16.msra.mxu1 %v618_v4 }
  0x2a   : > { %621 = vmatprep.subr.bf16.mxu0 %v620_v5  ;;  %685 = vmatprep.subr.bf16.mxu1 %v620_v5 }
  0x2d   : > { %623 = vmatpush1.bf16.msra.mxu0 %v622_v14  ;;  %687 = vmatpush1.bf16.msra.mxu1 %v622_v14 }
  0x2e   : > { %625 = vmatprep.subr.bf16.mxu0 %v624_v15  ;;  %689 = vmatprep.subr.bf16.mxu1 %v624_v15 }
  0x31   : > { %627 = vmatpush1.bf16.msra.mxu0 %v626_v21  ;;  %691 = vmatpush1.bf16.msra.mxu1 %v626_v21  ;;  %v488_v21 = vsub.s32 1, %v451_v2 }
  0x32   : > { %629 = vmatprep.subr.bf16.mxu0 %v628_v24  ;;  %693 = vmatprep.subr.bf16.mxu1 %v628_v24 }
  0x33   : > { %v489_v26 = vrot.slane %v480_v22, %v488_v21 }
  0x35   : > { %631 = vmatpush1.bf16.msra.mxu0 %v630_v31  ;;  %695 = vmatpush1.bf16.msra.mxu1 %v630_v31  ;;  %v502_v31 = vrot.slane %v493_v23, %v488_v21  ;;  %v490_v34 = vcombine.low %v485_v25, %v489_v26 }
  0x36   : > { %633 = vmatprep.subr.bf16.mxu0 %v632_v32  ;;  %697 = vmatprep.subr.bf16.mxu1 %v632_v32 }
  0x37   : > { %v503_v36 = vcombine.low %v498_v30, %v502_v31 }
  0x39   : > { %635 = vmatpush1.bf16.msra.mxu0 %v634_v39  ;;  %699 = vmatpush1.bf16.msra.mxu1 %v634_v39 }
  0x3a   : > { %637 = vmatprep.subr.bf16.mxu0 %v636_v40  ;;  %701 = vmatprep.subr.bf16.mxu1 %v636_v40 }
  0x3d   : > { %639 = vmatpush1.bf16.msra.mxu0 %v638_v48  ;;  %703 = vmatpush1.bf16.msra.mxu1 %v638_v48 }
  0x3e   : > { %641 = vmatprep.subr.bf16.mxu0 %v640_v49  ;;  %705 = vmatprep.subr.bf16.mxu1 %v640_v49 }
  0x41   : > { %643 = vmatpush1.bf16.msra.mxu0 %v642_v56  ;;  %707 = vmatpush1.bf16.msra.mxu1 %v642_v56 }
  0x42   : > { %645 = vmatprep.subr.bf16.mxu0 %v644_v57  ;;  %709 = vmatprep.subr.bf16.mxu1 %v644_v57 }
  0x45   : > { %647 = vmatpush1.bf16.msra.mxu0 %v646_v62  ;;  %711 = vmatpush1.bf16.msra.mxu1 %v646_v62 }
  0x48   : > { %364 = vmatmul.mubr.f32.vlgmr.msra.gmra.mrb[0].mxu0 %v209_v63  ;;  %438 = vmatmul.mubr.f32.vlgmr.msra.gmra.mrb[0].mxu1 %v227_v0 }
 0x11b   : > { %v365_v4 = vpop.f32.mrb[0].mxu0  ;;  %v439_v5 = vpop.f32.mrb[0].mxu1 }
 0x11c   : > { %v371_v6 = vmul.f32 0.0009765625, %v365_v4  ;;  %v367_v7 = vpop.f32.mrb[1].mxu0  ;;  %v444_v8 = vmul.f32 0.0009765625, %v439_v5  ;;  %v441_v9 = vpop.f32.mrb[1].mxu1 }
 0x11d   : > { %v372_v10 = vmul.f32 0.0009765625, %v367_v7  ;;  %v445_v11 = vmul.f32 0.0009765625, %v441_v9 }
 0x11e   : > { %v446_v12 = vmul.f32 %v371_v6, %v371_v6  ;;  %v453_v13 = vrot.slane %v371_v6, %v452_v3 }
 0x11f   : > { %v447_v14 = vmul.f32 %v372_v10, %v372_v10  ;;  %v457_v15 = vrot.slane %v372_v10, %v452_v3 }
 0x120   : > { %v448_v16 = vsub.f32 %v444_v8, %v446_v12 }
 0x121   : > { %v460_v17 = vcombine.low %v453_v13, %v457_v15  ;;  %v449_v18 = vsub.f32 %v445_v11, %v447_v14 }
 0x122   : > { %v463_v19 = vadd.f32 1e-05, %v448_v16 }
 0x123   : > { %v464_v20 = vadd.f32 1e-05, %v449_v18  ;;  %v462_v32 = vsub.f32 %v864_v41, %v460_v17 }
 0x124   : > { %721 = vrsqrt.f32 %v463_v19 }
 0x125   : > { %723 = vrsqrt.f32 %v464_v20 }
 0x12e   : > { %v722_v24 = vpop.eup %721 }
 0x12f   : > { %v724_v27 = vpop.eup %723  ;;  %v470_v28 = vrot.slane %v722_v24, %v452_v3 }
 0x130   : > { %v474_v29 = vrot.slane %v724_v27, %v452_v3 }
 0x132   : > { %v477_v33 = vcombine.low %v470_v28, %v474_v29 }
 0x134   : > { %v479_v35 = vmul.f32 %v477_v33, %v462_v32 }
 0x136   : > { %v492_v37 = vmul.f32 %v490_v34, %v479_v35 }
 0x138   : > { %v505_v38 = vadd.f32 %v503_v36, %v492_v37 }
 0x13a   : > { %v507_v39 = vmul.f32 0.044715, %v505_v38  ;;  %v506_v46 = vmul.f32 0.5, %v505_v38 }
 0x13c   : > { %v508_v40 = vmul.f32 %v507_v39, %v505_v38 }
 0x13e   : > { %v509_v42 = vmul.f32 %v508_v40, %v505_v38 }
 0x140   : > { %v510_v43 = vadd.f32 %v509_v42, %v505_v38 }
 0x142   : > { %v511_v44 = vmul.f32 0.7978846, %v510_v43 }
 0x144   : > { %725 = vtanh.f32 %v511_v44 }
 0x14e   : > { %v726_v45 = vpop.eup %725 }
 0x14f   : > { %v513_v47 = vadd.f32 1.0, %v726_v45 }
 0x151   : > { %v514_v41 = vmul.f32 %v513_v47, %v506_v46 }
 0x153   : > { %515 = vst [vmem:[%s197_s13] sm:$0xff] %v514_v41 }
 0x154 PF: > { %s14_s15 = sadd.s32 1, %s733_s15  }
 0x155   : > { %p11_p4 = scmp.ge.s32.totalorder %s14_s15, 4  }
 0x157   :  { %13 = sbr.rel (!%p11_p4) target bundleno = 1 (0x1), region = 66 }

// kernel: conformer_vq_motion_forward.18
= control target key start
LH: loop header
LB: loop body
LE: loop exit
PB: predicated region body
PF: predicated region fallthrough
CT: control target
= control target key end

     0   :  { %s1326_s1 = inlined_call_operand.vmem [shape: bf16[768,256], index: 1, kind: input, shape index: {}]   ;;  %s1327_s0 = inlined_call_operand.vmem [shape: f32[8,768], index: 0, kind: input, shape index: {}]   ;;  %s1328_s2 = inlined_call_operand.vmem [shape: f32[1,256], index: 2, kind: input, shape index: {}]   ;;  %s1329_s3 = inlined_call_operand.vmem [shape: f32[8,256], index: 3, kind: output, shape index: {}]  }
   0x1   :  { %v847_v0 = vld [vmem:[%s1326_s1 + $0x104] ss:$8 sps:$4 sm:$0xff]   ;;  %v849_v1 = vld [vmem:[%s1326_s1 + $0x100] ss:$8 sps:$4 sm:$0xff]   ;;  %v850_v2 = vld [vmem:[%s1326_s1 + $0x114] ss:$8 sps:$4 sm:$0xff]  }
   0x2   :  { %655 = vmatprep.subr.bf16.mxu0 %v847_v0  ;;  %v852_v3 = vld [vmem:[%s1326_s1 + $0x110] ss:$8 sps:$4 sm:$0xff]   ;;  %v853_v4 = vld [vmem:[%s1326_s1 + $0x124] ss:$8 sps:$4 sm:$0xff]   ;;  %v855_v5 = vld [vmem:[%s1326_s1 + $0x120] ss:$8 sps:$4 sm:$0xff]  }
   0x3   :  { %656 = vmatpush1.bf16.msra.mxu0 %v849_v1  ;;  %v856_v6 = vld [vmem:[%s1326_s1 + $0x134] ss:$8 sps:$4 sm:$0xff]   ;;  %v858_v7 = vld [vmem:[%s1326_s1 + $0x130] ss:$8 sps:$4 sm:$0xff]   ;;  %v859_v8 = vld [vmem:[%s1326_s1 + $0x144] ss:$8 sps:$4 sm:$0xff]  }
   0x4   :  { %657 = vmatprep.subr.bf16.mxu0 %v850_v2  ;;  %v861_v9 = vld [vmem:[%s1326_s1 + $0x140] ss:$8 sps:$4 sm:$0xff]   ;;  %v862_v10 = vld [vmem:[%s1326_s1 + $0x154] ss:$8 sps:$4 sm:$0xff]   ;;  %v864_v11 = vld [vmem:[%s1326_s1 + $0x150] ss:$8 sps:$4 sm:$0xff]  }
   0x5   :  { %v865_v12 = vld [vmem:[%s1326_s1 + $0x164] ss:$8 sps:$4 sm:$0xff]   ;;  %v894_v14 = vld [vmem:[%s1326_s1] ss:$8 sps:$4 sm:$0xff]   ;;  %v868_v16 = vld [vmem:[%s1326_s1 + $0x174] ss:$8 sps:$4 sm:$0xff]  }
   0x6   :  { %v892_v13 = vld [vmem:[%s1326_s1 + $0x4] ss:$8 sps:$4 sm:$0xff]   ;;  %v867_v15 = vld [vmem:[%s1326_s1 + $0x160] ss:$8 sps:$4 sm:$0xff]   ;;  %v898_v17 = vld [vmem:[%s1326_s1 + $0x14] ss:$8 sps:$4 sm:$0xff]  }
   0x7   :  { %658 = vmatpush1.bf16.msra.mxu0 %v852_v3  ;;  %614 = vmatprep.subr.bf16.mxu1 %v892_v13  ;;  %v900_v18 = vld [vmem:[%s1326_s1 + $0x10] ss:$8 sps:$4 sm:$0xff]   ;;  %v904_v22 = vld [vmem:[%s1326_s1 + $0x24] ss:$8 sps:$4 sm:$0xff]   ;;  %v906_v23 = vld [vmem:[%s1326_s1 + $0x20] ss:$8 sps:$4 sm:$0xff]  }
   0x8   :  { %659 = vmatprep.subr.bf16.mxu0 %v853_v4  ;;  %615 = vmatpush1.bf16.msra.mxu1 %v894_v14  ;;  %v17_v19 = vld [vmem:[%s1327_s0 + $0x18] sm:$0xff]  ;;  %v871_v24 = vld [vmem:[%s1326_s1 + $0x184] ss:$8 sps:$4 sm:$0xff]   ;;  %v873_v26 = vld [vmem:[%s1326_s1 + $0x180] ss:$8 sps:$4 sm:$0xff]  }
   0x9   :  { %v870_v20 = vld [vmem:[%s1326_s1 + $0x170] ss:$8 sps:$4 sm:$0xff]   ;;  %616 = vmatprep.subr.bf16.mxu1 %v898_v17  ;;  %v23_v21 = vpack.c.bf16 %v17_v19, %v17_v19  ;;  %v910_v25 = vld [vmem:[%s1326_s1 + $0x34] ss:$8 sps:$4 sm:$0xff]   ;;  %v916_v29 = vld [vmem:[%s1326_s1 + $0x44] ss:$8 sps:$4 sm:$0xff]  }
   0xa   :  { %v912_v27 = vld [vmem:[%s1326_s1 + $0x30] ss:$8 sps:$4 sm:$0xff]   ;;  %v874_v28 = vld [vmem:[%s1326_s1 + $0x194] ss:$8 sps:$4 sm:$0xff]   ;;  %v918_v31 = vld [vmem:[%s1326_s1 + $0x40] ss:$8 sps:$4 sm:$0xff]  }
   0xb   :  { %660 = vmatpush1.bf16.msra.mxu0 %v855_v5  ;;  %687 = vmatprep.mubr.bf16.mxu0 %v23_v21  ;;  %v876_v30 = vld [vmem:[%s1326_s1 + $0x190] ss:$8 sps:$4 sm:$0xff]   ;;  %v877_v32 = vld [vmem:[%s1326_s1 + $0x1a4] ss:$8 sps:$4 sm:$0xff]   ;;  %v922_v33 = vld [vmem:[%s1326_s1 + $0x54] ss:$8 sps:$4 sm:$0xff]  }
   0xc   :  { %661 = vmatprep.subr.bf16.mxu0 %v856_v6  ;;  %617 = vmatpush1.bf16.msra.mxu1 %v900_v18  ;;  %v879_v34 = vld [vmem:[%s1326_s1 + $0x1a0] ss:$8 sps:$4 sm:$0xff]   ;;  %v924_v35 = vld [vmem:[%s1326_s1 + $0x50] ss:$8 sps:$4 sm:$0xff]   ;;  %v880_v36 = vld [vmem:[%s1326_s1 + $0x1b4] ss:$8 sps:$4 sm:$0xff]  }
   0xd   :  { %618 = vmatprep.subr.bf16.mxu1 %v904_v22  ;;  %v928_v37 = vld [vmem:[%s1326_s1 + $0x64] ss:$8 sps:$4 sm:$0xff]   ;;  %v882_v38 = vld [vmem:[%s1326_s1 + $0x1b0] ss:$8 sps:$4 sm:$0xff]   ;;  %v930_v39 = vld [vmem:[%s1326_s1 + $0x60] ss:$8 sps:$4 sm:$0xff]  }
   0xe   :  { %v883_v40 = vld [vmem:[%s1326_s1 + $0x1c4] ss:$8 sps:$4 sm:$0xff]   ;;  %v934_v41 = vld [vmem:[%s1326_s1 + $0x74] ss:$8 sps:$4 sm:$0xff]   ;;  %v885_v42 = vld [vmem:[%s1326_s1 + $0x1c0] ss:$8 sps:$4 sm:$0xff]  }
   0xf   :  { %662 = vmatpush1.bf16.msra.mxu0 %v858_v7  ;;  %v936_v43 = vld [vmem:[%s1326_s1 + $0x70] ss:$8 sps:$4 sm:$0xff]   ;;  %v886_v44 = vld [vmem:[%s1326_s1 + $0x1d4] ss:$8 sps:$4 sm:$0xff]   ;;  %v940_v45 = vld [vmem:[%s1326_s1 + $0x84] ss:$8 sps:$4 sm:$0xff]  }
  0x10   :  { %663 = vmatprep.subr.bf16.mxu0 %v859_v8  ;;  %619 = vmatpush1.bf16.msra.mxu1 %v906_v23  ;;  %v888_v46 = vld [vmem:[%s1326_s1 + $0x1d0] ss:$8 sps:$4 sm:$0xff]   ;;  %v942_v47 = vld [vmem:[%s1326_s1 + $0x80] ss:$8 sps:$4 sm:$0xff]   ;;  %v889_v48 = vld [vmem:[%s1326_s1 + $0x1e4] ss:$8 sps:$4 sm:$0xff]  }
  0x11   :  { %620 = vmatprep.subr.bf16.mxu1 %v910_v25  ;;  %v946_v49 = vld [vmem:[%s1326_s1 + $0x94] ss:$8 sps:$4 sm:$0xff]   ;;  %v891_v50 = vld [vmem:[%s1326_s1 + $0x1e0] ss:$8 sps:$4 sm:$0xff]   ;;  %v948_v51 = vld [vmem:[%s1326_s1 + $0x90] ss:$8 sps:$4 sm:$0xff]  }
  0x12   :  { %v895_v52 = vld [vmem:[%s1326_s1 + $0x1f4] ss:$8 sps:$4 sm:$0xff]   ;;  %v952_v53 = vld [vmem:[%s1326_s1 + $0xa4] ss:$8 sps:$4 sm:$0xff]   ;;  %v897_v54 = vld [vmem:[%s1326_s1 + $0x1f0] ss:$8 sps:$4 sm:$0xff]  }
  0x13   :  { %664 = vmatpush1.bf16.msra.mxu0 %v861_v9  ;;  %v16_v55 = vld [vmem:[%s1327_s0 + $0x10] sm:$0xff]  ;;  %v954_v56 = vld [vmem:[%s1326_s1 + $0xa0] ss:$8 sps:$4 sm:$0xff]   ;;  %v903_v57 = vld [vmem:[%s1326_s1 + $0x204] ss:$8 sps:$4 sm:$0xff]  }
  0x14   :  { %665 = vmatprep.subr.bf16.mxu0 %v862_v10  ;;  %621 = vmatpush1.bf16.msra.mxu1 %v912_v27  ;;  %v958_v58 = vld [vmem:[%s1326_s1 + $0xb4] ss:$8 sps:$4 sm:$0xff]   ;;  %v901_v59 = vld [vmem:[%s1326_s1 + $0x200] ss:$8 sps:$4 sm:$0xff]   ;;  %v22_v60 = vpack.c.bf16 %v16_v55, %v16_v55  ;;  %v960_v62 = vld [vmem:[%s1326_s1 + $0xb0] ss:$8 sps:$4 sm:$0xff]  }
  0x15   :  { %622 = vmatprep.subr.bf16.mxu1 %v916_v29  ;;  %v909_v61 = vld [vmem:[%s1326_s1 + $0x214] ss:$8 sps:$4 sm:$0xff]   ;;  %v15_v63 = vld [vmem:[%s1327_s0 + $0x8] sm:$0xff]  ;;  %v907_v4 = vld [vmem:[%s1326_s1 + $0x210] ss:$8 sps:$4 sm:$0xff]  }
  0x16   :  { %v964_v0 = vld [vmem:[%s1326_s1 + $0xc4] ss:$8 sps:$4 sm:$0xff]   ;;  %v21_v1 = vpack.c.bf16 %v15_v63, %v15_v63  ;;  %v966_v5 = vld [vmem:[%s1326_s1 + $0xc0] ss:$8 sps:$4 sm:$0xff]   ;;  %v970_v7 = vld [vmem:[%s1326_s1 + $0xd4] ss:$8 sps:$4 sm:$0xff]  }
  0x17   :  { %666 = vmatpush1.bf16.msra.mxu0 %v864_v11  ;;  %v19_v2 = vld [vmem:[%s1327_s0 + $0x28] sm:$0xff]  ;;  %v972_v9 = vld [vmem:[%s1326_s1 + $0xd0] ss:$8 sps:$4 sm:$0xff]   ;;  %v921_v10 = vld [vmem:[%s1326_s1 + $0x234] ss:$8 sps:$4 sm:$0xff]  }
  0x18   :  { %667 = vmatprep.subr.bf16.mxu0 %v865_v12  ;;  %623 = vmatpush1.bf16.msra.mxu1 %v918_v31  ;;  %v25_v3 = vpack.c.bf16 %v19_v2, %v19_v2  ;;  %v915_v6 = vld [vmem:[%s1326_s1 + $0x224] ss:$8 sps:$4 sm:$0xff]   ;;  %v913_v8 = vld [vmem:[%s1326_s1 + $0x220] ss:$8 sps:$4 sm:$0xff]   ;;  %v919_v12 = vld [vmem:[%s1326_s1 + $0x230] ss:$8 sps:$4 sm:$0xff]  }
  0x19   :  { %624 = vmatprep.subr.bf16.mxu1 %v922_v33  ;;  %646 = vmatprep.mubr.bf16.mxu1 %v21_v1  ;;  %v976_v11 = vld [vmem:[%s1326_s1 + $0xe4] ss:$8 sps:$4 sm:$0xff]   ;;  %v978_v13 = vld [vmem:[%s1326_s1 + $0xe0] ss:$8 sps:$4 sm:$0xff]   ;;  %v984_v17 = vld [vmem:[%s1326_s1 + $0xf0] ss:$8 sps:$4 sm:$0xff]  }
  0x1a   :  { %v927_v14 = vld [vmem:[%s1326_s1 + $0x244] ss:$8 sps:$4 sm:$0xff]   ;;  %v933_v19 = vld [vmem:[%s1326_s1 + $0x254] ss:$8 sps:$4 sm:$0xff]   ;;  %v931_v21 = vld [vmem:[%s1326_s1 + $0x250] ss:$8 sps:$4 sm:$0xff]  }
  0x1b   :  { %668 = vmatpush1.bf16.msra.mxu0 %v867_v15  ;;  %v982_v15 = vld [vmem:[%s1326_s1 + $0xf4] ss:$8 sps:$4 sm:$0xff]   ;;  %v14_v18 = vld [vmem:[%s1327_s0] sm:$0xff]  ;;  %v943_v25 = vld [vmem:[%s1326_s1 + $0x270] ss:$8 sps:$4 sm:$0xff]  }
  0x1c   :  { %669 = vmatprep.subr.bf16.mxu0 %v868_v16  ;;  %625 = vmatpush1.bf16.msra.mxu1 %v924_v35  ;;  %v925_v16 = vld [vmem:[%s1326_s1 + $0x240] ss:$8 sps:$4 sm:$0xff]   ;;  %v939_v22 = vld [vmem:[%s1326_s1 + $0x264] ss:$8 sps:$4 sm:$0xff]   ;;  %v955_v29 = vld [vmem:[%s1326_s1 + $0x290] ss:$8 sps:$4 sm:$0xff]  }
  0x1d   :  { %626 = vmatprep.subr.bf16.mxu1 %v928_v37  ;;  %v937_v23 = vld [vmem:[%s1326_s1 + $0x260] ss:$8 sps:$4 sm:$0xff]   ;;  %v967_v33 = vld [vmem:[%s1326_s1 + $0x2b0] ss:$8 sps:$4 sm:$0xff]  }
  0x1e   :  { %v949_v27 = vld [vmem:[%s1326_s1 + $0x280] ss:$8 sps:$4 sm:$0xff]   ;;  %v979_v37 = vld [vmem:[%s1326_s1 + $0x2d0] ss:$8 sps:$4 sm:$0xff]  }
  0x1f   :  { %670 = vmatpush1.bf16.msra.mxu0 %v870_v20  ;;  %v20_v20 = vpack.c.bf16 %v14_v18, %v14_v18  ;;  %v961_v31 = vld [vmem:[%s1326_s1 + $0x2a0] ss:$8 sps:$4 sm:$0xff]  }
  0x20   :  { %671 = vmatprep.subr.bf16.mxu0 %v871_v24  ;;  %627 = vmatpush1.bf16.msra.mxu1 %v930_v39  ;;  %v945_v24 = vld [vmem:[%s1326_s1 + $0x274] ss:$8 sps:$4 sm:$0xff]   ;;  %v973_v35 = vld [vmem:[%s1326_s1 + $0x2c0] ss:$8 sps:$4 sm:$0xff]  }
  0x21   :  { %628 = vmatprep.subr.bf16.mxu1 %v934_v41  ;;  %v985_v39 = vld [vmem:[%s1326_s1 + $0x2e0] ss:$8 sps:$4 sm:$0xff]   ;;  %v988_v41 = vld [vmem:[%s1326_s1 + $0x2f0] ss:$8 sps:$4 sm:$0xff]  }
  0x23   :  { %672 = vmatpush1.bf16.msra.mxu0 %v873_v26  ;;  %v951_v26 = vld [vmem:[%s1326_s1 + $0x284] ss:$8 sps:$4 sm:$0xff]  }
  0x24   :  { %673 = vmatprep.subr.bf16.mxu0 %v874_v28  ;;  %629 = vmatpush1.bf16.msra.mxu1 %v936_v43  ;;  %v957_v28 = vld [vmem:[%s1326_s1 + $0x294] ss:$8 sps:$4 sm:$0xff]  }
  0x25   :  { %630 = vmatprep.subr.bf16.mxu1 %v940_v45 }
  0x27   :  { %674 = vmatpush1.bf16.msra.mxu0 %v876_v30  ;;  %v963_v30 = vld [vmem:[%s1326_s1 + $0x2a4] ss:$8 sps:$4 sm:$0xff]  }
  0x28   :  { %675 = vmatprep.subr.bf16.mxu0 %v877_v32  ;;  %631 = vmatpush1.bf16.msra.mxu1 %v942_v47  ;;  %v969_v32 = vld [vmem:[%s1326_s1 + $0x2b4] ss:$8 sps:$4 sm:$0xff]  }
  0x29   :  { %632 = vmatprep.subr.bf16.mxu1 %v946_v49 }
  0x2b   :  { %676 = vmatpush1.bf16.msra.mxu0 %v879_v34  ;;  %v975_v34 = vld [vmem:[%s1326_s1 + $0x2c4] ss:$8 sps:$4 sm:$0xff]  }
  0x2c   :  { %677 = vmatprep.subr.bf16.mxu0 %v880_v36  ;;  %633 = vmatpush1.bf16.msra.mxu1 %v948_v51  ;;  %v981_v36 = vld [vmem:[%s1326_s1 + $0x2d4] ss:$8 sps:$4 sm:$0xff]   ;;  %v122_v51 = vld [vmem:[%s1328_s2] sm:$0x3] }
  0x2d   :  { %634 = vmatprep.subr.bf16.mxu1 %v952_v53 }
  0x2f   :  { %678 = vmatpush1.bf16.msra.mxu0 %v882_v38  ;;  %v987_v38 = vld [vmem:[%s1326_s1 + $0x2e4] ss:$8 sps:$4 sm:$0xff]  }
  0x30   :  { %679 = vmatprep.subr.bf16.mxu0 %v883_v40  ;;  %635 = vmatpush1.bf16.msra.mxu1 %v954_v56  ;;  %v990_v40 = vld [vmem:[%s1326_s1 + $0x2f4] ss:$8 sps:$4 sm:$0xff]  }
  0x31   :  { %636 = vmatprep.subr.bf16.mxu1 %v958_v58 }
  0x33   :  { %680 = vmatpush1.bf16.msra.mxu0 %v885_v42  ;;  %v18_v42 = vld [vmem:[%s1327_s0 + $0x20] sm:$0xff] }
  0x34   :  { %681 = vmatprep.subr.bf16.mxu0 %v886_v44  ;;  %637 = vmatpush1.bf16.msra.mxu1 %v960_v62  ;;  %v24_v43 = vpack.c.bf16 %v18_v42, %v18_v42 }
  0x35   :  { %638 = vmatprep.subr.bf16.mxu1 %v964_v0 }
  0x37   :  { %682 = vmatpush1.bf16.msra.mxu0 %v888_v46 }
  0x38   :  { %683 = vmatprep.subr.bf16.mxu0 %v889_v48  ;;  %639 = vmatpush1.bf16.msra.mxu1 %v966_v5  ;;  %v124_v48 = vlaneseq }
  0x39   :  { %640 = vmatprep.subr.bf16.mxu1 %v970_v7 }
  0x3a   :  { %v125_v49 = vshrl.u32 %v124_v48, 7 }
  0x3b   :  { %684 = vmatpush1.bf16.msra.mxu0 %v891_v50 }
  0x3c   :  { %685 = vmatprep.subr.bf16.mxu0 %v895_v52  ;;  %641 = vmatpush1.bf16.msra.mxu1 %v972_v9  ;;  %v126_v50 = vsub.s32 0, %v125_v49  ;;  %v130_v52 = vsub.s32 1, %v125_v49 }
  0x3d   :  { %642 = vmatprep.subr.bf16.mxu1 %v976_v11 }
  0x3e   :  { %v127_v53 = vrot.slane %v122_v51, %v126_v50 }
  0x3f   :  { %686 = vmatpush1.bf16.msra.mxu0 %v897_v54  ;;  %v131_v54 = vrot.slane %v122_v51, %v130_v52 }
  0x40   :  { %696 = vmatprep.subr.bf16.mxu0 %v903_v57  ;;  %643 = vmatpush1.bf16.msra.mxu1 %v978_v13 }
  0x41   :  { %644 = vmatprep.subr.bf16.mxu1 %v982_v15 }
  0x42   :  { %688 = vmatmul.mubr.bf16.vlgmr.msra.gmra.mrb[0].mxu0 %v22_v60 }
  0x43   :  { %697 = vmatpush1.bf16.msra.mxu0 %v901_v59  ;;  %728 = vmatprep.mubr.bf16.mxu0 %v25_v3 }
  0x44   :  { %698 = vmatprep.subr.bf16.mxu0 %v909_v61  ;;  %645 = vmatpush1.bf16.msra.mxu1 %v984_v17 }
  0x47   :  { %699 = vmatpush1.bf16.msra.mxu0 %v907_v4  ;;  %647 = vmatmul.mubr.bf16.vlgmr.msra.gmra.mrb[0].mxu1 %v20_v20 }
  0x48   :  { %700 = vmatprep.subr.bf16.mxu0 %v915_v6 }
  0x4b   :  { %701 = vmatpush1.bf16.msra.mxu0 %v913_v8 }
  0x4c   :  { %702 = vmatprep.subr.bf16.mxu0 %v921_v10 }
  0x4f   :  { %703 = vmatpush1.bf16.msra.mxu0 %v919_v12 }
  0x50   :  { %704 = vmatprep.subr.bf16.mxu0 %v927_v14 }
  0x53   :  { %705 = vmatpush1.bf16.msra.mxu0 %v925_v16 }
  0x54   :  { %706 = vmatprep.subr.bf16.mxu0 %v933_v19 }
  0x57   :  { %707 = vmatpush1.bf16.msra.mxu0 %v931_v21 }
  0x58   :  { %708 = vmatprep.subr.bf16.mxu0 %v939_v22 }
  0x5b   :  { %709 = vmatpush1.bf16.msra.mxu0 %v937_v23 }
  0x5c   :  { %710 = vmatprep.subr.bf16.mxu0 %v945_v24 }
  0x5f   :  { %711 = vmatpush1.bf16.msra.mxu0 %v943_v25 }
  0x60   :  { %712 = vmatprep.subr.bf16.mxu0 %v951_v26 }
  0x63   :  { %713 = vmatpush1.bf16.msra.mxu0 %v949_v27 }
  0x64   :  { %714 = vmatprep.subr.bf16.mxu0 %v957_v28 }
  0x67   :  { %715 = vmatpush1.bf16.msra.mxu0 %v955_v29 }
  0x68   :  { %716 = vmatprep.subr.bf16.mxu0 %v963_v30 }
  0x6b   :  { %717 = vmatpush1.bf16.msra.mxu0 %v961_v31 }
  0x6c   :  { %718 = vmatprep.subr.bf16.mxu0 %v969_v32 }
  0x6f   :  { %719 = vmatpush1.bf16.msra.mxu0 %v967_v33 }
  0x70   :  { %720 = vmatprep.subr.bf16.mxu0 %v975_v34 }
  0x73   :  { %721 = vmatpush1.bf16.msra.mxu0 %v973_v35 }
  0x74   :  { %722 = vmatprep.subr.bf16.mxu0 %v981_v36 }
  0x77   :  { %723 = vmatpush1.bf16.msra.mxu0 %v979_v37 }
  0x78   :  { %724 = vmatprep.subr.bf16.mxu0 %v987_v38 }
  0x7b   :  { %725 = vmatpush1.bf16.msra.mxu0 %v985_v39 }
  0x7c   :  { %726 = vmatprep.subr.bf16.mxu0 %v990_v40 }
  0x7f   :  { %727 = vmatpush1.bf16.msra.mxu0 %v988_v41 }
  0x82   :  { %729 = vmatmul.mubr.bf16.vlgmr.msra.gmra.mrb[0].mxu0 %v24_v43 }
 0x11a   :  { %v648_v44 = vpop.f32.mrb[0].mxu1 }
 0x11b   :  { %v650_v45 = vpop.f32.mrb[1].mxu1  ;;  %v649_v55 = vadd.f32 %v648_v44, %v127_v53 }
 0x11c   :  { %v652_v46 = vpop.f32.mrb[2].mxu1  ;;  %v651_v56 = vadd.f32 %v650_v45, %v131_v54 }
 0x11d   :  { %v653_v47 = vpop.f32.mrb[3].mxu1 }
 0x155   :  { %v730_v57 = vpop.f32.mrb[0].mxu0 }
 0x156   :  { %v840_v58 = vadd.f32 %v730_v57, %v649_v55  ;;  %v732_v59 = vpop.f32.mrb[1].mxu0 }
 0x157   :  { %v842_v60 = vadd.f32 %v732_v59, %v651_v56  ;;  %v734_v61 = vpop.f32.mrb[2].mxu0 }
 0x158   :  { %737 = vst [vmem:[%s1329_s3] sm:$0xff] %v840_v58  ;;  %v735_v62 = vpop.f32.mrb[3].mxu0 }
 0x159   :  { %738 = vst [vmem:[%s1329_s3 + $0x8] sm:$0xff] %v842_v60 }

// kernel: conformer_vq_motion_forward.25
= control target key start
LH: loop header
LB: loop body
LE: loop exit
PB: predicated region body
PF: predicated region fallthrough
CT: control target
= control target key end

     0   :  { %v181_v0 = vmov 0.0   ;;  %vm182_vm0 = vmmov 0   ;;  %s236_s1 = inlined_call_operand.vmem [shape: bf16[128,128], index: 1, kind: input, shape index: {}]   ;;  %s237_s0 = inlined_call_operand.vmem [shape: f32[8,128], index: 0, kind: input, shape index: {}]   ;;  %s238_s2 = inlined_call_operand.vmem [shape: f32[1,128], index: 2, kind: input, shape index: {}]   ;;  %s239_s3 = inlined_call_operand.vmem [shape: f32[8,128], index: 3, kind: output, shape index: {}]  }
   0x1   :  { %151 = vmatprep.subr.bf16.mxu0 %v181_v0  ;;  %v173_v1 = vld [vmem:[%s236_s1] sm:$0xff]   ;;  %167 = vmatprep.mubr.msk.bf16.mxu0 %vm182_vm0, %v181_v0  ;;  %v174_v2 = vld [vmem:[%s236_s1 + $0x8] sm:$0xff]   ;;  %v175_v3 = vld [vmem:[%s236_s1 + $0x10] sm:$0xff]  }
   0x2   :  { %152 = vmatpush3.bf16.msra.mxu0 %v173_v1  ;;  %v176_v4 = vld [vmem:[%s236_s1 + $0x18] sm:$0xff]   ;;  %v177_v5 = vld [vmem:[%s236_s1 + $0x20] sm:$0xff]   ;;  %v178_v6 = vld [vmem:[%s236_s1 + $0x28] sm:$0xff]  }
   0x3   :  { %153 = vmatprep.subr.bf16.mxu0 %v181_v0  ;;  %v179_v7 = vld [vmem:[%s236_s1 + $0x30] sm:$0xff]   ;;  %v180_v8 = vld [vmem:[%s236_s1 + $0x38] sm:$0xff]   ;;  %v15_v9 = vld [vmem:[%s237_s0] sm:$0xff] }
   0x4   :  { %v16_v10 = vpack.c.bf16 %v15_v9, %v15_v9  ;;  %v133_v11 = vld [vmem:[%s238_s2] ss:$0 sm:$0xff] }
   0x6   :  { %154 = vmatpush3.bf16.msra.mxu0 %v174_v2 }
   0x7   :  { %155 = vmatprep.subr.bf16.mxu0 %v181_v0 }
   0xa   :  { %156 = vmatpush3.bf16.msra.mxu0 %v175_v3 }
   0xb   :  { %157 = vmatprep.subr.bf16.mxu0 %v181_v0 }
   0xe   :  { %158 = vmatpush3.bf16.msra.mxu0 %v176_v4 }
   0xf   :  { %159 = vmatprep.subr.bf16.mxu0 %v181_v0 }
  0x12   :  { %160 = vmatpush3.bf16.msra.mxu0 %v177_v5 }
  0x13   :  { %161 = vmatprep.subr.bf16.mxu0 %v181_v0 }
  0x16   :  { %162 = vmatpush3.bf16.msra.mxu0 %v178_v6 }
  0x17   :  { %163 = vmatprep.subr.bf16.mxu0 %v181_v0 }
  0x1a   :  { %164 = vmatpush3.bf16.msra.mxu0 %v179_v7 }
  0x1b   :  { %165 = vmatprep.subr.bf16.mxu0 %v181_v0 }
  0x1e   :  { %166 = vmatpush3.bf16.msra.mxu0 %v180_v8 }
  0x21   :  { %168 = vmatmul.mubr.bf16.vlgmr.msra.gmra.mrb[0].mxu0 %v16_v10 }
  0xf4   :  { %v122_v12 = vpop.f32.mrb[0].mxu0 }
  0xf5   :  { %v123_v13 = vadd.f32 %v133_v11, %v122_v12  ;;  %v169_v14 = vpop.f32.mrb[1].mxu0 }
  0xf6   :  { %v125_v15 = vpop.f32.mrb[2].mxu0 }
  0xf7   :  { %128 = vst [vmem:[%s239_s3] sm:$0xff] %v123_v13  ;;  %v170_v16 = vpop.f32.mrb[3].mxu0 }

// kernel: conformer_vq_motion_forward.20
= control target key start
LH: loop header
LB: loop body
LE: loop exit
PB: predicated region body
PF: predicated region fallthrough
CT: control target
= control target key end

     0   :  { %v407_v1 = vmov 0.0   ;;  %vm408_vm0 = vmmov 0   ;;  %s516_s1 = inlined_call_operand.vmem [shape: bf16[384,128], index: 1, kind: input, shape index: {}]   ;;  %s517_s0 = inlined_call_operand.vmem [shape: f32[8,384], index: 0, kind: input, shape index: {}]   ;;  %s518_s2 = inlined_call_operand.vmem [shape: f32[1,128], index: 2, kind: input, shape index: {}]   ;;  %s519_s3 = inlined_call_operand.vmem [shape: f32[8,128], index: 3, kind: output, shape index: {}]  }
   0x1   :  { %v383_v0 = vld [vmem:[%s516_s1 + $0x40] sm:$0xff]   ;;  %361 = vmatprep.subr.bf16.mxu1 %v407_v1  ;;  %377 = vmatprep.mubr.msk.bf16.mxu1 %vm408_vm0, %v407_v1  ;;  %v386_v4 = vld [vmem:[%s516_s1 + $0x48] sm:$0xff]   ;;  %v389_v7 = vld [vmem:[%s516_s1 + $0x50] sm:$0xff]  }
   0x2   :  { %v384_v2 = vld [vmem:[%s516_s1] sm:$0xff]   ;;  %330 = vmatprep.subr.bf16.mxu0 %v383_v0  ;;  %v387_v5 = vld [vmem:[%s516_s1 + $0x8] sm:$0xff]   ;;  %v390_v8 = vld [vmem:[%s516_s1 + $0x10] sm:$0xff]  }
   0x3   :  { %v385_v3 = vld [vmem:[%s516_s1 + $0x80] sm:$0xff]   ;;  %331 = vmatpush3.bf16.msra.mxu0 %v384_v2  ;;  %v388_v6 = vld [vmem:[%s516_s1 + $0x88] sm:$0xff]   ;;  %v391_v9 = vld [vmem:[%s516_s1 + $0x90] sm:$0xff]  }
   0x4   :  { %362 = vmatpush3.bf16.msra.mxu1 %v385_v3  ;;  %332 = vmatprep.subr.bf16.mxu0 %v386_v4  ;;  %v392_v10 = vld [vmem:[%s516_s1 + $0x58] sm:$0xff]   ;;  %v395_v13 = vld [vmem:[%s516_s1 + $0x60] sm:$0xff]   ;;  %v398_v16 = vld [vmem:[%s516_s1 + $0x68] sm:$0xff]  }
   0x5   :  { %363 = vmatprep.subr.bf16.mxu1 %v407_v1  ;;  %v393_v11 = vld [vmem:[%s516_s1 + $0x18] sm:$0xff]   ;;  %v396_v14 = vld [vmem:[%s516_s1 + $0x20] sm:$0xff]   ;;  %v399_v17 = vld [vmem:[%s516_s1 + $0x28] sm:$0xff]  }
   0x6   :  { %v394_v12 = vld [vmem:[%s516_s1 + $0x98] sm:$0xff]   ;;  %v397_v15 = vld [vmem:[%s516_s1 + $0xa0] sm:$0xff]   ;;  %v400_v18 = vld [vmem:[%s516_s1 + $0xa8] sm:$0xff]  }
   0x7   :  { %333 = vmatpush3.bf16.msra.mxu0 %v387_v5  ;;  %v401_v19 = vld [vmem:[%s516_s1 + $0x70] sm:$0xff]   ;;  %v16_v21 = vld [vmem:[%s517_s0 + $0x8] sm:$0xff]  ;;  %v404_v23 = vld [vmem:[%s516_s1 + $0x78] sm:$0xff]  }
   0x8   :  { %364 = vmatpush3.bf16.msra.mxu1 %v388_v6  ;;  %334 = vmatprep.subr.bf16.mxu0 %v389_v7  ;;  %v402_v20 = vld [vmem:[%s516_s1 + $0x30] sm:$0xff]   ;;  %v19_v24 = vpack.c.bf16 %v16_v21, %v16_v21  ;;  %v405_v25 = vld [vmem:[%s516_s1 + $0x38] sm:$0xff]   ;;  %v15_v26 = vld [vmem:[%s517_s0] sm:$0xff] }
   0x9   :  { %365 = vmatprep.subr.bf16.mxu1 %v407_v1  ;;  %v403_v22 = vld [vmem:[%s516_s1 + $0xb0] sm:$0xff]   ;;  %v406_v27 = vld [vmem:[%s516_s1 + $0xb8] sm:$0xff]   ;;  %v18_v29 = vpack.c.bf16 %v15_v26, %v15_v26  ;;  %v305_v33 = vld [vmem:[%s518_s2] ss:$0 sm:$0xff] }
   0xa   :  { %252 = vmatprep.mubr.bf16.mxu0 %v19_v24  ;;  %v17_v28 = vld [vmem:[%s517_s0 + $0x10] sm:$0xff] }
   0xb   :  { %335 = vmatpush3.bf16.msra.mxu0 %v390_v8  ;;  %v20_v30 = vpack.c.bf16 %v17_v28, %v17_v28 }
   0xc   :  { %366 = vmatpush3.bf16.msra.mxu1 %v391_v9  ;;  %336 = vmatprep.subr.bf16.mxu0 %v392_v10 }
   0xd   :  { %367 = vmatprep.subr.bf16.mxu1 %v407_v1 }
   0xf   :  { %337 = vmatpush3.bf16.msra.mxu0 %v393_v11 }
  0x10   :  { %368 = vmatpush3.bf16.msra.mxu1 %v394_v12  ;;  %338 = vmatprep.subr.bf16.mxu0 %v395_v13 }
  0x11   :  { %369 = vmatprep.subr.bf16.mxu1 %v407_v1 }
  0x13   :  { %339 = vmatpush3.bf16.msra.mxu0 %v396_v14 }
  0x14   :  { %370 = vmatpush3.bf16.msra.mxu1 %v397_v15  ;;  %340 = vmatprep.subr.bf16.mxu0 %v398_v16 }
  0x15   :  { %371 = vmatprep.subr.bf16.mxu1 %v407_v1 }
  0x17   :  { %341 = vmatpush3.bf16.msra.mxu0 %v399_v17 }
  0x18   :  { %372 = vmatpush3.bf16.msra.mxu1 %v400_v18  ;;  %342 = vmatprep.subr.bf16.mxu0 %v401_v19 }
  0x19   :  { %373 = vmatprep.subr.bf16.mxu1 %v407_v1 }
  0x1b   :  { %343 = vmatpush3.bf16.msra.mxu0 %v402_v20 }
  0x1c   :  { %374 = vmatpush3.bf16.msra.mxu1 %v403_v22  ;;  %344 = vmatprep.subr.bf16.mxu0 %v404_v23 }
  0x1d   :  { %375 = vmatprep.subr.bf16.mxu1 %v407_v1 }
  0x1f   :  { %345 = vmatpush3.bf16.msra.mxu0 %v405_v25 }
  0x20   :  { %376 = vmatpush3.bf16.msra.mxu1 %v406_v27 }
  0x22   :  { %253 = vmatmul.mubr.bf16.vlgmr.msra.gmra.mrb[0].mxu0 %v18_v29 }
  0x23   :  { %378 = vmatmul.mubr.bf16.vlgmr.msra.gmra.mrb[0].mxu1 %v20_v30 }
  0xf5   :  { %v346_v31 = vpop.f32.mrb[0].mxu0 }
  0xf6   :  { %v347_v32 = vpop.f32.mrb[1].mxu0  ;;  %v294_v34 = vpop.f32.mrb[0].mxu1 }
  0xf7   :  { %v348_v35 = vadd.f32 %v347_v32, %v346_v31  ;;  %v349_v36 = vpop.f32.mrb[2].mxu0  ;;  %v379_v37 = vpop.f32.mrb[1].mxu1 }
  0xf8   :  { %v350_v38 = vpop.f32.mrb[3].mxu0  ;;  %v297_v39 = vpop.f32.mrb[2].mxu1 }
  0xf9   :  { %v255_v40 = vadd.f32 %v348_v35, %v305_v33  ;;  %v380_v41 = vpop.f32.mrb[3].mxu1 }
  0xfb   :  { %v295_v42 = vadd.f32 %v294_v34, %v255_v40 }
  0xfd   :  { %300 = vst [vmem:[%s519_s3] sm:$0xff] %v295_v42 }

// kernel: conformer_vq_motion_forward.26
= control target key start
LH: loop header
LB: loop body
LE: loop exit
PB: predicated region body
PF: predicated region fallthrough
CT: control target
= control target key end

     0   :  { %v213_v1 = vmov 0   ;;  %v35_v19 = vlaneseq  ;;  %s294_s1 = inlined_call_operand.vmem [shape: bf16[128,256], index: 1, kind: input, shape index: {}]   ;;  %s295_s0 = inlined_call_operand.vmem [shape: f32[8,128], index: 0, kind: input, shape index: {}]   ;;  %s296_s2 = inlined_call_operand.vmem [shape: f32[1,256], index: 2, kind: input, shape index: {}]   ;;  %s297_s3 = inlined_call_operand.vmem [shape: f32[8,256], index: 3, kind: output, shape index: {}]  }
   0x1   :  { %v189_v0 = vld [vmem:[%s294_s1 + $0x4] ss:$8 sps:$4 sm:$0xff]   ;;  %157 = vmatprep.mubr.bf16.mxu0 %v213_v1  ;;  %v191_v2 = vld [vmem:[%s294_s1] ss:$8 sps:$4 sm:$0xff]   ;;  %v192_v3 = vld [vmem:[%s294_s1 + $0x14] ss:$8 sps:$4 sm:$0xff]  }
   0x2   :  { %125 = vmatprep.subr.bf16.mxu0 %v189_v0  ;;  %v194_v4 = vld [vmem:[%s294_s1 + $0x10] ss:$8 sps:$4 sm:$0xff]   ;;  %v195_v5 = vld [vmem:[%s294_s1 + $0x24] ss:$8 sps:$4 sm:$0xff]   ;;  %v197_v6 = vld [vmem:[%s294_s1 + $0x20] ss:$8 sps:$4 sm:$0xff]  }
   0x3   :  { %126 = vmatpush1.bf16.msra.mxu0 %v191_v2  ;;  %v198_v7 = vld [vmem:[%s294_s1 + $0x34] ss:$8 sps:$4 sm:$0xff]   ;;  %v200_v8 = vld [vmem:[%s294_s1 + $0x30] ss:$8 sps:$4 sm:$0xff]   ;;  %v201_v9 = vld [vmem:[%s294_s1 + $0x44] ss:$8 sps:$4 sm:$0xff]  }
   0x4   :  { %127 = vmatprep.subr.bf16.mxu0 %v192_v3  ;;  %v203_v10 = vld [vmem:[%s294_s1 + $0x40] ss:$8 sps:$4 sm:$0xff]   ;;  %v204_v11 = vld [vmem:[%s294_s1 + $0x54] ss:$8 sps:$4 sm:$0xff]   ;;  %v206_v12 = vld [vmem:[%s294_s1 + $0x50] ss:$8 sps:$4 sm:$0xff]  }
   0x5   :  { %v207_v13 = vld [vmem:[%s294_s1 + $0x64] ss:$8 sps:$4 sm:$0xff]   ;;  %v209_v14 = vld [vmem:[%s294_s1 + $0x60] ss:$8 sps:$4 sm:$0xff]   ;;  %v210_v15 = vld [vmem:[%s294_s1 + $0x74] ss:$8 sps:$4 sm:$0xff]  }
   0x6   :  { %v212_v16 = vld [vmem:[%s294_s1 + $0x70] ss:$8 sps:$4 sm:$0xff]   ;;  %v15_v17 = vld [vmem:[%s295_s0] sm:$0xff]  ;;  %v36_v20 = vshrl.u32 %v35_v19, 7 }
   0x7   :  { %128 = vmatpush1.bf16.msra.mxu0 %v194_v4  ;;  %v16_v18 = vpack.c.bf16 %v15_v17, %v15_v17  ;;  %v33_v22 = vld [vmem:[%s296_s2] sm:$0x3] }
   0x8   :  { %129 = vmatprep.subr.bf16.mxu0 %v195_v5  ;;  %v37_v21 = vsub.s32 0, %v36_v20  ;;  %v41_v23 = vsub.s32 1, %v36_v20 }
   0xa   :  { %v38_v24 = vrot.slane %v33_v22, %v37_v21  ;;  %v42_v25 = vrot.slane %v33_v22, %v41_v23 }
   0xb   :  { %130 = vmatpush1.bf16.msra.mxu0 %v197_v6 }
   0xc   :  { %131 = vmatprep.subr.bf16.mxu0 %v198_v7 }
   0xf   :  { %132 = vmatpush1.bf16.msra.mxu0 %v200_v8 }
  0x10   :  { %133 = vmatprep.subr.bf16.mxu0 %v201_v9 }
  0x13   :  { %134 = vmatpush1.bf16.msra.mxu0 %v203_v10 }
  0x14   :  { %135 = vmatprep.subr.bf16.mxu0 %v204_v11 }
  0x17   :  { %136 = vmatpush1.bf16.msra.mxu0 %v206_v12 }
  0x18   :  { %137 = vmatprep.subr.bf16.mxu0 %v207_v13 }
  0x1b   :  { %138 = vmatpush1.bf16.msra.mxu0 %v209_v14 }
  0x1c   :  { %139 = vmatprep.subr.bf16.mxu0 %v210_v15 }
  0x1f   :  { %140 = vmatpush1.bf16.msra.mxu0 %v212_v16 }
  0x22   :  { %158 = vmatmul.mubr.bf16.vlgmr.msra.gmra.mrb[0].mxu0 %v16_v18 }
  0xf5   :  { %v159_v26 = vpop.f32.mrb[0].mxu0 }
  0xf6   :  { %v160_v27 = vadd.f32 %v159_v26, %v38_v24  ;;  %v161_v28 = vpop.f32.mrb[1].mxu0 }
  0xf7   :  { %v162_v29 = vadd.f32 %v161_v28, %v42_v25  ;;  %v163_v30 = vpop.f32.mrb[2].mxu0 }
  0xf8   :  { %166 = vst [vmem:[%s297_s3] sm:$0xff] %v160_v27  ;;  %v164_v31 = vpop.f32.mrb[3].mxu0 }
  0xf9   :  { %167 = vst [vmem:[%s297_s3 + $0x8] sm:$0xff] %v162_v29 }

// kernel: conformer_vq_motion_forward.28
= control target key start
LH: loop header
LB: loop body
LE: loop exit
PB: predicated region body
PF: predicated region fallthrough
CT: control target
= control target key end

     0   :  { %s334_s1 = inlined_call_operand.vmem [shape: bf16[256,128], index: 1, kind: input, shape index: {}]   ;;  %s335_s0 = inlined_call_operand.vmem [shape: f32[8,256], index: 0, kind: input, shape index: {}]   ;;  %s336_s2 = inlined_call_operand.vmem [shape: f32[1,128], index: 2, kind: input, shape index: {}]   ;;  %s337_s3 = inlined_call_operand.vmem [shape: f32[8,128], index: 3, kind: output, shape index: {}]  }
   0x1   :  { %v238_v0 = vld [vmem:[%s334_s1 + $0x40] sm:$0xff]   ;;  %v240_v2 = vld [vmem:[%s334_s1 + $0x48] sm:$0xff]   ;;  %v242_v4 = vld [vmem:[%s334_s1 + $0x50] sm:$0xff]  }
   0x2   :  { %v239_v1 = vld [vmem:[%s334_s1] sm:$0xff]   ;;  %216 = vmatprep.subr.bf16.mxu0 %v238_v0  ;;  %v241_v3 = vld [vmem:[%s334_s1 + $0x8] sm:$0xff]   ;;  %v243_v5 = vld [vmem:[%s334_s1 + $0x10] sm:$0xff]  }
   0x3   :  { %217 = vmatpush3.bf16.msra.mxu0 %v239_v1  ;;  %v244_v6 = vld [vmem:[%s334_s1 + $0x58] sm:$0xff]   ;;  %v246_v8 = vld [vmem:[%s334_s1 + $0x60] sm:$0xff]   ;;  %v248_v10 = vld [vmem:[%s334_s1 + $0x68] sm:$0xff]  }
   0x4   :  { %218 = vmatprep.subr.bf16.mxu0 %v240_v2  ;;  %v245_v7 = vld [vmem:[%s334_s1 + $0x18] sm:$0xff]   ;;  %v247_v9 = vld [vmem:[%s334_s1 + $0x20] sm:$0xff]   ;;  %v16_v11 = vld [vmem:[%s335_s0 + $0x8] sm:$0xff] }
   0x5   :  { %v18_v12 = vpack.c.bf16 %v16_v11, %v16_v11  ;;  %v249_v13 = vld [vmem:[%s334_s1 + $0x28] sm:$0xff]   ;;  %v250_v14 = vld [vmem:[%s334_s1 + $0x70] sm:$0xff]   ;;  %v252_v16 = vld [vmem:[%s334_s1 + $0x78] sm:$0xff]  }
   0x6   :  { %v251_v15 = vld [vmem:[%s334_s1 + $0x30] sm:$0xff]   ;;  %v253_v17 = vld [vmem:[%s334_s1 + $0x38] sm:$0xff]   ;;  %v15_v18 = vld [vmem:[%s335_s0] sm:$0xff] }
   0x7   :  { %219 = vmatpush3.bf16.msra.mxu0 %v241_v3  ;;  %186 = vmatprep.mubr.bf16.mxu0 %v18_v12  ;;  %v17_v19 = vpack.c.bf16 %v15_v18, %v15_v18  ;;  %v199_v21 = vld [vmem:[%s336_s2] ss:$0 sm:$0xff] }
   0x8   :  { %220 = vmatprep.subr.bf16.mxu0 %v242_v4 }
   0xb   :  { %221 = vmatpush3.bf16.msra.mxu0 %v243_v5 }
   0xc   :  { %222 = vmatprep.subr.bf16.mxu0 %v244_v6 }
   0xf   :  { %223 = vmatpush3.bf16.msra.mxu0 %v245_v7 }
  0x10   :  { %224 = vmatprep.subr.bf16.mxu0 %v246_v8 }
  0x13   :  { %225 = vmatpush3.bf16.msra.mxu0 %v247_v9 }
  0x14   :  { %226 = vmatprep.subr.bf16.mxu0 %v248_v10 }
  0x17   :  { %227 = vmatpush3.bf16.msra.mxu0 %v249_v13 }
  0x18   :  { %228 = vmatprep.subr.bf16.mxu0 %v250_v14 }
  0x1b   :  { %229 = vmatpush3.bf16.msra.mxu0 %v251_v15 }
  0x1c   :  { %230 = vmatprep.subr.bf16.mxu0 %v252_v16 }
  0x1f   :  { %231 = vmatpush3.bf16.msra.mxu0 %v253_v17 }
  0x22   :  { %187 = vmatmul.mubr.bf16.vlgmr.msra.gmra.mrb[0].mxu0 %v17_v19 }
  0xf5   :  { %v232_v20 = vpop.f32.mrb[0].mxu0 }
  0xf6   :  { %v233_v22 = vpop.f32.mrb[1].mxu0 }
  0xf7   :  { %v234_v23 = vadd.f32 %v233_v22, %v232_v20  ;;  %v235_v24 = vpop.f32.mrb[2].mxu0 }
  0xf8   :  { %v236_v25 = vpop.f32.mrb[3].mxu0 }
  0xf9   :  { %v189_v26 = vadd.f32 %v234_v23, %v199_v21 }
  0xfb   :  { %194 = vst [vmem:[%s337_s3] sm:$0xff] %v189_v26 }

// kernel: conformer_vq_motion_forward.30
= control target key start
LH: loop header
LB: loop body
LE: loop exit
PB: predicated region body
PF: predicated region fallthrough
CT: control target
= control target key end

     0   :  { %s673_s15 = smov 0   ;;  %s774_s0 = inlined_call_operand.vmem [shape: f32[2,8,128], index: 0, kind: input, shape index: {}]   ;;  %s775_s1 = inlined_call_operand.vmem [shape: f32[128,128], index: 1, kind: input, shape index: {}]   ;;  %s776_s2 = inlined_call_operand.vmem [shape: f32[1,128], index: 2, kind: input, shape index: {}]   ;;  %s777_s3 = inlined_call_operand.vmem [shape: f32[1,128], index: 3, kind: input, shape index: {}]   ;;  %s778_s4 = inlined_call_operand.vmem [shape: f32[2,8,128], index: 4, kind: output, shape index: {}]  }
   0x1 LB: > { %s459_s16 = sadd.s32 4294967295, %s643_s15   ;;  %p463_p0 = scmp.ge.s32.totalorder %s643_s15, 1  ;;  %s643_s15 = sphi %s673_s15, %s14_s15  }
   0x2   : > { %p161_p1 = scmp.lt.s32.totalorder %s643_s15, 3 }
   0x4   : > { %p162_p2 = pnand %p463_p0, %p161_p1 }
   0x5   : > { %v207_v0 = vld [vmem:[%s775_s1] sm:$0xff] (!%p162_p2)  ;;  %v208_v1 = vld [vmem:[%s775_s1 + $0x8] sm:$0xff] (!%p162_p2)  ;;  %v209_v2 = vld [vmem:[%s775_s1 + $0x10] sm:$0xff] (!%p162_p2)  ;;  %v645_v3 = vmov (!%p162_p2), 0.0|0.0   ;;  %p185_p3 = scmp.lt.s32.totalorder (!%p162_p2), %s459_s16, 1  ;;  %vm646_vm0 = vmmov (!%p162_p2), 0   ;;  %v368_v47 = vlaneseq (!%p162_p2) }
   0x6   : > { %165 = sbr.rel (%p162_p2) target bundleno = 304 (0x130), region = 36  ;;  %574 = vmatprep.subr.bf16.mxu0 (!%p162_p2), %v645_v3  ;;  %v575_v4 = vpack.c.bf16 (!%p162_p2), %v208_v1, %v207_v0  ;;  %598 = vmatprep.subr.bf16.mxu1 (!%p162_p2), %v645_v3  ;;  %v210_v5 = vld [vmem:[%s775_s1 + $0x18] sm:$0xff] (!%p162_p2)  ;;  %v647_v6 = vmov (!%p162_p2), 0.0   ;;  %v211_v8 = vld [vmem:[%s775_s1 + $0x20] sm:$0xff] (!%p162_p2)  ;;  %v212_v9 = vld [vmem:[%s775_s1 + $0x28] sm:$0xff] (!%p162_p2) }
   0x7   : > { %536 = vmatprep.mubr.msk.f32.mxu0 (!%p162_p2), %vm646_vm0, %v647_v6  ;;  %571 = vmatprep.mubr.msk.f32.mxu1 (!%p162_p2), %vm646_vm0, %v647_v6  ;;  %v578_v7 = vpack.c.bf16 (!%p162_p2), %v210_v5, %v209_v2  ;;  %v581_v10 = vpack.c.bf16 (!%p162_p2), %v212_v9, %v211_v8  ;;  %v213_v12 = vld [vmem:[%s775_s1 + $0x30] sm:$0xff] (!%p162_p2)  ;;  %v214_v13 = vld [vmem:[%s775_s1 + $0x38] sm:$0xff] (!%p162_p2)  ;;  %v215_v18 = vld [vmem:[%s775_s1 + $0x40] sm:$0xff] (!%p162_p2)  ;;  %v369_v50 = vshrl.u32 (!%p162_p2), %v368_v47, 7 }
   0x8   : > { %576 = vmatpush3.bf16.msra.mxu0 (!%p162_p2), %v575_v4  ;;  %600 = vmatpush3.bf16.msra.mxu1 (!%p162_p2), %v575_v4  ;;  %v584_v17 = vpack.c.bf16 (!%p162_p2), %v214_v13, %v213_v12  ;;  %v216_v19 = vld [vmem:[%s775_s1 + $0x48] sm:$0xff] (!%p162_p2)  ;;  %v217_v23 = vld [vmem:[%s775_s1 + $0x50] sm:$0xff] (!%p162_p2)  ;;  %v218_v24 = vld [vmem:[%s775_s1 + $0x58] sm:$0xff] (!%p162_p2) }
   0x9   : > { %577 = vmatprep.subr.bf16.mxu0 (!%p162_p2), %v645_v3  ;;  %601 = vmatprep.subr.bf16.mxu1 (!%p162_p2), %v645_v3  ;;  %v587_v22 = vpack.c.bf16 (!%p162_p2), %v216_v19, %v215_v18  ;;  %v590_v27 = vpack.c.bf16 (!%p162_p2), %v218_v24, %v217_v23  ;;  %v219_v28 = vld [vmem:[%s775_s1 + $0x60] sm:$0xff] (!%p162_p2)  ;;  %v220_v29 = vld [vmem:[%s775_s1 + $0x68] sm:$0xff] (!%p162_p2)  ;;  %v221_v33 = vld [vmem:[%s775_s1 + $0x70] sm:$0xff] (!%p162_p2)  ;;  %v370_v51 = vsub.s32 (!%p162_p2), 0, %v369_v50 }
   0xa   : > { %v593_v32 = vpack.c.bf16 (!%p162_p2), %v220_v29, %v219_v28  ;;  %v222_v34 = vld [vmem:[%s775_s1 + $0x78] sm:$0xff] (!%p162_p2)  ;;  %v466_v56 = vld [vmem:[%s776_s2] ss:$0 sm:$0xff] (!%p162_p2) }
   0xb   : > { %v596_v37 = vpack.c.bf16 (!%p162_p2), %v222_v34, %v221_v33  ;;  %v467_v58 = vld [vmem:[%s777_s3] ss:$0 sm:$0xff] (!%p162_p2) }
   0xc   : > { %579 = vmatpush3.bf16.msra.mxu0 (!%p162_p2), %v578_v7  ;;  %603 = vmatpush3.bf16.msra.mxu1 (!%p162_p2), %v578_v7 }
   0xd   : > { %s780_s16 = smov (!%p185_p3, %s459_s16), 1  ;;  %580 = vmatprep.subr.bf16.mxu0 %v645_v3  ;;  %604 = vmatprep.subr.bf16.mxu1 %v645_v3 }
   0xe   : > { %s464_s29 = sshll.u32 %s780_s16, 3 }
   0xf   : > { %s188_s6 = scalar_lea.vmem %s774_s0, %s464_s29  ;;  %s192_s10 = scalar_lea.vmem %s778_s4, %s464_s29 }
  0x10   : > { %v711_v11 = vld [vmem:[%s188_s6] sm:$0xff]  ;;  %582 = vmatpush3.bf16.msra.mxu0 %v581_v10  ;;  %606 = vmatpush3.bf16.msra.mxu1 %v581_v10 }
  0x11   : > { %v200_v14 = vmul.f32 %v711_v11, %v711_v11  ;;  %v194_v15 = vrot.slane %v711_v11, 4  ;;  %583 = vmatprep.subr.bf16.mxu0 %v645_v3  ;;  %607 = vmatprep.subr.bf16.mxu1 %v645_v3 }
  0x13   : > { %v201_v16 = vrot.slane %v200_v14, 4  ;;  %v195_v20 = vadd.f32 %v194_v15, %v711_v11 }
  0x14   : > { %585 = vmatpush3.bf16.msra.mxu0 %v584_v17  ;;  %609 = vmatpush3.bf16.msra.mxu1 %v584_v17 }
  0x15   : > { %v202_v21 = vadd.f32 %v201_v16, %v200_v14  ;;  %586 = vmatprep.subr.bf16.mxu0 %v645_v3  ;;  %610 = vmatprep.subr.bf16.mxu1 %v645_v3  ;;  %v196_v25 = vrot.slane %v195_v20, 2 }
  0x17   : > { %v203_v26 = vrot.slane %v202_v21, 2  ;;  %v197_v30 = vadd.f32 %v196_v25, %v195_v20 }
  0x18   : > { %588 = vmatpush3.bf16.msra.mxu0 %v587_v22  ;;  %612 = vmatpush3.bf16.msra.mxu1 %v587_v22 }
  0x19   : > { %589 = vmatprep.subr.bf16.mxu0 %v645_v3  ;;  %613 = vmatprep.subr.bf16.mxu1 %v645_v3  ;;  %v204_v31 = vadd.f32 %v203_v26, %v202_v21  ;;  %v198_v35 = vrot.slane %v197_v30, 1 }
  0x1b   : > { %v205_v36 = vrot.slane %v204_v31, 1  ;;  %v199_v38 = vadd.f32 %v198_v35, %v197_v30 }
  0x1c   : > { %591 = vmatpush3.bf16.msra.mxu0 %v590_v27  ;;  %615 = vmatpush3.bf16.msra.mxu1 %v590_v27 }
  0x1d   : > { %592 = vmatprep.subr.bf16.mxu0 %v645_v3  ;;  %616 = vmatprep.subr.bf16.mxu1 %v645_v3  ;;  %v206_v39 = vadd.f32 %v205_v36, %v204_v31 }
  0x20   : > { %594 = vmatpush3.bf16.msra.mxu0 %v593_v32  ;;  %618 = vmatpush3.bf16.msra.mxu1 %v593_v32 }
  0x21   : > { %595 = vmatprep.subr.bf16.mxu0 %v645_v3  ;;  %619 = vmatprep.subr.bf16.mxu1 %v645_v3 }
  0x24   : > { %597 = vmatpush3.bf16.msra.mxu0 %v596_v37  ;;  %621 = vmatpush3.bf16.msra.mxu1 %v596_v37 }
  0x27   : > { %537 = vmatmul.mubr.f32.vlgmr.msra.gmra.mrb[0].mxu0 %v199_v38  ;;  %572 = vmatmul.mubr.f32.vlgmr.msra.gmra.mrb[0].mxu1 %v206_v39 }
  0xfa   : > { %v289_v40 = vpop.f32.mrb[0].mxu0  ;;  %v361_v41 = vpop.f32.mrb[0].mxu1 }
  0xfb   : > { %v294_v42 = vmul.f32 0.015625, %v289_v40  ;;  %v538_v43 = vpop.f32.mrb[1].mxu0  ;;  %v365_v44 = vmul.f32 0.015625, %v361_v41  ;;  %v573_v45 = vpop.f32.mrb[1].mxu1 }
  0xfd   : > { %v366_v46 = vmul.f32 %v294_v42, %v294_v42  ;;  %v371_v52 = vrot.slane %v294_v42, %v370_v51 }
  0xff   : > { %v367_v48 = vsub.f32 %v365_v44, %v366_v46  ;;  %v372_v54 = vsub.f32 %v711_v11, %v371_v52 }
 0x101   : > { %v373_v49 = vadd.f32 1e-05, %v367_v48 }
 0x103   : > { %633 = vrsqrt.f32 %v373_v49 }
 0x10d   : > { %v634_v53 = vpop.eup %633 }
 0x10e   : > { %v378_v55 = vrot.slane %v634_v53, %v370_v51 }
 0x110   : > { %v379_v57 = vmul.f32 %v378_v55, %v372_v54 }
 0x112   : > { %v387_v59 = vmul.f32 %v466_v56, %v379_v57 }
 0x114   : > { %v395_v60 = vadd.f32 %v467_v58, %v387_v59 }
 0x116   : > { %v397_v61 = vmul.f32 0.044715, %v395_v60  ;;  %v396_v3 = vmul.f32 0.5, %v395_v60 }
 0x118   : > { %v398_v62 = vmul.f32 %v397_v61, %v395_v60 }
 0x11a   : > { %v399_v63 = vmul.f32 %v398_v62, %v395_v60 }
 0x11c   : > { %v400_v0 = vadd.f32 %v399_v63, %v395_v60 }
 0x11e   : > { %v401_v1 = vmul.f32 0.7978846, %v400_v0 }
 0x120   : > { %635 = vtanh.f32 %v401_v1 }
 0x12a   : > { %v636_v2 = vpop.eup %635 }
 0x12b   : > { %v403_v4 = vadd.f32 1.0, %v636_v2 }
 0x12d   : > { %v404_v5 = vmul.f32 %v403_v4, %v396_v3 }
 0x12f   : > { %405 = vst [vmem:[%s192_s10] sm:$0xff] %v404_v5 }
 0x130 PF: > { %s14_s15 = sadd.s32 1, %s643_s15  }
 0x131   : > { %p11_p4 = scmp.ge.s32.totalorder %s14_s15, 4  }
 0x133   :  { %13 = sbr.rel (!%p11_p4) target bundleno = 1 (0x1), region = 66 }

// kernel: conformer_vq_motion_forward.29
= control target key start
LH: loop header
LB: loop body
LE: loop exit
PB: predicated region body
PF: predicated region fallthrough
CT: control target
= control target key end

     0   :  { %v413_v1 = vmov 0.0   ;;  %vm414_vm0 = vmmov 0   ;;  %s543_s1 = inlined_call_operand.vmem [shape: bf16[384,128], index: 1, kind: input, shape index: {}]   ;;  %s544_s0 = inlined_call_operand.vmem [shape: f32[16,384], index: 0, kind: input, shape index: {}]   ;;  %s545_s2 = inlined_call_operand.vmem [shape: f32[1,128], index: 2, kind: input, shape index: {}]   ;;  %s546_s3 = inlined_call_operand.vmem [shape: f32[16,128], index: 3, kind: output, shape index: {}]  }
   0x1   :  { %v389_v0 = vld [vmem:[%s543_s1 + $0x40] sm:$0xff]   ;;  %367 = vmatprep.subr.bf16.mxu1 %v413_v1  ;;  %383 = vmatprep.mubr.msk.bf16.mxu1 %vm414_vm0, %v413_v1  ;;  %v392_v4 = vld [vmem:[%s543_s1 + $0x48] sm:$0xff]   ;;  %v395_v7 = vld [vmem:[%s543_s1 + $0x50] sm:$0xff]  }
   0x2   :  { %v390_v2 = vld [vmem:[%s543_s1] sm:$0xff]   ;;  %336 = vmatprep.subr.bf16.mxu0 %v389_v0  ;;  %v393_v5 = vld [vmem:[%s543_s1 + $0x8] sm:$0xff]   ;;  %v396_v8 = vld [vmem:[%s543_s1 + $0x10] sm:$0xff]  }
   0x3   :  { %v391_v3 = vld [vmem:[%s543_s1 + $0x80] sm:$0xff]   ;;  %337 = vmatpush3.bf16.msra.mxu0 %v390_v2  ;;  %v394_v6 = vld [vmem:[%s543_s1 + $0x88] sm:$0xff]   ;;  %v397_v9 = vld [vmem:[%s543_s1 + $0x90] sm:$0xff]  }
   0x4   :  { %368 = vmatpush3.bf16.msra.mxu1 %v391_v3  ;;  %338 = vmatprep.subr.bf16.mxu0 %v392_v4  ;;  %v398_v10 = vld [vmem:[%s543_s1 + $0x58] sm:$0xff]   ;;  %v401_v13 = vld [vmem:[%s543_s1 + $0x60] sm:$0xff]   ;;  %v404_v16 = vld [vmem:[%s543_s1 + $0x68] sm:$0xff]  }
   0x5   :  { %369 = vmatprep.subr.bf16.mxu1 %v413_v1  ;;  %v399_v11 = vld [vmem:[%s543_s1 + $0x18] sm:$0xff]   ;;  %v402_v14 = vld [vmem:[%s543_s1 + $0x20] sm:$0xff]   ;;  %v405_v17 = vld [vmem:[%s543_s1 + $0x28] sm:$0xff]  }
   0x6   :  { %v400_v12 = vld [vmem:[%s543_s1 + $0x98] sm:$0xff]   ;;  %v403_v15 = vld [vmem:[%s543_s1 + $0xa0] sm:$0xff]   ;;  %v406_v18 = vld [vmem:[%s543_s1 + $0xa8] sm:$0xff]  }
   0x7   :  { %339 = vmatpush3.bf16.msra.mxu0 %v393_v5  ;;  %v407_v19 = vld [vmem:[%s543_s1 + $0x70] sm:$0xff]   ;;  %v16_v21 = vld [vmem:[%s544_s0 + $0x8] sm:$0xff]  ;;  %v19_v22 = vld [vmem:[%s544_s0 + $0x20] sm:$0xff] }
   0x8   :  { %370 = vmatpush3.bf16.msra.mxu1 %v394_v6  ;;  %340 = vmatprep.subr.bf16.mxu0 %v395_v7  ;;  %v408_v20 = vld [vmem:[%s543_s1 + $0x30] sm:$0xff]   ;;  %v410_v24 = vld [vmem:[%s543_s1 + $0x78] sm:$0xff]   ;;  %v22_v25 = vpack.c.bf16 %v19_v22, %v16_v21  ;;  %v15_v27 = vld [vmem:[%s544_s0] sm:$0xff] }
   0x9   :  { %371 = vmatprep.subr.bf16.mxu1 %v413_v1  ;;  %v409_v23 = vld [vmem:[%s543_s1 + $0xb0] sm:$0xff]   ;;  %v411_v26 = vld [vmem:[%s543_s1 + $0x38] sm:$0xff]   ;;  %v20_v31 = vld [vmem:[%s544_s0 + $0x28] sm:$0xff] }
   0xa   :  { %255 = vmatprep.mubr.bf16.mxu0 %v22_v25  ;;  %v18_v28 = vld [vmem:[%s544_s0 + $0x18] sm:$0xff]  ;;  %v17_v30 = vld [vmem:[%s544_s0 + $0x10] sm:$0xff]  ;;  %v311_v36 = vld [vmem:[%s545_s2] ss:$0 sm:$0xff] }
   0xb   :  { %341 = vmatpush3.bf16.msra.mxu0 %v396_v8  ;;  %v412_v29 = vld [vmem:[%s543_s1 + $0xb8] sm:$0xff]   ;;  %v21_v32 = vpack.c.bf16 %v18_v28, %v15_v27  ;;  %v23_v33 = vpack.c.bf16 %v20_v31, %v17_v30 }
   0xc   :  { %372 = vmatpush3.bf16.msra.mxu1 %v397_v9  ;;  %342 = vmatprep.subr.bf16.mxu0 %v398_v10 }
   0xd   :  { %373 = vmatprep.subr.bf16.mxu1 %v413_v1 }
   0xf   :  { %343 = vmatpush3.bf16.msra.mxu0 %v399_v11 }
  0x10   :  { %374 = vmatpush3.bf16.msra.mxu1 %v400_v12  ;;  %344 = vmatprep.subr.bf16.mxu0 %v401_v13 }
  0x11   :  { %375 = vmatprep.subr.bf16.mxu1 %v413_v1 }
  0x13   :  { %345 = vmatpush3.bf16.msra.mxu0 %v402_v14 }
  0x14   :  { %376 = vmatpush3.bf16.msra.mxu1 %v403_v15  ;;  %346 = vmatprep.subr.bf16.mxu0 %v404_v16 }
  0x15   :  { %377 = vmatprep.subr.bf16.mxu1 %v413_v1 }
  0x17   :  { %347 = vmatpush3.bf16.msra.mxu0 %v405_v17 }
  0x18   :  { %378 = vmatpush3.bf16.msra.mxu1 %v406_v18  ;;  %348 = vmatprep.subr.bf16.mxu0 %v407_v19 }
  0x19   :  { %379 = vmatprep.subr.bf16.mxu1 %v413_v1 }
  0x1b   :  { %349 = vmatpush3.bf16.msra.mxu0 %v408_v20 }
  0x1c   :  { %380 = vmatpush3.bf16.msra.mxu1 %v409_v23  ;;  %350 = vmatprep.subr.bf16.mxu0 %v410_v24 }
  0x1d   :  { %381 = vmatprep.subr.bf16.mxu1 %v413_v1 }
  0x1f   :  { %351 = vmatpush3.bf16.msra.mxu0 %v411_v26 }
  0x20   :  { %382 = vmatpush3.bf16.msra.mxu1 %v412_v29 }
  0x22   :  { %256 = vmatmul.mubr.bf16.vlgmr.msra.gmra.mrb[0].mxu0 %v21_v32 }
  0x23   :  { %384 = vmatmul.mubr.bf16.vlgmr.msra.gmra.mrb[0].mxu1 %v23_v33 }
  0xf5   :  { %v352_v34 = vpop.f32.mrb[0].mxu0 }
  0xf6   :  { %v353_v35 = vpop.f32.mrb[1].mxu0  ;;  %v298_v37 = vpop.f32.mrb[0].mxu1 }
  0xf7   :  { %v354_v38 = vadd.f32 %v353_v35, %v352_v34  ;;  %v355_v39 = vpop.f32.mrb[2].mxu0  ;;  %v385_v40 = vpop.f32.mrb[1].mxu1 }
  0xf8   :  { %v356_v41 = vpop.f32.mrb[3].mxu0  ;;  %v301_v42 = vpop.f32.mrb[2].mxu1 }
  0xf9   :  { %v258_v43 = vadd.f32 %v354_v38, %v311_v36  ;;  %v357_v44 = vadd.f32 %v356_v41, %v355_v39  ;;  %v386_v45 = vpop.f32.mrb[3].mxu1 }
  0xfb   :  { %v299_v46 = vadd.f32 %v298_v37, %v258_v43  ;;  %v261_v47 = vadd.f32 %v357_v44, %v311_v36 }
  0xfd   :  { %305 = vst [vmem:[%s546_s3] sm:$0xff] %v299_v46  ;;  %v302_v48 = vadd.f32 %v301_v42, %v261_v47 }
  0xff   :  { %306 = vst [vmem:[%s546_s3 + $0x8] sm:$0xff] %v302_v48 }

// kernel: conformer_vq_motion_forward.31
= control target key start
LH: loop header
LB: loop body
LE: loop exit
PB: predicated region body
PF: predicated region fallthrough
CT: control target
= control target key end

     0   :  { %v716_v2 = vmov 0   ;;  %s972_s0 = inlined_call_operand.vmem [shape: f32[32,384], index: 0, kind: input, shape index: {}]   ;;  %s973_s1 = inlined_call_operand.vmem [shape: bf16[384,256], index: 1, kind: input, shape index: {}]   ;;  %s974_s2 = inlined_call_operand.vmem [shape: f32[1,256], index: 2, kind: input, shape index: {}]   ;;  %s975_s3 = inlined_call_operand.hbm [shape: f32[32,256], index: 3, kind: output, shape index: {}]  }
   0x1   :  { %v604_v0 = vld [vmem:[%s973_s1 + $0x4] ss:$8 sps:$4 sm:$0xff]   ;;  %v606_v1 = vld [vmem:[%s973_s1] ss:$8 sps:$4 sm:$0xff]   ;;  %419 = vmatprep.mubr.bf16.mxu0 %v716_v2  ;;  %v607_v3 = vld [vmem:[%s973_s1 + $0x14] ss:$8 sps:$4 sm:$0xff]  }
   0x2   :  { %334 = vmatprep.subr.bf16.mxu1 %v604_v0  ;;  %v609_v4 = vld [vmem:[%s973_s1 + $0x10] ss:$8 sps:$4 sm:$0xff]   ;;  %v610_v5 = vld [vmem:[%s973_s1 + $0x24] ss:$8 sps:$4 sm:$0xff]   ;;  %v612_v6 = vld [vmem:[%s973_s1 + $0x20] ss:$8 sps:$4 sm:$0xff]  }
   0x3   :  { %335 = vmatpush1.bf16.msra.mxu1 %v606_v1  ;;  %v613_v7 = vld [vmem:[%s973_s1 + $0x34] ss:$8 sps:$4 sm:$0xff]   ;;  %v615_v8 = vld [vmem:[%s973_s1 + $0x30] ss:$8 sps:$4 sm:$0xff]   ;;  %v628_v9 = vld [vmem:[%s973_s1 + $0x104] ss:$8 sps:$4 sm:$0xff]  }
   0x4   :  { %336 = vmatprep.subr.bf16.mxu1 %v607_v3  ;;  %v616_v10 = vld [vmem:[%s973_s1 + $0x44] ss:$8 sps:$4 sm:$0xff]   ;;  %v632_v11 = vld [vmem:[%s973_s1 + $0x100] ss:$8 sps:$4 sm:$0xff]   ;;  %387 = vmatprep.subr.bf16.mxu0 %v628_v9  ;;  %v634_v12 = vld [vmem:[%s973_s1 + $0x114] ss:$8 sps:$4 sm:$0xff]  }
   0x5   :  { %388 = vmatpush1.bf16.msra.mxu0 %v632_v11  ;;  %v618_v13 = vld [vmem:[%s973_s1 + $0x40] ss:$8 sps:$4 sm:$0xff]   ;;  %v619_v14 = vld [vmem:[%s973_s1 + $0x54] ss:$8 sps:$4 sm:$0xff]   ;;  %v638_v15 = vld [vmem:[%s973_s1 + $0x110] ss:$8 sps:$4 sm:$0xff]  }
   0x6   :  { %389 = vmatprep.subr.bf16.mxu0 %v634_v12  ;;  %v640_v16 = vld [vmem:[%s973_s1 + $0x124] ss:$8 sps:$4 sm:$0xff]   ;;  %v621_v17 = vld [vmem:[%s973_s1 + $0x50] ss:$8 sps:$4 sm:$0xff]   ;;  %v644_v18 = vld [vmem:[%s973_s1 + $0x120] ss:$8 sps:$4 sm:$0xff]  }
   0x7   :  { %337 = vmatpush1.bf16.msra.mxu1 %v609_v4  ;;  %v646_v19 = vld [vmem:[%s973_s1 + $0x134] ss:$8 sps:$4 sm:$0xff]   ;;  %v622_v20 = vld [vmem:[%s973_s1 + $0x64] ss:$8 sps:$4 sm:$0xff]   ;;  %v650_v21 = vld [vmem:[%s973_s1 + $0x130] ss:$8 sps:$4 sm:$0xff]  }
   0x8   :  { %338 = vmatprep.subr.bf16.mxu1 %v610_v5  ;;  %v624_v22 = vld [vmem:[%s973_s1 + $0x60] ss:$8 sps:$4 sm:$0xff]   ;;  %v652_v23 = vld [vmem:[%s973_s1 + $0x144] ss:$8 sps:$4 sm:$0xff]   ;;  %v625_v24 = vld [vmem:[%s973_s1 + $0x74] ss:$8 sps:$4 sm:$0xff]  }
   0x9   :  { %390 = vmatpush1.bf16.msra.mxu0 %v638_v15  ;;  %v627_v25 = vld [vmem:[%s973_s1 + $0x70] ss:$8 sps:$4 sm:$0xff]   ;;  %v656_v26 = vld [vmem:[%s973_s1 + $0x140] ss:$8 sps:$4 sm:$0xff]   ;;  %v658_v27 = vld [vmem:[%s973_s1 + $0x154] ss:$8 sps:$4 sm:$0xff]  }
   0xa   :  { %391 = vmatprep.subr.bf16.mxu0 %v640_v16  ;;  %v630_v28 = vld [vmem:[%s973_s1 + $0x84] ss:$8 sps:$4 sm:$0xff]   ;;  %v662_v29 = vld [vmem:[%s973_s1 + $0x150] ss:$8 sps:$4 sm:$0xff]   ;;  %v633_v30 = vld [vmem:[%s973_s1 + $0x80] ss:$8 sps:$4 sm:$0xff]  }
   0xb   :  { %339 = vmatpush1.bf16.msra.mxu1 %v612_v6  ;;  %v664_v31 = vld [vmem:[%s973_s1 + $0x164] ss:$8 sps:$4 sm:$0xff]   ;;  %v636_v32 = vld [vmem:[%s973_s1 + $0x94] ss:$8 sps:$4 sm:$0xff]   ;;  %v668_v36 = vld [vmem:[%s973_s1 + $0x160] ss:$8 sps:$4 sm:$0xff]  }
   0xc   :  { %340 = vmatprep.subr.bf16.mxu1 %v613_v7  ;;  %v17_v33 = vld [vmem:[%s972_s0 + $0x8] sm:$0xff]  ;;  %v20_v34 = vld [vmem:[%s972_s0 + $0x20] sm:$0xff]  ;;  %v639_v37 = vld [vmem:[%s973_s1 + $0x90] ss:$8 sps:$4 sm:$0xff]  }
   0xd   :  { %392 = vmatpush1.bf16.msra.mxu0 %v644_v18  ;;  %v29_v35 = vpack.c.bf16 %v20_v34, %v17_v33  ;;  %v670_v38 = vld [vmem:[%s973_s1 + $0x174] ss:$8 sps:$4 sm:$0xff]   ;;  %v642_v39 = vld [vmem:[%s973_s1 + $0xa4] ss:$8 sps:$4 sm:$0xff]  }
   0xe   :  { %393 = vmatprep.subr.bf16.mxu0 %v646_v19 }
   0xf   :  { %341 = vmatpush1.bf16.msra.mxu1 %v615_v8  ;;  %366 = vmatprep.mubr.bf16.mxu1 %v29_v35 }
  0x10   :  { %342 = vmatprep.subr.bf16.mxu1 %v616_v10 }
  0x11   :  { %394 = vmatpush1.bf16.msra.mxu0 %v650_v21 }
  0x12   :  { %395 = vmatprep.subr.bf16.mxu0 %v652_v23 }
  0x13   :  { %343 = vmatpush1.bf16.msra.mxu1 %v618_v13 }
  0x14   :  { %344 = vmatprep.subr.bf16.mxu1 %v619_v14 }
  0x15   :  { %396 = vmatpush1.bf16.msra.mxu0 %v656_v26 }
  0x16   :  { %397 = vmatprep.subr.bf16.mxu0 %v658_v27 }
  0x17   :  { %345 = vmatpush1.bf16.msra.mxu1 %v621_v17 }
  0x18   :  { %346 = vmatprep.subr.bf16.mxu1 %v622_v20 }
  0x19   :  { %398 = vmatpush1.bf16.msra.mxu0 %v662_v29 }
  0x1a   :  { %399 = vmatprep.subr.bf16.mxu0 %v664_v31 }
  0x1b   :  { %347 = vmatpush1.bf16.msra.mxu1 %v624_v22 }
  0x1c   :  { %348 = vmatprep.subr.bf16.mxu1 %v625_v24 }
  0x1f   :  { %349 = vmatpush1.bf16.msra.mxu1 %v627_v25 }
  0x20   :  { %350 = vmatprep.subr.bf16.mxu1 %v630_v28 }
  0x23   :  { %351 = vmatpush1.bf16.msra.mxu1 %v633_v30 }
  0x24   :  { %352 = vmatprep.subr.bf16.mxu1 %v636_v32 }
  0x25   :  { %8 = vsyncpa [#allocation3], 0  ;;  %400 = vmatpush1.bf16.msra.mxu0 %v668_v36  ;;  %v674_v40 = vld [vmem:[%s973_s1 + $0x170] ss:$8 sps:$4 sm:$0xff]   ;;  %v21_v42 = vld [vmem:[%s972_s0 + $0x28] sm:$0xff]  ;;  %v84_v7 = vlaneseq }
  0x26   :  { %v18_v41 = vld [vmem:[%s972_s0 + $0x10] sm:$0xff]  ;;  %v645_v43 = vld [vmem:[%s973_s1 + $0xa0] ss:$8 sps:$4 sm:$0xff]   ;;  %401 = vmatprep.subr.bf16.mxu0 %v670_v38  ;;  %v654_v47 = vld [vmem:[%s973_s1 + $0xc4] ss:$8 sps:$4 sm:$0xff]  }
  0x27   :  { %353 = vmatpush1.bf16.msra.mxu1 %v639_v37  ;;  %v648_v44 = vld [vmem:[%s973_s1 + $0xb4] ss:$8 sps:$4 sm:$0xff]   ;;  %v30_v45 = vpack.c.bf16 %v21_v42, %v18_v41  ;;  %v651_v46 = vld [vmem:[%s973_s1 + $0xb0] ss:$8 sps:$4 sm:$0xff]   ;;  %v24_v48 = vld [vmem:[%s972_s0 + $0x40] sm:$0xff]  ;;  %v85_v10 = vshrl.u32 %v84_v7, 7 }
  0x28   :  { %354 = vmatprep.subr.bf16.mxu1 %v642_v39  ;;  %v27_v49 = vld [vmem:[%s972_s0 + $0x58] sm:$0xff]  ;;  %v657_v50 = vld [vmem:[%s973_s1 + $0xc0] ss:$8 sps:$4 sm:$0xff]   ;;  %v666_v54 = vld [vmem:[%s973_s1 + $0xe4] ss:$8 sps:$4 sm:$0xff]  }
  0x29   :  { %402 = vmatpush1.bf16.msra.mxu0 %v674_v40  ;;  %v660_v51 = vld [vmem:[%s973_s1 + $0xd4] ss:$8 sps:$4 sm:$0xff]   ;;  %v33_v52 = vpack.c.bf16 %v27_v49, %v24_v48  ;;  %v663_v53 = vld [vmem:[%s973_s1 + $0xd0] ss:$8 sps:$4 sm:$0xff]   ;;  %v669_v55 = vld [vmem:[%s973_s1 + $0xe0] ss:$8 sps:$4 sm:$0xff]  }
  0x2a   :  { %v672_v56 = vld [vmem:[%s973_s1 + $0xf4] ss:$8 sps:$4 sm:$0xff]   ;;  %v675_v57 = vld [vmem:[%s973_s1 + $0xf0] ss:$8 sps:$4 sm:$0xff]   ;;  %v16_v58 = vld [vmem:[%s972_s0] sm:$0xff]  ;;  %v86_v13 = vsub.s32 0, %v85_v10 }
  0x2b   :  { %355 = vmatpush1.bf16.msra.mxu1 %v645_v43  ;;  %v19_v59 = vld [vmem:[%s972_s0 + $0x18] sm:$0xff]  ;;  %v26_v61 = vld [vmem:[%s972_s0 + $0x50] sm:$0xff]  ;;  %v25_v1 = vld [vmem:[%s972_s0 + $0x48] sm:$0xff]  ;;  %v90_v15 = vsub.s32 1, %v85_v10 }
  0x2c   :  { %356 = vmatprep.subr.bf16.mxu1 %v648_v44  ;;  %420 = vmatmul.mubr.bf16.vlgmr.msra.gmra.mrb[0].mxu0 %v30_v45  ;;  %v23_v60 = vld [vmem:[%s972_s0 + $0x38] sm:$0xff]  ;;  %v28_v62 = vpack.c.bf16 %v19_v59, %v16_v58  ;;  %v22_v0 = vld [vmem:[%s972_s0 + $0x30] sm:$0xff]  ;;  %v82_v14 = vld [vmem:[%s974_s2] sm:$0x3]  ;;  %s717_s0 = smov [#allocation2]  }
  0x2d   :  { %429 = vmatprep.mubr.bf16.mxu0 %v716_v2  ;;  %v32_v63 = vpack.c.bf16 %v26_v61, %v23_v60  ;;  %v31_v2 = vpack.c.bf16 %v25_v1, %v22_v0  ;;  %v87_v16 = vrot.slane %v82_v14, %v86_v13  ;;  %v91_v17 = vrot.slane %v82_v14, %v90_v15  ;;  %s525_s2 = sshll.u32 %s717_s0, 4  ;;  %s526_s2 = int_to_ptr.vmem [resolvable:$true] %s525_s2 }
  0x2e   :  { %s692_s25 = scalar_lea.vmem %s526_s2, 1024  ;;  %p697_p1 = scmp.lt.s32.totalorder %s526_s2, %s526_s2 }
  0x2f   :  { %357 = vmatpush1.bf16.msra.mxu1 %v651_v46  ;;  %p693_p0 = scmp.ne.s32.totalorder %s526_s2, %s692_s25  ;;  %p698_p2 = scmp.lt.s32.totalorder %s692_s25, %s692_s25 }
  0x30   :  { %358 = vmatprep.subr.bf16.mxu1 %v654_v47 }
  0x31   :  { %p699_p3 = por %p698_p2, %p697_p1 }
  0x33   :  { %359 = vmatpush1.bf16.msra.mxu1 %v657_v50  ;;  %p700_p4 = pnand %p699_p3, %p693_p0 }
  0x34   :  { %360 = vmatprep.subr.bf16.mxu1 %v660_v51  ;;  %430 = vmatmul.mubr.bf16.gmra.mrb[4].mxu0 %v33_v52 }
  0x37   :  { %361 = vmatpush1.bf16.msra.mxu1 %v663_v53 }
  0x38   :  { %362 = vmatprep.subr.bf16.mxu1 %v666_v54 }
  0x3b   :  { %363 = vmatpush1.bf16.msra.mxu1 %v669_v55 }
  0x3c   :  { %364 = vmatprep.subr.bf16.mxu1 %v672_v56 }
  0x3f   :  { %365 = vmatpush1.bf16.msra.mxu1 %v675_v57 }
  0x42   :  { %367 = vmatmul.mubr.bf16.vlgmr.msra.gmra.mrb[0].mxu1 %v28_v62 }
  0x43   :  { %376 = vmatprep.mubr.bf16.mxu1 %v32_v63 }
  0x4a   :  { %377 = vmatmul.mubr.bf16.gmra.mrb[4].mxu1 %v31_v2 }
  0xff   :  { %v421_v3 = vpop.f32.mrb[0].mxu0 }
 0x100   :  { %v423_v4 = vpop.f32.mrb[1].mxu0 }
 0x101   :  { %v425_v5 = vpop.f32.mrb[2].mxu0 }
 0x102   :  { %v427_v6 = vpop.f32.mrb[3].mxu0 }
 0x107   :  { %v431_v8 = vpop.f32.mrb[4].mxu0 }
 0x108   :  { %v433_v9 = vpop.f32.mrb[5].mxu0 }
 0x109   :  { %v435_v11 = vpop.f32.mrb[6].mxu0 }
 0x10a   :  { %v437_v12 = vpop.f32.mrb[7].mxu0 }
 0x115   :  { %v368_v18 = vpop.f32.mrb[0].mxu1 }
 0x116   :  { %v369_v19 = vadd.f32 %v368_v18, %v87_v16  ;;  %v370_v20 = vpop.f32.mrb[1].mxu1 }
 0x117   :  { %v371_v21 = vadd.f32 %v370_v20, %v91_v17  ;;  %v372_v22 = vpop.f32.mrb[2].mxu1 }
 0x118   :  { %v925_v23 = vadd.f32 %v421_v3, %v369_v19  ;;  %v373_v24 = vadd.f32 %v372_v22, %v87_v16  ;;  %v374_v25 = vpop.f32.mrb[3].mxu1 }
 0x119   :  { %v927_v26 = vadd.f32 %v423_v4, %v371_v21  ;;  %v375_v27 = vadd.f32 %v374_v25, %v91_v17 }
 0x11a   :  { %v448_v28 = vmul.f32 0.044715, %v925_v23  ;;  %v930_v29 = vadd.f32 %v425_v5, %v373_v24  ;;  %v440_v19 = vmul.f32 0.5, %v925_v23 }
 0x11b   :  { %v449_v30 = vmul.f32 0.044715, %v927_v26  ;;  %v933_v31 = vadd.f32 %v427_v6, %v375_v27  ;;  %v441_v24 = vmul.f32 0.5, %v927_v26 }
 0x11c   :  { %v456_v32 = vmul.f32 %v448_v28, %v925_v23  ;;  %v450_v33 = vmul.f32 0.044715, %v930_v29 }
 0x11d   :  { %v457_v34 = vmul.f32 %v449_v30, %v927_v26  ;;  %v451_v35 = vmul.f32 0.044715, %v933_v31  ;;  %v378_v36 = vpop.f32.mrb[4].mxu1  ;;  %v442_v30 = vmul.f32 0.5, %v930_v29 }
 0x11e   :  { %v464_v37 = vmul.f32 %v456_v32, %v925_v23  ;;  %v458_v38 = vmul.f32 %v450_v33, %v930_v29  ;;  %v379_v39 = vadd.f32 %v378_v36, %v87_v16  ;;  %v380_v40 = vpop.f32.mrb[5].mxu1 }
 0x11f   :  { %v465_v41 = vmul.f32 %v457_v34, %v927_v26  ;;  %v459_v42 = vmul.f32 %v451_v35, %v933_v31  ;;  %v381_v43 = vadd.f32 %v380_v40, %v91_v17  ;;  %v382_v44 = vpop.f32.mrb[6].mxu1  ;;  %v443_v34 = vmul.f32 0.5, %v933_v31 }
 0x120   :  { %v472_v45 = vadd.f32 %v464_v37, %v925_v23  ;;  %v466_v46 = vmul.f32 %v458_v38, %v930_v29  ;;  %v945_v47 = vadd.f32 %v431_v8, %v379_v39  ;;  %v383_v48 = vadd.f32 %v382_v44, %v87_v16  ;;  %v384_v49 = vpop.f32.mrb[7].mxu1 }
 0x121   :  { %v473_v50 = vadd.f32 %v465_v41, %v927_v26  ;;  %v467_v51 = vmul.f32 %v459_v42, %v933_v31  ;;  %v434_v52 = vadd.f32 %v433_v9, %v381_v43  ;;  %v385_v53 = vadd.f32 %v384_v49, %v91_v17 }
 0x122   :  { %v480_v54 = vmul.f32 0.7978846, %v472_v45  ;;  %v474_v55 = vadd.f32 %v466_v46, %v930_v29  ;;  %v452_v56 = vmul.f32 0.044715, %v945_v47  ;;  %v436_v62 = vadd.f32 %v435_v11, %v383_v48 }
 0x123   :  { %v481_v57 = vmul.f32 0.7978846, %v473_v50  ;;  %v475_v58 = vadd.f32 %v467_v51, %v933_v31  ;;  %v453_v59 = vmul.f32 0.044715, %v434_v52  ;;  %v438_v1 = vadd.f32 %v437_v12, %v385_v53 }
 0x124   :  { %676 = vtanh.f32 %v480_v54  ;;  %v482_v60 = vmul.f32 0.7978846, %v474_v55  ;;  %v460_v61 = vmul.f32 %v452_v56, %v945_v47  ;;  %v454_v3 = vmul.f32 0.044715, %v436_v62 }
 0x125   :  { %678 = vtanh.f32 %v481_v57  ;;  %v483_v63 = vmul.f32 0.7978846, %v475_v58  ;;  %v461_v0 = vmul.f32 %v453_v59, %v434_v52  ;;  %v455_v5 = vmul.f32 0.044715, %v438_v1 }
 0x126   :  { %680 = vtanh.f32 %v482_v60  ;;  %v468_v2 = vmul.f32 %v460_v61, %v945_v47  ;;  %v462_v7 = vmul.f32 %v454_v3, %v436_v62  ;;  %v444_v38 = vmul.f32 0.5, %v945_v47 }
 0x127   :  { %682 = vtanh.f32 %v483_v63  ;;  %v469_v4 = vmul.f32 %v461_v0, %v434_v52  ;;  %v463_v9 = vmul.f32 %v455_v5, %v438_v1  ;;  %v445_v40 = vmul.f32 0.5, %v434_v52 }
 0x128   :  { %v476_v6 = vadd.f32 %v468_v2, %v945_v47  ;;  %v470_v13 = vmul.f32 %v462_v7, %v436_v62  ;;  %v446_v44 = vmul.f32 0.5, %v436_v62  ;;  %v447_v46 = vmul.f32 0.5, %v438_v1 }
 0x129   :  { %v477_v8 = vadd.f32 %v469_v4, %v434_v52  ;;  %v471_v11 = vmul.f32 %v463_v9, %v438_v1 }
 0x12a   :  { %v484_v10 = vmul.f32 0.7978846, %v476_v6  ;;  %v478_v15 = vadd.f32 %v470_v13, %v436_v62 }
 0x12b   :  { %v485_v14 = vmul.f32 0.7978846, %v477_v8  ;;  %v479_v12 = vadd.f32 %v471_v11, %v438_v1 }
 0x12c   :  { %684 = vtanh.f32 %v484_v10  ;;  %v486_v17 = vmul.f32 0.7978846, %v478_v15 }
 0x12d   :  { %686 = vtanh.f32 %v485_v14  ;;  %v487_v21 = vmul.f32 0.7978846, %v479_v12 }
 0x12e   :  { %v677_v16 = vpop.eup %676  ;;  %688 = vtanh.f32 %v486_v17 }
 0x12f   :  { %v679_v18 = vpop.eup %678  ;;  %v496_v20 = vadd.f32 1.0, %v677_v16  ;;  %690 = vtanh.f32 %v487_v21 }
 0x130   :  { %v681_v22 = vpop.eup %680  ;;  %v497_v25 = vadd.f32 1.0, %v679_v18 }
 0x131   :  { %v683_v27 = vpop.eup %682  ;;  %v504_v28 = vmul.f32 %v496_v20, %v440_v19  ;;  %v498_v32 = vadd.f32 1.0, %v681_v22 }
 0x132   :  { %v505_v33 = vmul.f32 %v497_v25, %v441_v24  ;;  %v499_v35 = vadd.f32 1.0, %v683_v27 }
 0x133   :  { %512 = vst [vmem:[#allocation2] sm:$0xff] %v504_v28  ;;  %v506_v36 = vmul.f32 %v498_v32, %v442_v30 }
 0x134   :  { %513 = vst [vmem:[#allocation2 + $0x8] sm:$0xff] %v505_v33  ;;  %v507_v23 = vmul.f32 %v499_v35, %v443_v34 }
 0x135   :  { %514 = vst [vmem:[#allocation2 + $0x10] sm:$0xff] %v506_v36 }
 0x136   :  { %v685_v37 = vpop.eup %684  ;;  %515 = vst [vmem:[#allocation2 + $0x18] sm:$0xff] %v507_v23 }
 0x137   :  { %v687_v26 = vpop.eup %686  ;;  %v500_v39 = vadd.f32 1.0, %v685_v37 }
 0x138   :  { %v501_v41 = vadd.f32 1.0, %v687_v26  ;;  %v689_v42 = vpop.eup %688 }
 0x139   :  { %v508_v29 = vmul.f32 %v500_v39, %v444_v38  ;;  %v691_v31 = vpop.eup %690  ;;  %v502_v45 = vadd.f32 1.0, %v689_v42 }
 0x13a   :  { %v509_v43 = vmul.f32 %v501_v41, %v445_v40  ;;  %v503_v48 = vadd.f32 1.0, %v691_v31 }
 0x13b   :  { %516 = vst [vmem:[#allocation2 + $0x20] sm:$0xff] %v508_v29  ;;  %v510_v49 = vmul.f32 %v502_v45, %v446_v44 }
 0x13c   :  { %517 = vst [vmem:[#allocation2 + $0x28] sm:$0xff] %v509_v43  ;;  %v511_v50 = vmul.f32 %v503_v48, %v447_v46 }
 0x13d   :  { %518 = vst [vmem:[#allocation2 + $0x30] sm:$0xff] %v510_v49 }
 0x13e   :  { %519 = vst [vmem:[#allocation2 + $0x38] sm:$0xff] %v511_v50 }
 0x13f   :  { %703 = shalt.err (!%p700_p4)
}
 0x140   :  { %s704_s28 = scalar_lea.hbm %s975_s3, 1024 }
 0x141   :  { %p705_p5 = scmp.ne.s32.totalorder %s975_s3, %s704_s28  ;;  %p708_p6 = scmp.lt.u32.totalorder %s704_s28, %s975_s3 }
 0x143   :  { %p710_p7 = pnand %p708_p6, %p705_p5 }
 0x145   :  { %713 = shalt.err (!%p710_p7)
}
 0x146   :  { %s718_s6 = smov 256   ;;  %s719_s7 = smov 16  }
 0x147   :  { %531 = dma.vmem_to_hbm [thread:$0]  %s526_s2, 1024, %s975_s3, [#allocation3], %s718_s6, %s718_s6, %s719_s7  }
 0x148   :  { %714 = dma.done.wait [#allocation3], 1024  }
 0x149   :  { %715 = vsyncadd [#allocation3], 4294966272 }
 0x14a   :  { %535 = vsyncpa [#allocation3], 1 }

</bundles_post_ra>
